<compile_context>
chip_gen: v6e
topology: v6e:2x2x1
jax: 0.10.0
libtpu: 0.0.40
codegen_flags: <defaults>
</compile_context>

<pallas_src>
import functools
import math
import numpy as np
import jax
import jax.numpy as jnp
from jax.experimental import pallas as pl
from jax.experimental.pallas import tpu as pltpu

ELMO_DIM = 256                       # module hard-codes 768; small stand-in
LABEL_SIZE = 16
LATENT_SIZE = int(math.sqrt(LABEL_SIZE))   # latent_size == 0 branch


# ---------------------------------------------------------------- glue utils
def token_lens_to_idxs(token_lens):
    """Identical to the reference PyTorch helper."""
    max_token_num = max([len(x) for x in token_lens])
    max_token_len = max([max(x) for x in token_lens])
    idxs, masks = ([], [])
    for seq_token_lens in token_lens:
        seq_idxs, seq_masks = ([], [])
        offset = 0
        for token_len in seq_token_lens:
            seq_idxs.extend([i + offset for i in range(token_len)]
                            + [-1] * (max_token_len - token_len))
            seq_masks.extend([1.0 / token_len] * token_len
                             + [0.0] * (max_token_len - token_len))
            offset += token_len
        seq_idxs.extend([-1] * max_token_len * (max_token_num - len(seq_token_lens)))
        seq_masks.extend([0.0] * max_token_len * (max_token_num - len(seq_token_lens)))
        idxs.append(seq_idxs)
        masks.append(seq_masks)
    return (idxs, masks, max_token_num, max_token_len)


def _round_up(x, m):
    return ((x + m - 1) // m) * m


def _log_sigmoid(x):
    # numerically stable log(sigmoid(x)) = min(x, 0) - log1p(exp(-|x|))
    return jnp.minimum(x, 0.0) - jnp.log1p(jnp.exp(-jnp.abs(x)))


# ---------------------------------------------------------------- the kernel
def hfet_kernel(x_ref, msk_ref, y_ref, g_ref, gt_ref,
                w_men_m_ref, w_men_o_ref, w_ctx_c_ref, w_ctx_m_ref,
                w_ctx_d_ref, w_ctx_o_ref,
                w_head_m_ref, w_head_c_ref,
                scalar_ref,
                logits_ref, latent_ref, loss_ref, *, num_labels):
    f32 = jnp.float32
    bf16 = jnp.bfloat16

    n_rows = x_ref.shape[0]              # b_tile * s_pad flattened (mention, token) rows
    b_tile = g_ref.shape[0]
    s_pad = n_rows // b_tile
    lp = logits_ref.shape[-1]            # label dim padded to a multiple of 128

    x = x_ref[...]                       # (N, D) f32
    xb = x.astype(bf16)                  # bf16 MXU operands, f32 accumulation
    men_bias = msk_ref[:, 0:1]           # (N, 1)  -1e4 * (1 - men_mask), precomputed
    ctx_bias = msk_ref[:, 1:2]           # (N, 1)  -1e4 * (1 - ctx_mask)
    dist = msk_ref[:, 2:3]               # (N, 1)

    def seq_softmax(scores):
        # softmax over each mention's s_pad contiguous rows (s_pad % 8 == 0,
        # so this reshape is a tile-aligned regroup of sublanes).
        s3 = scores.reshape(b_tile, s_pad, 1)
        m = jnp.max(s3, axis=1, keepdims=True)
        e = jnp.exp(s3 - m)
        den = jnp.sum(e, axis=1, keepdims=True)
        a3 = e * pl.reciprocal(den, approx=True)     # EUP, not VALU divide
        return a3.reshape(n_rows, 1)

    # ---- mention attention (scores + pooling routed through the MXU) ----
    men_h = jnp.tanh(jnp.dot(xb, w_men_m_ref[...], preferred_element_type=f32))  # (N, D)
    men_s = jnp.dot(men_h, w_men_o_ref[...], preferred_element_type=f32) + men_bias
    men_a = seq_softmax(men_s)                                                    # (N, 1)
    men_repr = jnp.dot(g_ref[...], x * men_a, preferred_element_type=f32)         # (BT, D)

    # ---- context attention ----
    # TODO(synk): dist_dropout / repr_dropout are eval-mode identity here.
    men_proj = jnp.dot(men_repr.astype(bf16), w_ctx_m_ref[...],
                       preferred_element_type=f32)                                # (BT, D)
    ctx_h = jnp.tanh(
        jnp.dot(xb, w_ctx_c_ref[...], preferred_element_type=f32)
        + jnp.dot(gt_ref[...], men_proj, preferred_element_type=f32)              # bcast per mention
        + dist * w_ctx_d_ref[...])                                                # (N, D)
    ctx_s = jnp.dot(ctx_h, w_ctx_o_ref[...], preferred_element_type=f32) + ctx_bias
    ctx_a = seq_softmax(ctx_s)
    ctx_repr = jnp.dot(g_ref[...], x * ctx_a, preferred_element_type=f32)          # (BT, D)

    # ---- fused output heads: [output_linear | feat_to_latent @ latent_to_label]
    #      column-concatenated per mention/context half -> 2 matmuls, 256 lanes
    head = (jnp.dot(men_repr, w_head_m_ref[...], preferred_element_type=f32)
            + jnp.dot(ctx_repr, w_head_c_ref[...], preferred_element_type=f32))    # (BT, 2*LP)
    out_latent = head[:, lp:]                         # tile-aligned lane slice
    logits = head[:, :lp] + scalar_ref[0] * out_latent

    logits_ref[...] = logits             # lane-dense (BT, 128k) unmasked stores
    latent_ref[...] = out_latent

    # per-mention MultiLabelSoftMarginLoss over the real label columns only
    y = y_ref[...]                                                                 # (BT, LP)
    valid = jax.lax.broadcasted_iota(jnp.int32, (1, lp), 1) < num_labels
    per = -(y * _log_sigmoid(logits) + (1.0 - y) * _log_sigmoid(-logits))
    per = jnp.where(valid, per, 0.0)
    loss = jnp.sum(per, axis=1, keepdims=True) * (1.0 / num_labels)                # (BT, 1)
    loss_ref[...] = jnp.broadcast_to(loss, (b_tile, lp))


# ---------------------------------------------------------------- wrapper
def hfet_pallas(elmo, men_mask, ctx_mask, dist, labels, params, b_tile=8):
    f32 = jnp.float32
    bf16 = jnp.bfloat16
    B, S, D = elmo.shape
    L = labels.shape[1]
    LP = _round_up(L, 128)                 # lane-dense outputs / label columns
    S_pad = _round_up(max(S, 8), 8)        # tile-aligned per-mention row groups
    Bp = _round_up(B, b_tile)
    n_rows = b_tile * S_pad
    n_steps = Bp // b_tile

    # --- pad mention batch + token sequence, flatten (mention, token) rows ---
    elmo_p = jnp.zeros((Bp, S_pad, D), f32).at[:B, :S, :].set(elmo.astype(f32))
    men_b = jnp.full((Bp, S_pad), -10000.0, f32).at[:B, :S].set(
        -10000.0 * (1.0 - men_mask.astype(f32)))
    ctx_b = jnp.full((Bp, S_pad), -10000.0, f32).at[:B, :S].set(
        -10000.0 * (1.0 - ctx_mask.astype(f32)))
    dist_p = jnp.zeros((Bp, S_pad), f32).at[:B, :S].set(dist.astype(f32))
    x_flat = elmo_p.reshape(Bp * S_pad, D)
    msk = jnp.stack([men_b, ctx_b, dist_p], axis=-1).reshape(Bp * S_pad, 3)
    labels_p = jnp.zeros((Bp, LP), f32).at[:B, :L].set(labels.astype(f32))

    # --- constant group matrices: per-mention pooling / broadcast on the MXU ---
    G = jnp.kron(jnp.eye(b_tile, dtype=f32), jnp.ones((1, S_pad), f32))   # (BT, N)
    Gt = jnp.transpose(G)                                                 # (N, BT)

    # --- weights (pre-transposed x @ W layout); D x D operands in bf16 ---
    w_men_m = params["w_men_m"].astype(bf16)
    w_ctx_c = params["w_ctx_c"].astype(bf16)
    w_ctx_m = params["w_ctx_m"].astype(bf16)
    w_men_o = params["w_men_o"].reshape(D, 1).astype(f32)
    w_ctx_o = params["w_ctx_o"].reshape(D, 1).astype(f32)
    w_ctx_d = params["w_ctx_d"].reshape(1, D).astype(f32)

    def pad_cols(w):
        return jnp.zeros((w.shape[0], LP), f32).at[:, :L].set(w.astype(f32))

    w_out_m = pad_cols(params["w_out"][:D])
    w_out_c = pad_cols(params["w_out"][D:])
    w_lat = params["w_f2l"] @ params["w_l2l"]      # fold latent path (both bias-free)
    w_lat_m = pad_cols(w_lat[:D])
    w_lat_c = pad_cols(w_lat[D:])
    # fuse the two heads along lanes: columns [0:LP) -> logits, [LP:2LP) -> latent
    w_head_m = jnp.concatenate([w_out_m, w_lat_m], axis=1)   # (D, 2*LP)
    w_head_c = jnp.concatenate([w_out_c, w_lat_c], axis=1)   # (D, 2*LP)

    row_map = lambda t: (t, 0)
    const2 = lambda t: (0, 0)

    in_specs = [
        pl.BlockSpec((n_rows, D), row_map),        # x (flattened mention-token rows)
        pl.BlockSpec((n_rows, 3), row_map),        # packed [men_bias, ctx_bias, dist]
        pl.BlockSpec((b_tile, LP), row_map),       # labels (lane padded)
        pl.BlockSpec((b_tile, n_rows), const2),    # G  (pool rows -> mentions)
        pl.BlockSpec((n_rows, b_tile), const2),    # G^T (broadcast mentions -> rows)
        # constant-index weights: fetched once across the grid (index unchanged)
        pl.BlockSpec((D, D), const2),              # men_attn_linear_m^T (bf16)
        pl.BlockSpec((D, 1), const2),              # men_attn_linear_o^T
        pl.BlockSpec((D, D), const2),              # ctx_attn_linear_c^T (bf16)
        pl.BlockSpec((D, D), const2),              # ctx_attn_linear_m^T (bf16)
        pl.BlockSpec((1, D), const2),              # ctx_attn_linear_d^T
        pl.BlockSpec((D, 1), const2),              # ctx_attn_linear_o^T
        pl.BlockSpec((D, 2 * LP), const2),         # fused head, mention half
        pl.BlockSpec((D, 2 * LP), const2),         # fused head, context half
        pl.BlockSpec(memory_space=pltpu.MemorySpace.SMEM),   # latent_scalar
    ]
    out_specs = (
        pl.BlockSpec((b_tile, LP), row_map),       # logits
        pl.BlockSpec((b_tile, LP), row_map),       # outputs_latent
        pl.BlockSpec((b_tile, LP), row_map),       # per-mention loss (lane broadcast)
    )
    out_shape = (
        jax.ShapeDtypeStruct((Bp, LP), f32),
        jax.ShapeDtypeStruct((Bp, LP), f32),
        jax.ShapeDtypeStruct((Bp, LP), f32),
    )

    kernel = functools.partial(hfet_kernel, num_labels=L)
    logits_p, latent_p, loss_p = pl.pallas_call(
        kernel,
        grid=(n_steps,),
        in_specs=in_specs,
        out_specs=out_specs,
        out_shape=out_shape,
        compiler_params=pltpu.CompilerParams(
            dimension_semantics=("parallel",),     # megacore: split mention tiles
            vmem_limit_bytes=16 << 20),            # well above actual ~3 MiB footprint
    )(x_flat, msk, labels_p, G, Gt,
      w_men_m, w_men_o, w_ctx_c, w_ctx_m, w_ctx_d, w_ctx_o,
      w_head_m, w_head_c,
      params["latent_scalar"])

    loss = jnp.mean(loss_p[:B, 0])                 # MultiLabelSoftMarginLoss 'mean'
    return loss, logits_p[:B, :L], latent_p[:B, :L]


# ---------------------------------------------------------------- pure-JAX ref
def hfet_reference(elmo, men_mask, ctx_mask, dist, labels, params):
    men_h = jnp.tanh(elmo @ params["w_men_m"])
    men_a = jnp.sum(men_h * params["w_men_o"][None], axis=-1, keepdims=True)
    men_a = men_a + (1.0 - men_mask[:, :, None]) * -10000.0
    men_a = jax.nn.softmax(men_a, axis=1)
    men_repr = jnp.sum(elmo * men_a, axis=1)

    ctx_h = (elmo @ params["w_ctx_c"]
             + (men_repr @ params["w_ctx_m"])[:, None, :]
             + dist[:, :, None] * params["w_ctx_d"][None])
    ctx_h = jnp.tanh(ctx_h)
    ctx_a = jnp.sum(ctx_h * params["w_ctx_o"][None], axis=-1, keepdims=True)
    ctx_a = ctx_a + (1.0 - ctx_mask[:, :, None]) * -10000.0
    ctx_a = jax.nn.softmax(ctx_a, axis=1)
    ctx_repr = jnp.sum(elmo * ctx_a, axis=1)

    final_repr = jnp.concatenate([men_repr, ctx_repr], axis=1)
    logits = final_repr @ params["w_out"]
    latent_label = final_repr @ params["w_f2l"]
    out_latent = latent_label @ params["w_l2l"]
    logits = logits + params["latent_scalar"][0] * out_latent

    per = -(labels * _log_sigmoid(logits) + (1.0 - labels) * _log_sigmoid(-logits))
    loss = jnp.mean(jnp.mean(per, axis=1))
    return loss, logits, out_latent


# ---------------------------------------------------------------- main
if __name__ == "__main__":
    D, L, R = ELMO_DIM, LABEL_SIZE, LATENT_SIZE
    key = jax.random.PRNGKey(0)
    keys = jax.random.split(key, 20)

    # --- synthetic BERT encoder output ---------------------------------
    # TODO(synk): BertModel('allenai/scibert_scivocab_uncased') has no Pallas
    # equivalent; a synthetic encoder output stands in for it.
    token_lens = [[1, 2, 1, 1, 2], [1, 1, 3, 1, 2, 1]]   # per-sentence word-piece counts
    B_sent = len(token_lens)
    WP = 12                                              # word-piece length (incl. [CLS])
    bert_outputs = jax.random.normal(keys[0], (B_sent, WP, D), jnp.float32)

    # --- word-piece -> token aggregation (plain-JAX glue, as in forward_nn)
    idxs, masks, token_num, token_len = token_lens_to_idxs(token_lens)
    idxs = jnp.asarray(idxs, jnp.int32) + 1                       # +1 skips [CLS]; -1 -> 0
    masks = jnp.asarray(masks, jnp.float32)
    idx_full = jnp.broadcast_to(idxs[:, :, None], (B_sent, token_num * token_len, D))
    gathered = jnp.take_along_axis(bert_outputs, idx_full, axis=1) * masks[:, :, None]
    elmo = gathered.reshape(B_sent, token_num, token_len, D).sum(axis=2)   # (B_sent, S, D)
    S = token_num                                                          # 6

    # --- mention-level batch via `gathers` ------------------------------
    gathers = jnp.asarray([0, 1, 1, 0, 1, 0, 0, 1, 1, 0, 1, 0], jnp.int32)
    B = int(gathers.shape[0])                      # 12 mentions -> 2 grid steps of 8
    elmo_m = jnp.take(elmo, gathers, axis=0)       # (B, S, D)

    men_pos = jax.random.randint(keys[1], (B,), 0, S)
    men_mask = jax.nn.one_hot(men_pos, S, dtype=jnp.float32)       # mention span (1 token)
    ctx_mask = 1.0 - men_mask                                      # context = rest
    dist = jax.random.uniform(keys[2], (B, S), jnp.float32)
    labels = (jax.random.uniform(keys[3], (B, L)) > 0.7).astype(jnp.float32)

    # --- deterministic parameters (nn.Linear weights, pre-transposed) ---
    scale = 0.05
    params = {
        "w_men_m": scale * jax.random.normal(keys[4], (D, D), jnp.float32),
        "w_men_o": scale * jax.random.normal(keys[5], (1, D), jnp.float32),
        "w_ctx_c": scale * jax.random.normal(keys[6], (D, D), jnp.float32),
        "w_ctx_m": scale * jax.random.normal(keys[7], (D, D), jnp.float32),
        "w_ctx_d": scale * jax.random.normal(keys[8], (1, D), jnp.float32),
        "w_ctx_o": scale * jax.random.normal(keys[9], (1, D), jnp.float32),
        "w_out":   scale * jax.random.normal(keys[10], (2 * D, L), jnp.float32),
        "w_f2l":   scale * jax.random.normal(keys[11], (2 * D, R), jnp.float32),
        "w_l2l":   scale * jax.random.normal(keys[12], (R, L), jnp.float32),
        "latent_scalar": jnp.asarray([0.1], jnp.float32),
    }

    # --- run Pallas kernel ----------------------------------------------
    loss, logits, out_latent = jax.block_until_ready(
        hfet_pallas(elmo_m, men_mask, ctx_mask, dist, labels, params))

    # --- verify against pure-JAX (f32) reference -------------------------
    ref_loss, ref_logits, ref_latent = hfet_reference(
        elmo_m, men_mask, ctx_mask, dist, labels, params)
    np.testing.assert_allclose(np.asarray(logits), np.asarray(ref_logits),
                               rtol=2e-2, atol=2e-2)
    np.testing.assert_allclose(np.asarray(out_latent), np.asarray(ref_latent),
                               rtol=2e-2, atol=2e-2)
    np.testing.assert_allclose(np.asarray(loss), np.asarray(ref_loss),
                               rtol=2e-2, atol=2e-2)

    print("KERNEL_OK")
</pallas_src>

<mosaic_0001>
module attributes {stable_mosaic.version = 11 : i64} {
  func.func @hfet_kernel(%arg0: i32, %arg1: memref<64x256xf32, #tpu.memory_space<vmem>>, %arg2: memref<64x3xf32, #tpu.memory_space<vmem>>, %arg3: memref<8x128xf32, #tpu.memory_space<vmem>>, %arg4: memref<8x64xf32, #tpu.memory_space<vmem>>, %arg5: memref<64x8xf32, #tpu.memory_space<vmem>>, %arg6: memref<256x256xbf16, #tpu.memory_space<vmem>>, %arg7: memref<256x1xf32, #tpu.memory_space<vmem>>, %arg8: memref<256x256xbf16, #tpu.memory_space<vmem>>, %arg9: memref<256x256xbf16, #tpu.memory_space<vmem>>, %arg10: memref<1x256xf32, #tpu.memory_space<vmem>>, %arg11: memref<256x1xf32, #tpu.memory_space<vmem>>, %arg12: memref<256x256xf32, #tpu.memory_space<vmem>>, %arg13: memref<256x256xf32, #tpu.memory_space<vmem>>, %arg14: memref<1xf32, #tpu.memory_space<smem>>, %arg15: memref<8x128xf32, #tpu.memory_space<vmem>>, %arg16: memref<8x128xf32, #tpu.memory_space<vmem>>, %arg17: memref<8x128xf32, #tpu.memory_space<vmem>>) attributes {dimension_semantics = [#tpu.dimension_semantics<parallel>], iteration_bounds = array<i64: 2>, scalar_prefetch = 0 : i64, scratch_operands = 0 : i64, tpu.core_type = #tpu.core_type<tc>, window_params = [{transform_indices = @transform_0, window_bounds = array<i64: 64, 256>}, {transform_indices = @transform_1, window_bounds = array<i64: 64, 3>}, {transform_indices = @transform_2, window_bounds = array<i64: 8, 128>}, {pipeline_mode = #tpu.pipeline_mode<synchronous>, transform_indices = @transform_3, window_bounds = array<i64: 8, 64>}, {pipeline_mode = #tpu.pipeline_mode<synchronous>, transform_indices = @transform_4, window_bounds = array<i64: 64, 8>}, {pipeline_mode = #tpu.pipeline_mode<synchronous>, transform_indices = @transform_5, window_bounds = array<i64: 256, 256>}, {pipeline_mode = #tpu.pipeline_mode<synchronous>, transform_indices = @transform_6, window_bounds = array<i64: 256, 1>}, {pipeline_mode = #tpu.pipeline_mode<synchronous>, transform_indices = @transform_7, window_bounds = array<i64: 256, 256>}, {pipeline_mode = #tpu.pipeline_mode<synchronous>, transform_indices = @transform_8, window_bounds = array<i64: 256, 256>}, {pipeline_mode = #tpu.pipeline_mode<synchronous>, transform_indices = @transform_9, window_bounds = array<i64: 1, 256>}, {pipeline_mode = #tpu.pipeline_mode<synchronous>, transform_indices = @transform_10, window_bounds = array<i64: 256, 1>}, {pipeline_mode = #tpu.pipeline_mode<synchronous>, transform_indices = @transform_11, window_bounds = array<i64: 256, 256>}, {pipeline_mode = #tpu.pipeline_mode<synchronous>, transform_indices = @transform_12, window_bounds = array<i64: 256, 256>}, {transform_indices = @transform_13, window_bounds = array<i64: 1>}, {transform_indices = @transform_14, window_bounds = array<i64: 8, 128>}, {transform_indices = @transform_15, window_bounds = array<i64: 8, 128>}, {transform_indices = @transform_16, window_bounds = array<i64: 8, 128>}]} {
    %c0 = arith.constant 0 : index
    %c0_0 = arith.constant 0 : index
    %0 = vector.load %arg1[%c0, %c0_0] : memref<64x256xf32, #tpu.memory_space<vmem>>, vector<64x256xf32>
    %1 = arith.truncf %0 : vector<64x256xf32> to vector<64x256xbf16>
    %c0_1 = arith.constant 0 : index
    %c0_2 = arith.constant 0 : index
    %2 = vector.load %arg2[%c0_1, %c0_2] : memref<64x3xf32, #tpu.memory_space<vmem>>, vector<64x1xf32>
    %c0_3 = arith.constant 0 : index
    %c1 = arith.constant 1 : index
    %3 = vector.load %arg2[%c0_3, %c1] : memref<64x3xf32, #tpu.memory_space<vmem>>, vector<64x1xf32>
    %c0_4 = arith.constant 0 : index
    %c2 = arith.constant 2 : index
    %4 = vector.load %arg2[%c0_4, %c2] : memref<64x3xf32, #tpu.memory_space<vmem>>, vector<64x1xf32>
    %c0_5 = arith.constant 0 : index
    %c0_6 = arith.constant 0 : index
    %5 = vector.load %arg6[%c0_5, %c0_6] : memref<256x256xbf16, #tpu.memory_space<vmem>>, vector<256x256xbf16>
    %cst = arith.constant dense<0.000000e+00> : vector<64x256xf32>
    %6 = tpu.matmul %1, %5, %cst {dimension_numbers = #tpu.dot_dimension_numbers<[1], [0], [0], [1], [0, 0, 1, 1], [], []>} : vector<64x256xbf16>, vector<256x256xbf16>, vector<64x256xf32> -> vector<64x256xf32>
    %7 = math.tanh %6 : vector<64x256xf32>
    %c0_7 = arith.constant 0 : index
    %c0_8 = arith.constant 0 : index
    %8 = vector.load %arg7[%c0_7, %c0_8] : memref<256x1xf32, #tpu.memory_space<vmem>>, vector<256x1xf32>
    %cst_9 = arith.constant dense<0.000000e+00> : vector<64x1xf32>
    %9 = tpu.matmul %7, %8, %cst_9 {dimension_numbers = #tpu.dot_dimension_numbers<[1], [0], [0], [1], [0, 0, 1, 1], [], []>} : vector<64x256xf32>, vector<256x1xf32>, vector<64x1xf32> -> vector<64x1xf32>
    %10 = arith.addf %9, %2 : vector<64x1xf32>
    %11 = vector.shape_cast %10 : vector<64x1xf32> to vector<8x8x1xf32>
    %cst_10 = arith.constant dense<0xFF800000> : vector<8x1xf32>
    %12 = vector.multi_reduction <maximumf>, %11, %cst_10 [1] : vector<8x8x1xf32> to vector<8x1xf32>
    %13 = vector.shape_cast %12 : vector<8x1xf32> to vector<8x1x1xf32>
    %14 = vector.broadcast %13 : vector<8x1x1xf32> to vector<8x8x1xf32>
    %15 = arith.subf %11, %14 : vector<8x8x1xf32>
    %16 = math.exp %15 : vector<8x8x1xf32>
    %cst_11 = arith.constant dense<0.000000e+00> : vector<8x1xf32>
    %17 = vector.multi_reduction <add>, %16, %cst_11 [1] : vector<8x8x1xf32> to vector<8x1xf32>
    %18 = vector.shape_cast %17 : vector<8x1xf32> to vector<8x1x1xf32>
    %19 = tpu.reciprocal %18 {approx = true} : vector<8x1x1xf32> -> vector<8x1x1xf32>
    %20 = vector.broadcast %19 : vector<8x1x1xf32> to vector<8x8x1xf32>
    %21 = arith.mulf %16, %20 : vector<8x8x1xf32>
    %22 = vector.shape_cast %21 : vector<8x8x1xf32> to vector<64x1xf32>
    %c0_12 = arith.constant 0 : index
    %c0_13 = arith.constant 0 : index
    %23 = vector.load %arg4[%c0_12, %c0_13] : memref<8x64xf32, #tpu.memory_space<vmem>>, vector<8x64xf32>
    %24 = vector.broadcast %22 : vector<64x1xf32> to vector<64x256xf32>
    %25 = arith.mulf %0, %24 : vector<64x256xf32>
    %cst_14 = arith.constant dense<0.000000e+00> : vector<8x256xf32>
    %26 = tpu.matmul %23, %25, %cst_14 {dimension_numbers = #tpu.dot_dimension_numbers<[1], [0], [0], [1], [0, 0, 1, 1], [], []>} : vector<8x64xf32>, vector<64x256xf32>, vector<8x256xf32> -> vector<8x256xf32>
    %27 = arith.truncf %26 : vector<8x256xf32> to vector<8x256xbf16>
    %c0_15 = arith.constant 0 : index
    %c0_16 = arith.constant 0 : index
    %28 = vector.load %arg9[%c0_15, %c0_16] : memref<256x256xbf16, #tpu.memory_space<vmem>>, vector<256x256xbf16>
    %cst_17 = arith.constant dense<0.000000e+00> : vector<8x256xf32>
    %29 = tpu.matmul %27, %28, %cst_17 {dimension_numbers = #tpu.dot_dimension_numbers<[1], [0], [0], [1], [0, 0, 1, 1], [], []>} : vector<8x256xbf16>, vector<256x256xbf16>, vector<8x256xf32> -> vector<8x256xf32>
    %c0_18 = arith.constant 0 : index
    %c0_19 = arith.constant 0 : index
    %30 = vector.load %arg8[%c0_18, %c0_19] : memref<256x256xbf16, #tpu.memory_space<vmem>>, vector<256x256xbf16>
    %cst_20 = arith.constant dense<0.000000e+00> : vector<64x256xf32>
    %31 = tpu.matmul %1, %30, %cst_20 {dimension_numbers = #tpu.dot_dimension_numbers<[1], [0], [0], [1], [0, 0, 1, 1], [], []>} : vector<64x256xbf16>, vector<256x256xbf16>, vector<64x256xf32> -> vector<64x256xf32>
    %c0_21 = arith.constant 0 : index
    %c0_22 = arith.constant 0 : index
    %32 = vector.load %arg5[%c0_21, %c0_22] : memref<64x8xf32, #tpu.memory_space<vmem>>, vector<64x8xf32>
    %cst_23 = arith.constant dense<0.000000e+00> : vector<64x256xf32>
    %33 = tpu.matmul %32, %29, %cst_23 {dimension_numbers = #tpu.dot_dimension_numbers<[1], [0], [0], [1], [0, 0, 1, 1], [], []>} : vector<64x8xf32>, vector<8x256xf32>, vector<64x256xf32> -> vector<64x256xf32>
    %34 = arith.addf %31, %33 : vector<64x256xf32>
    %c0_24 = arith.constant 0 : index
    %c0_25 = arith.constant 0 : index
    %35 = vector.load %arg10[%c0_24, %c0_25] : memref<1x256xf32, #tpu.memory_space<vmem>>, vector<1x256xf32>
    %36 = vector.broadcast %4 : vector<64x1xf32> to vector<64x256xf32>
    %37 = vector.broadcast %35 : vector<1x256xf32> to vector<64x256xf32>
    %38 = arith.mulf %36, %37 : vector<64x256xf32>
    %39 = arith.addf %34, %38 : vector<64x256xf32>
    %40 = math.tanh %39 : vector<64x256xf32>
    %c0_26 = arith.constant 0 : index
    %c0_27 = arith.constant 0 : index
    %41 = vector.load %arg11[%c0_26, %c0_27] : memref<256x1xf32, #tpu.memory_space<vmem>>, vector<256x1xf32>
    %cst_28 = arith.constant dense<0.000000e+00> : vector<64x1xf32>
    %42 = tpu.matmul %40, %41, %cst_28 {dimension_numbers = #tpu.dot_dimension_numbers<[1], [0], [0], [1], [0, 0, 1, 1], [], []>} : vector<64x256xf32>, vector<256x1xf32>, vector<64x1xf32> -> vector<64x1xf32>
    %43 = arith.addf %42, %3 : vector<64x1xf32>
    %44 = vector.shape_cast %43 : vector<64x1xf32> to vector<8x8x1xf32>
    %cst_29 = arith.constant dense<0xFF800000> : vector<8x1xf32>
    %45 = vector.multi_reduction <maximumf>, %44, %cst_29 [1] : vector<8x8x1xf32> to vector<8x1xf32>
    %46 = vector.shape_cast %45 : vector<8x1xf32> to vector<8x1x1xf32>
    %47 = vector.broadcast %46 : vector<8x1x1xf32> to vector<8x8x1xf32>
    %48 = arith.subf %44, %47 : vector<8x8x1xf32>
    %49 = math.exp %48 : vector<8x8x1xf32>
    %cst_30 = arith.constant dense<0.000000e+00> : vector<8x1xf32>
    %50 = vector.multi_reduction <add>, %49, %cst_30 [1] : vector<8x8x1xf32> to vector<8x1xf32>
    %51 = vector.shape_cast %50 : vector<8x1xf32> to vector<8x1x1xf32>
    %52 = tpu.reciprocal %51 {approx = true} : vector<8x1x1xf32> -> vector<8x1x1xf32>
    %53 = vector.broadcast %52 : vector<8x1x1xf32> to vector<8x8x1xf32>
    %54 = arith.mulf %49, %53 : vector<8x8x1xf32>
    %55 = vector.shape_cast %54 : vector<8x8x1xf32> to vector<64x1xf32>
    %c0_31 = arith.constant 0 : index
    %c0_32 = arith.constant 0 : index
    %56 = vector.load %arg4[%c0_31, %c0_32] : memref<8x64xf32, #tpu.memory_space<vmem>>, vector<8x64xf32>
    %57 = vector.broadcast %55 : vector<64x1xf32> to vector<64x256xf32>
    %58 = arith.mulf %0, %57 : vector<64x256xf32>
    %cst_33 = arith.constant dense<0.000000e+00> : vector<8x256xf32>
    %59 = tpu.matmul %56, %58, %cst_33 {dimension_numbers = #tpu.dot_dimension_numbers<[1], [0], [0], [1], [0, 0, 1, 1], [], []>} : vector<8x64xf32>, vector<64x256xf32>, vector<8x256xf32> -> vector<8x256xf32>
    %c0_34 = arith.constant 0 : index
    %c0_35 = arith.constant 0 : index
    %60 = vector.load %arg12[%c0_34, %c0_35] : memref<256x256xf32, #tpu.memory_space<vmem>>, vector<256x256xf32>
    %cst_36 = arith.constant dense<0.000000e+00> : vector<8x256xf32>
    %61 = tpu.matmul %26, %60, %cst_36 {dimension_numbers = #tpu.dot_dimension_numbers<[1], [0], [0], [1], [0, 0, 1, 1], [], []>} : vector<8x256xf32>, vector<256x256xf32>, vector<8x256xf32> -> vector<8x256xf32>
    %c0_37 = arith.constant 0 : index
    %c0_38 = arith.constant 0 : index
    %62 = vector.load %arg13[%c0_37, %c0_38] : memref<256x256xf32, #tpu.memory_space<vmem>>, vector<256x256xf32>
    %cst_39 = arith.constant dense<0.000000e+00> : vector<8x256xf32>
    %63 = tpu.matmul %59, %62, %cst_39 {dimension_numbers = #tpu.dot_dimension_numbers<[1], [0], [0], [1], [0, 0, 1, 1], [], []>} : vector<8x256xf32>, vector<256x256xf32>, vector<8x256xf32> -> vector<8x256xf32>
    %64 = arith.addf %61, %63 : vector<8x256xf32>
    %65 = vector.extract_strided_slice %64 {offsets = [0, 128], sizes = [8, 128], strides = [1, 1]} : vector<8x256xf32> to vector<8x128xf32>
    %66 = vector.extract_strided_slice %64 {offsets = [0, 0], sizes = [8, 128], strides = [1, 1]} : vector<8x256xf32> to vector<8x128xf32>
    %c0_40 = arith.constant 0 : index
    %67 = memref.load %arg14[%c0_40] : memref<1xf32, #tpu.memory_space<smem>>
    %68 = vector.broadcast %67 : f32 to vector<8x128xf32>
    %69 = arith.mulf %68, %65 : vector<8x128xf32>
    %70 = arith.addf %66, %69 : vector<8x128xf32>
    %c0_41 = arith.constant 0 : index
    %c0_42 = arith.constant 0 : index
    %71 = vector.load %arg15[%c0_41, %c0_42] : memref<8x128xf32, #tpu.memory_space<vmem>>, vector<8x128xf32>
    tpu.vector_store %arg15[%c0_41, %c0_42], %70 {strides = array<i32>} : memref<8x128xf32, #tpu.memory_space<vmem>>, vector<8x128xf32>,
    %c0_43 = arith.constant 0 : index
    %c0_44 = arith.constant 0 : index
    %72 = vector.load %arg16[%c0_43, %c0_44] : memref<8x128xf32, #tpu.memory_space<vmem>>, vector<8x128xf32>
    tpu.vector_store %arg16[%c0_43, %c0_44], %65 {strides = array<i32>} : memref<8x128xf32, #tpu.memory_space<vmem>>, vector<8x128xf32>,
    %c0_45 = arith.constant 0 : index
    %c0_46 = arith.constant 0 : index
    %73 = vector.load %arg3[%c0_45, %c0_46] : memref<8x128xf32, #tpu.memory_space<vmem>>, vector<8x128xf32>
    %74 = tpu.iota {dimensions = array<i32: 1>} : vector<1x128xi32>
    %c16_i32 = arith.constant 16 : i32
    %75 = vector.broadcast %c16_i32 : i32 to vector<1x128xi32>
    %76 = arith.cmpi slt, %74, %75 : vector<1x128xi32>
    %cst_47 = arith.constant 0.000000e+00 : f32
    %77 = vector.broadcast %cst_47 : f32 to vector<8x128xf32>
    %78 = arith.minimumf %70, %77 : vector<8x128xf32>
    %79 = math.absf %70 : vector<8x128xf32>
    %cst_48 = arith.constant 0.000000e+00 : f32
    %80 = vector.broadcast %cst_48 : f32 to vector<8x128xf32>
    %81 = arith.subf %80, %79 : vector<8x128xf32>
    %82 = math.exp %81 : vector<8x128xf32>
    %83 = math.log1p %82 : vector<8x128xf32>
    %84 = arith.subf %78, %83 : vector<8x128xf32>
    %85 = arith.mulf %73, %84 : vector<8x128xf32>
    %cst_49 = arith.constant 1.000000e+00 : f32
    %86 = vector.broadcast %cst_49 : f32 to vector<8x128xf32>
    %87 = arith.subf %86, %73 : vector<8x128xf32>
    %cst_50 = arith.constant 0.000000e+00 : f32
    %88 = vector.broadcast %cst_50 : f32 to vector<8x128xf32>
    %89 = arith.subf %88, %70 : vector<8x128xf32>
    %cst_51 = arith.constant 0.000000e+00 : f32
    %90 = vector.broadcast %cst_51 : f32 to vector<8x128xf32>
    %91 = arith.minimumf %89, %90 : vector<8x128xf32>
    %92 = math.absf %89 : vector<8x128xf32>
    %cst_52 = arith.constant 0.000000e+00 : f32
    %93 = vector.broadcast %cst_52 : f32 to vector<8x128xf32>
    %94 = arith.subf %93, %92 : vector<8x128xf32>
    %95 = math.exp %94 : vector<8x128xf32>
    %96 = math.log1p %95 : vector<8x128xf32>
    %97 = arith.subf %91, %96 : vector<8x128xf32>
    %98 = arith.mulf %87, %97 : vector<8x128xf32>
    %99 = arith.addf %85, %98 : vector<8x128xf32>
    %cst_53 = arith.constant 0.000000e+00 : f32
    %100 = vector.broadcast %cst_53 : f32 to vector<8x128xf32>
    %101 = arith.subf %100, %99 : vector<8x128xf32>
    %cst_54 = arith.constant 0.000000e+00 : f32
    %102 = vector.shape_cast %76 : vector<1x128xi1> to vector<1x128xi1>
    %103 = vector.broadcast %102 : vector<1x128xi1> to vector<8x128xi1>
    %104 = vector.broadcast %cst_54 : f32 to vector<8x128xf32>
    %105 = arith.select %103, %101, %104 : vector<8x128xi1>, vector<8x128xf32>
    %cst_55 = arith.constant dense<0.000000e+00> : vector<8xf32>
    %106 = vector.multi_reduction <add>, %105, %cst_55 [1] : vector<8x128xf32> to vector<8xf32>
    %107 = vector.shape_cast %106 : vector<8xf32> to vector<8x1xf32>
    %cst_56 = arith.constant 6.250000e-02 : f32
    %108 = vector.broadcast %cst_56 : f32 to vector<8x1xf32>
    %109 = arith.mulf %107, %108 : vector<8x1xf32>
    %110 = vector.shape_cast %109 : vector<8x1xf32> to vector<8x1xf32>
    %111 = vector.broadcast %110 : vector<8x1xf32> to vector<8x128xf32>
    %c0_57 = arith.constant 0 : index
    %c0_58 = arith.constant 0 : index
    %112 = vector.load %arg17[%c0_57, %c0_58] : memref<8x128xf32, #tpu.memory_space<vmem>>, vector<8x128xf32>
    tpu.vector_store %arg17[%c0_57, %c0_58], %111 {strides = array<i32>} : memref<8x128xf32, #tpu.memory_space<vmem>>, vector<8x128xf32>,
    return
  }
  func.func @transform_0(%arg0: i32) -> (i32, i32) {
    %c0_i32 = arith.constant 0 : i32
    %c0_i32_0 = arith.constant 0 : i32
    return %arg0, %c0_i32 : i32, i32
  }
  func.func @transform_1(%arg0: i32) -> (i32, i32) {
    %c0_i32 = arith.constant 0 : i32
    %c0_i32_0 = arith.constant 0 : i32
    return %arg0, %c0_i32 : i32, i32
  }
  func.func @transform_2(%arg0: i32) -> (i32, i32) {
    %c0_i32 = arith.constant 0 : i32
    %c0_i32_0 = arith.constant 0 : i32
    return %arg0, %c0_i32 : i32, i32
  }
  func.func @transform_3(%arg0: i32) -> (i32, i32) {
    %c0_i32 = arith.constant 0 : i32
    %c0_i32_0 = arith.constant 0 : i32
    %c0_i32_1 = arith.constant 0 : i32
    return %c0_i32, %c0_i32_0 : i32, i32
  }
  func.func @transform_4(%arg0: i32) -> (i32, i32) {
    %c0_i32 = arith.constant 0 : i32
    %c0_i32_0 = arith.constant 0 : i32
    %c0_i32_1 = arith.constant 0 : i32
    return %c0_i32, %c0_i32_0 : i32, i32
  }
  func.func @transform_5(%arg0: i32) -> (i32, i32) {
    %c0_i32 = arith.constant 0 : i32
    %c0_i32_0 = arith.constant 0 : i32
    %c0_i32_1 = arith.constant 0 : i32
    return %c0_i32, %c0_i32_0 : i32, i32
  }
  func.func @transform_6(%arg0: i32) -> (i32, i32) {
    %c0_i32 = arith.constant 0 : i32
    %c0_i32_0 = arith.constant 0 : i32
    %c0_i32_1 = arith.constant 0 : i32
    return %c0_i32, %c0_i32_0 : i32, i32
  }
  func.func @transform_7(%arg0: i32) -> (i32, i32) {
    %c0_i32 = arith.constant 0 : i32
    %c0_i32_0 = arith.constant 0 : i32
    %c0_i32_1 = arith.constant 0 : i32
    return %c0_i32, %c0_i32_0 : i32, i32
  }
  func.func @transform_8(%arg0: i32) -> (i32, i32) {
    %c0_i32 = arith.constant 0 : i32
    %c0_i32_0 = arith.constant 0 : i32
    %c0_i32_1 = arith.constant 0 : i32
    return %c0_i32, %c0_i32_0 : i32, i32
  }
  func.func @transform_9(%arg0: i32) -> (i32, i32) {
    %c0_i32 = arith.constant 0 : i32
    %c0_i32_0 = arith.constant 0 : i32
    %c0_i32_1 = arith.constant 0 : i32
    return %c0_i32, %c0_i32_0 : i32, i32
  }
  func.func @transform_10(%arg0: i32) -> (i32, i32) {
    %c0_i32 = arith.constant 0 : i32
    %c0_i32_0 = arith.constant 0 : i32
    %c0_i32_1 = arith.constant 0 : i32
    return %c0_i32, %c0_i32_0 : i32, i32
  }
  func.func @transform_11(%arg0: i32) -> (i32, i32) {
    %c0_i32 = arith.constant 0 : i32
    %c0_i32_0 = arith.constant 0 : i32
    %c0_i32_1 = arith.constant 0 : i32
    return %c0_i32, %c0_i32_0 : i32, i32
  }
  func.func @transform_12(%arg0: i32) -> (i32, i32) {
    %c0_i32 = arith.constant 0 : i32
    %c0_i32_0 = arith.constant 0 : i32
    %c0_i32_1 = arith.constant 0 : i32
    return %c0_i32, %c0_i32_0 : i32, i32
  }
  func.func @transform_13(%arg0: i32) -> i32 {
    %c0_i32 = arith.constant 0 : i32
    %c0_i32_0 = arith.constant 0 : i32
    return %c0_i32 : i32
  }
  func.func @transform_14(%arg0: i32) -> (i32, i32) {
    %c0_i32 = arith.constant 0 : i32
    %c0_i32_0 = arith.constant 0 : i32
    return %arg0, %c0_i32 : i32, i32
  }
  func.func @transform_15(%arg0: i32) -> (i32, i32) {
    %c0_i32 = arith.constant 0 : i32
    %c0_i32_0 = arith.constant 0 : i32
    return %arg0, %c0_i32 : i32, i32
  }
  func.func @transform_16(%arg0: i32) -> (i32, i32) {
    %c0_i32 = arith.constant 0 : i32
    %c0_i32_0 = arith.constant 0 : i32
    return %arg0, %c0_i32 : i32, i32
  }
}

</mosaic_0001>

<bundles_post_ra>
// kernel: tpu_custom_call.1
= control target key start
LH: loop header
LB: loop body
LE: loop exit
PB: predicated region body
PF: predicated region fallthrough
CT: control target
= control target key end

     0   :  { %s5223_s0 = inlined_call_operand.hbm [shape: f32[128,256], index: 0, kind: input, shape index: {}]   ;;  %s5224_s1 = inlined_call_operand.vmem [shape: f32[128,3], index: 1, kind: input, shape index: {}]   ;;  %s5225_s2 = inlined_call_operand.vmem [shape: f32[16,128], index: 2, kind: input, shape index: {}]   ;;  %s5226_s3 = inlined_call_operand.vmem [shape: f32[8,64], index: 3, kind: input, shape index: {}]   ;;  %s5227_s4 = inlined_call_operand.vmem [shape: f32[64,8], index: 4, kind: input, shape index: {}]   ;;  %s5228_s5 = inlined_call_operand.hbm [shape: bf16[256,256], index: 5, kind: input, shape index: {}]   ;;  %s5229_s6 = inlined_call_operand.vmem [shape: f32[256,1], index: 6, kind: input, shape index: {}]   ;;  %s5230_s7 = inlined_call_operand.hbm [shape: bf16[256,256], index: 7, kind: input, shape index: {}]   ;;  %s5231_s8 = inlined_call_operand.hbm [shape: bf16[256,256], index: 8, kind: input, shape index: {}]   ;;  %s5232_s9 = inlined_call_operand.vmem [shape: f32[1,256], index: 9, kind: input, shape index: {}]   ;;  %s5233_s10 = inlined_call_operand.vmem [shape: f32[256,1], index: 10, kind: input, shape index: {}]   ;;  %s5234_s11 = inlined_call_operand.vmem [shape: f32[256,256], index: 11, kind: input, shape index: {}]   ;;  %s5235_s12 = inlined_call_operand.hbm [shape: f32[256,256], index: 12, kind: input, shape index: {}]   ;;  %s5236_s13 = inlined_call_operand.<no memory space> [shape: f32[1], index: 13, kind: input, shape index: {}]   ;;  %s5237_s14 = inlined_call_operand.hbm [shape: f32[16,128], index: 14, kind: output, shape index: {0}]   ;;  %s5238_s15 = inlined_call_operand.hbm [shape: f32[16,128], index: 15, kind: output, shape index: {1}]   ;;  %s5239_s16 = inlined_call_operand.hbm [shape: f32[16,128], index: 16, kind: output, shape index: {2}]  }
   0x1   :  { %5261 = sst [smem:[#allocation31_spill]] %s5223_s0 }
   0x2   :  { %5262 = sst [smem:[#allocation32_spill]] %s5228_s5 }
   0x3   :  { %5263 = sst [smem:[#allocation33_spill]] %s5230_s7 }
   0x4   :  { %5264 = sst [smem:[#allocation34_spill]] %s5231_s8 }
   0x5   :  { %5265 = sst [smem:[#allocation35_spill]] %s5235_s12 }
   0x6   :  { %5266 = sst [smem:[#allocation36_spill]] %s5239_s16 }
   0x7   :  { %22 = sst [smem:[#allocation2]] %s5236_s13 }
   0x8   :  { %23 = vsyncpa [#allocation4], 0 }
   0x9   :  { %25 = vsyncpa [#allocation4 + $0x1], 0 }
   0xa   :  { %26 = vsyncpa [#allocation7], 0 }
   0xb   :  { %27 = vsyncpa [#allocation10], 0 }
   0xc   :  { %28 = vsyncpa [#allocation5], 0 }
   0xd   :  { %30 = vsyncpa [#allocation5 + $0x1], 0 }
   0xe   :  { %31 = vsyncpa [#allocation14], 0 }
   0xf   :  { %33 = vsyncpa [#allocation14 + $0x1], 0  ;;  %s4174_s23 = smov 0   ;;  %s4176_s24 = smov 0  }
  0x10   :  { %s4178_s25 = smov 0   ;;  %s4180_s26 = smov 0  }
  0x11 LB: > { %5267 = sst [smem:[#allocation21_spill]] %s4056_s23  ;;  %s4195_s13 = sadd.s32 4294967295, %s4068_s26   ;;  %s4068_s26 = sphi %s4180_s26, %s5316_s26   ;;  %s4064_s25 = sphi %s4178_s25, %s5313_s25   ;;  %s4060_s24 = sphi %s4176_s24, %s5315_s24   ;;  %s4056_s23 = sphi %s4174_s23, %s5314_s23  }
  0x12   : > { %5268 = sst [smem:[#allocation22_spill]] %s4064_s25  ;;  %s5241_s27 = sadd.s32 4294967294, %s4068_s26  }
  0x13   : > { %p59_p0 = scmp.ne.s32.totalorder %s4060_s24, %s4056_s23  ;;  %p5244_p1 = scmp.eq.s32.totalorder %s4195_s13, 0 }
  0x14   : > { %p372_p3 = scmp.eq.s32.totalorder %s5241_s27, 1  ;;  %p3146_p5 = scmp.ge.s32.totalorder %s4068_s26, 1 }
  0x15   : > { %p4206_p4 = por %p5244_p1, %p59_p0  ;;  %p431_p7 = scmp.lt.s32.totalorder %s4068_s26, 3 }
  0x16   : > { %p4211_p6 = por %p372_p3, %p59_p0  ;;  %s4070_s0 = smov [#allocation6]  }
  0x17   : > { %s5269_s28 = scalar_select %p4206_p4, 1, 0 }
  0x18   : > { %s5270_s29 = scalar_select %p4211_p6, 1, 0 }
  0x19   : > { %p4216_p8 = pnand %p3146_p5, %p431_p7  ;;  %s449_s17 = sshll.u32 %s4070_s0, 4  ;;  %s450_s17 = int_to_ptr.vmem [resolvable:$true] %s449_s17 }
  0x1a   : > { %5271 = sst [smem:[#allocation23_spill]] %s5270_s29  ;;  %s4071_s19 = smov [#allocation9]  }
  0x1b   : > { %s5272_s30 = scalar_select %p4216_p8, 1, 0 }
  0x1c   : > { %p3420_p9 = pneg %p4216_p8  ;;  %s478_s20 = sshll.u32 %s4071_s19, 4  ;;  %s479_s20 = int_to_ptr.vmem [resolvable:$true] %s478_s20 }
  0x1d   : > { %s4072_s21 = smov [#allocation8]   ;;  %s3819_s27 = scalar_lea.vmem %s450_s17, 4096 }
  0x1e   : > { %p4225_p11 = pnand %p3420_p9, %p5244_p1  ;;  %s465_s22 = sshll.u32 %s4072_s21, 4  ;;  %s466_s22 = int_to_ptr.vmem [resolvable:$true] %s465_s22 }
  0x1f   : > { %p3820_p13 = scmp.ne.s32.totalorder %s450_s17, %s3819_s27  ;;  %p3827_p5 = scmp.lt.s32.totalorder %s450_s17, %s450_s17 }
  0x20   : > { %p3810_p12 = pneg %p4225_p11  ;;  %p3828_p7 = scmp.lt.s32.totalorder %s3819_s27, %s3819_s27 }
  0x22   : > { %p3822_p0 = pnand %p3820_p13, %p3810_p12  ;;  %p3829_p9 = por %p3828_p7, %p3827_p5 }
  0x24   : > { %p3823_p3 = pneg %p3822_p0 }
  0x26   : > { %p3830_p10 = pnand %p3829_p9, %p3823_p3 }
  0x28   : > { %3833 = shalt.err (!%p3830_p10)
}
  0x29   : > { %s4073_s0 = smov 128   ;;  %s4074_s19 = smov 8  }
  0x2a   : > { %s5274_s5 = sld [smem:[#allocation32_spill]]  ;;  %s3845_s23 = scalar_lea.vmem %s479_s20, 4096 }
  0x2b   : > { %p3846_p1 = scmp.ne.s32.totalorder %s479_s20, %s3845_s23  ;;  %p3853_p2 = scmp.lt.s32.totalorder %s479_s20, %s479_s20 }
  0x2c   : > { %p3854_p6 = scmp.lt.s32.totalorder %s3845_s23, %s3845_s23 }
  0x2d   : > { %p3848_p13 = pnand %p3846_p1, %p3810_p12 }
  0x2e   : > { %p3855_p5 = por %p3854_p6, %p3853_p2 }
  0x2f   : > { %p3849_p0 = pneg %p3848_p13 }
  0x30   : > { %3423 = dma.hbm_to_vmem [thread:$0]  (!%p4225_p11), %s5274_s5, 4096, %s450_s17, [#allocation7], %s4073_s0, %s4073_s0, %s4074_s19  }
  0x31   : > { %p3856_p3 = pnand %p3855_p5, %p3849_p0 }
  0x33   : > { %3859 = shalt.err (!%p3856_p3)
}
  0x34   : > { %s5275_s8 = sld [smem:[#allocation34_spill]]  ;;  %s3871_s29 = scalar_lea.vmem %s466_s22, 4096 }
  0x35   : > { %p3872_p10 = scmp.ne.s32.totalorder %s466_s22, %s3871_s29  ;;  %p3879_p9 = scmp.lt.s32.totalorder %s466_s22, %s466_s22 }
  0x36   : > { %p3880_p13 = scmp.lt.s32.totalorder %s3871_s29, %s3871_s29 }
  0x37   : > { %p3874_p7 = pnand %p3872_p10, %p3810_p12 }
  0x38   : > { %p3881_p4 = por %p3880_p13, %p3879_p9 }
  0x39   : > { %p3875_p1 = pneg %p3874_p7 }
  0x3a   : > { %3429 = dma.hbm_to_vmem [thread:$0]  (!%p4225_p11), %s5275_s8, 4096, %s479_s20, [#allocation10], %s4073_s0, %s4073_s0, %s4074_s19  }
  0x3b   : > { %p3882_p2 = pnand %p3881_p4, %p3875_p1 }
  0x3d   : > { %3885 = shalt.err (!%p3882_p2)
}
  0x3e   : > { %s5276_s7 = sld [smem:[#allocation33_spill]]  ;;  %s4075_s16 = smov [#allocation11]  }
  0x3f   : > { %s500_s20 = sshll.u32 %s4075_s16, 4  ;;  %s501_s20 = int_to_ptr.vmem [resolvable:$true] %s500_s20 }
  0x40   : > { %s3897_s21 = scalar_lea.vmem %s501_s20, 8192  ;;  %p3905_p3 = scmp.lt.s32.totalorder %s501_s20, %s501_s20 }
  0x41   : > { %p3898_p6 = scmp.ne.s32.totalorder %s501_s20, %s3897_s21  ;;  %p3906_p10 = scmp.lt.s32.totalorder %s3897_s21, %s3897_s21 }
  0x43   : > { %p3900_p0 = pnand %p3898_p6, %p3810_p12  ;;  %p3907_p4 = por %p3906_p10, %p3905_p3 }
  0x44   : > { %3426 = dma.hbm_to_vmem [thread:$0]  (!%p4225_p11), %s5276_s7, 4096, %s466_s22, [#allocation7], %s4073_s0, %s4073_s0, %s4074_s19  }
  0x45   : > { %p3901_p5 = pneg %p3900_p0 }
  0x47   : > { %p3908_p7 = pnand %p3907_p4, %p3901_p5 }
  0x49   : > { %3911 = shalt.err (!%p3908_p7)
}
  0x4a   : > { %s5247_s27 = smov 256   ;;  %s5248_s22 = smov 16  }
  0x4b   : > { %s5277_s12 = sld [smem:[#allocation35_spill]]  ;;  %s4267_s29 = sadd.s32 1, %s4068_s26  }
  0x4c   : > { %s43_s23 = ssub.s32 %s4068_s26, %s4267_s29  ;;  %s46_s17 = sadd.s32 1, %s4064_s25 }
  0x4d   : > { %p44_p12 = scmp.eq.s32.totalorder %s43_s23, 0  ;;  %p53_p1 = scmp.ne.s32.totalorder %s4064_s25, %s4060_s24 }
  0x4e   : > { %p54_p9 = scmp.eq.s32.totalorder %s4068_s26, 0  ;;  %p5279_p2 = scmp.eq.s32.totalorder %s4195_s13, 1 }
  0x4f   : > { %s4276_s16 = scalar_select %p44_p12, %s4064_s25, %s46_s17  }
  0x50   : > { %p55_p13 = por %p54_p9, %p53_p1  ;;  %p4280_p6 = por %p5279_p2, %p53_p1 }
  0x51   : > { %3432 = dma.hbm_to_vmem [thread:$0]  (!%p4225_p11), %s5277_s12, 8192, %s501_s20, [#allocation10], %s5247_s27, %s5247_s27, %s5248_s22  }
  0x52   : > { %5278 = sst [smem:[#allocation24_spill]] %s4276_s16  ;;  %p3451_p0 = scmp.lt.s32.totalorder %s4068_s26, 2 }
  0x53   : > { %s5280_s18 = scalar_select %p4280_p6, 1, 0 }
  0x54   : > { %s517_s21 = sand.u32 1, %s4064_s25   ;;  %s3283_s20 = sshll.u32 %s4068_s26, 11 }
  0x55   : > { %s3152_s0 = sshll.u32 %s517_s21, 7  ;;  %s5281_s22 = sld [smem:[#allocation31_spill]] }
  0x56   : > { %s521_s23 = scalar_lea.vmem [#allocation3], %s3152_s0  ;;  %p4294_p11 = pnand %p3451_p0, %p55_p13 }
  0x57   : > { %s529_s17 = sshll.u32 %s521_s23, 4  ;;  %s4298_s8 = scalar_lea.sflag [#allocation4], %s517_s21  ;;  %s4292_s17 = int_to_ptr.vmem [resolvable:$true] %s529_s17 }
  0x58   : > { %p3914_p3 = pneg %p4294_p11 }
  0x5b   : > { %s4290_s5 = scalar_lea.hbm %s5281_s22, %s3283_s20  ;;  %s3917_s0 = scalar_lea.hbm %s5281_s22, 4096 }
  0x5c   : > { %s3912_s12 = scalar_lea.hbm %s4290_s5, 2048  ;;  %p3918_p7 = scmp.lt.s32.totalorder %s4290_s5, %s5281_s22 }
  0x5d   : > { %p3913_p5 = scmp.ne.s32.totalorder %s4290_s5, %s3912_s12  ;;  %p3919_p12 = scmp.lt.s32.totalorder %s3917_s0, %s3912_s12 }
  0x5f   : > { %p3915_p10 = pnand %p3914_p3, %p3913_p5  ;;  %p3920_p1 = por %p3919_p12, %p3918_p7 }
  0x61   : > { %p3916_p4 = pneg %p3915_p10 }
  0x63   : > { %p3921_p9 = pnand %p3920_p1, %p3916_p4 }
  0x65   : > { %3924 = shalt.err (!%p3921_p9)
}
  0x66   : > { %s3925_s21 = scalar_lea.vmem %s4292_s17, 2048  ;;  %s4078_s16 = smov [#allocation3]  }
  0x67   : > { %p3926_p13 = scmp.ne.s32.totalorder %s4292_s17, %s3925_s21  ;;  %s3930_s25 = sshll.u32 %s4078_s16, 4  ;;  %s3931_s25 = int_to_ptr.vmem [resolvable:$false] %s3930_s25 }
  0x68   : > { %s3932_s27 = scalar_lea.vmem %s3931_s25, 4096  ;;  %p3933_p5 = scmp.lt.s32.totalorder %s4292_s17, %s3931_s25 }
  0x69   : > { %p3928_p2 = pnand %p3926_p13, %p3914_p3  ;;  %p3934_p10 = scmp.lt.s32.totalorder %s3932_s27, %s3925_s21 }
  0x6b   : > { %p3929_p0 = pneg %p3928_p2  ;;  %p3935_p6 = por %p3934_p10, %p3933_p5 }
  0x6d   : > { %p3936_p8 = pnand %p3935_p6, %p3929_p0 }
  0x6f   : > { %3939 = shalt.err (!%p3936_p8)
}
  0x70   : > { %s5283_s12 = smov 16   ;;  %s5284_s20 = smov 256  }
  0x71   : > { %3436 = dma.hbm_to_vmem [thread:$0]  (!%p4294_p11), %s4290_s5, 2048, %s4292_s17, %s4298_s8, %s5284_s20, %s5284_s20, %s5283_s12  }
  0x72   : > { %p5285_p3 = scmp.ne.s32.totalorder %s5272_s30, 0 }
  0x74   : > { %557 = sbr.rel (%p5285_p3) target bundleno = 2541 (0x9ed), region = 76 }
  0x79   : > { %s4325_s16 = sand.u32 1, %s4060_s24   ;;  %p5286_p8 = scmp.ne.s32.totalorder %s5269_s28, 0 }
  0x7a   : > { %s3157_s25 = sshll.u32 %s4325_s16, 7  ;;  %s560_s0 = scalar_lea.sflag [#allocation4], %s4325_s16 }
  0x7b   : > { %s4329_s19 = scalar_lea.vmem [#allocation3], %s3157_s25 }
  0x7c   : > { %4035 = dma.done.wait (%p5286_p8), %s560_s0, 2048  }
  0x7d   : > { %4037 = vsyncadd (%p5286_p8), %s560_s0, 4294965248  ;;  %p5287_p6 = scmp.eq.s32.totalorder %s4195_s13, 0 }
  0x7f   : > { %4039 = dma.done.wait (%p5287_p6), [#allocation7], 8192   ;;  %p5288_p11 = pmov %p5287_p6 }
  0x80   : > { %p5289_p4 = pmov %p5287_p6 }
  0x81   : > { %4041 = vsyncadd (%p5288_p11), [#allocation7], 4294959104 }
  0x82   : > { %4043 = dma.done.wait (%p5289_p4), [#allocation10], 12288   ;;  %p5290_p7 = pmov %p5289_p4 }
  0x83   : > { %v3507_v0 = vld [vmem:[#allocation6 + $0x74] ss:$8 sps:$4 sm:$0xff]   ;;  %v3509_v1 = vld [vmem:[#allocation6 + $0x70] ss:$8 sps:$4 sm:$0xff]   ;;  %v3510_v2 = vld [vmem:[#allocation6 + $0x64] ss:$8 sps:$4 sm:$0xff]  }
  0x84   : > { %4045 = vsyncadd (%p5290_p7), [#allocation10], 4294955008  ;;  %882 = vmatprep.subr.bf16.mxu0 %v3507_v0  ;;  %v3512_v3 = vld [vmem:[#allocation6 + $0x60] ss:$8 sps:$4 sm:$0xff]   ;;  %v3513_v4 = vld [vmem:[#allocation6 + $0x54] ss:$8 sps:$4 sm:$0xff]  }
  0x85   : > { %883 = vmatpush1.bf16.msra.mxu0 %v3509_v1  ;;  %v3515_v5 = vld [vmem:[#allocation6 + $0x50] ss:$8 sps:$4 sm:$0xff]   ;;  %v3516_v6 = vld [vmem:[#allocation6 + $0x44] ss:$8 sps:$4 sm:$0xff]   ;;  %v3518_v7 = vld [vmem:[#allocation6 + $0x40] ss:$8 sps:$4 sm:$0xff]  }
  0x86   : > { %884 = vmatprep.subr.bf16.mxu0 %v3510_v2  ;;  %v3519_v8 = vld [vmem:[#allocation6 + $0x34] ss:$8 sps:$4 sm:$0xff]   ;;  %v3521_v9 = vld [vmem:[#allocation6 + $0x30] ss:$8 sps:$4 sm:$0xff]   ;;  %v3522_v10 = vld [vmem:[#allocation6 + $0x24] ss:$8 sps:$4 sm:$0xff]  }
  0x87   : > { %v3524_v11 = vld [vmem:[#allocation6 + $0x20] ss:$8 sps:$4 sm:$0xff]   ;;  %v3525_v12 = vld [vmem:[#allocation6 + $0x14] ss:$8 sps:$4 sm:$0xff]   ;;  %v3527_v16 = vld [vmem:[#allocation6 + $0x10] ss:$8 sps:$4 sm:$0xff]  }
  0x88   : > { %v659_v13 = vld [vmem:[%s4329_s19 + $0x8] sm:$0xff]  ;;  %v661_v14 = vld [vmem:[%s4329_s19 + $0x18] sm:$0xff]  ;;  %v1001_v21 = vld [vmem:[%s5229_s6 + $0xf0] sm:$0xff]  ;;  %s3165_s0 = sshll.u32 %s4195_s13, 3  ;;  %vm1108_vm0 = vcmask 7168   ;;  %vm1318_vm1 = vcmask 523264  }
  0x89   : > { %885 = vmatpush1.bf16.msra.mxu0 %v3512_v3  ;;  %v4345_v15 = vpack.c.bf16 %v661_v14, %v659_v13  ;;  %v3528_v17 = vld [vmem:[#allocation6 + $0x4] ss:$8 sps:$4 sm:$0xff]   ;;  %v3530_v18 = vld [vmem:[#allocation6] ss:$8 sps:$4 sm:$0xff]   ;;  %v1002_v19 = vld [vmem:[%s5229_s6 + $0xf8] sm:$0xff]  ;;  %p649_p12 = scmp.lt.s32.totalorder %s3165_s0, 15 }
  0x8a   : > { %886 = vmatprep.subr.bf16.mxu0 %v3513_v4  ;;  %3284 = vmatprep.subr.mxu1 %v1002_v19  ;;  %v986_v20 = vld [vmem:[%s5229_s6 + $0x78] sm:$0xff]  ;;  %v985_v22 = vld [vmem:[%s5229_s6 + $0x70] sm:$0xff]  ;;  %v1000_v24 = vld [vmem:[%s5229_s6 + $0xe8] sm:$0xff]  ;;  %vm1668_vm2 = vcmask 64512   ;;  %s4082_s7 = smov 127   ;;  %s2849_s27 = sld [smem:[#allocation2]] }
  0x8b   : > { %914 = vmatprep.mubr.bf16.mxu0 %v4345_v15  ;;  %v3531_v23 = vld [vmem:[#allocation6 + $0xf4] ss:$8 sps:$4 sm:$0xff]   ;;  %3285 = vmatpush3.msra.mxu1 %v986_v20  ;;  %v3533_v25 = vld [vmem:[#allocation6 + $0xf0] ss:$8 sps:$4 sm:$0xff]   ;;  %v984_v26 = vld [vmem:[%s5229_s6 + $0x68] sm:$0xff]  ;;  %s5318_s0 = smov (!%p649_p12, %s3165_s0), 15 }
  0x8c   : > { %3286 = vmatprep.subr.mxu1 %v1001_v21  ;;  %v3534_v27 = vld [vmem:[#allocation6 + $0xe4] ss:$8 sps:$4 sm:$0xff]   ;;  %v998_v30 = vld [vmem:[%s5229_s6 + $0xd8] sm:$0xff]  ;;  %v997_v32 = vld [vmem:[%s5229_s6 + $0xd0] sm:$0xff]  ;;  %s3166_s5 = sshll.u32 %s5318_s0, 3  ;;  %s5115_s12 = sshll.u32 %s4325_s16, 3 }
  0x8d   : > { %887 = vmatpush1.bf16.msra.mxu0 %v3515_v5  ;;  %3287 = vmatpush3.msra.mxu1 %v985_v22  ;;  %v999_v28 = vld [vmem:[%s5229_s6 + $0xe0] sm:$0xff]  ;;  %v982_v31 = vld [vmem:[%s5229_s6 + $0x58] sm:$0xff]  ;;  %v981_v34 = vld [vmem:[%s5229_s6 + $0x50] sm:$0xff]  ;;  %s4527_s28 = scalar_lea.vmem %s5224_s1, %s3166_s5  ;;  %s5260_s20 = scalar_lea.vmem [#allocation12], %s5115_s12 }
  0x8e   : > { %888 = vmatprep.subr.bf16.mxu0 %v3516_v6  ;;  %v983_v29 = vld [vmem:[%s5229_s6 + $0x60] sm:$0xff]  ;;  %3288 = vmatprep.subr.mxu1 %v1000_v24  ;;  %v3537_v35 = vld [vmem:[#allocation6 + $0xd4] ss:$8 sps:$4 sm:$0xff]   ;;  %v996_v36 = vld [vmem:[%s5229_s6 + $0xc8] sm:$0xff]  ;;  %p654_p1 = scmp.lt.s32.totalorder %s4195_s13, 1  ;;  %s2907_s8 = sand.u32 1, %s4195_s13  }
  0x8f   : > { %3289 = vmatpush3.msra.mxu1 %v984_v26  ;;  %v3536_v33 = vld [vmem:[#allocation6 + $0xe0] ss:$8 sps:$4 sm:$0xff]   ;;  %v3539_v38 = vld [vmem:[#allocation6 + $0xd0] ss:$8 sps:$4 sm:$0xff]   ;;  %v3540_v39 = vld [vmem:[#allocation6 + $0xc4] ss:$8 sps:$4 sm:$0xff]  }
  0x90   : > { %3290 = vmatprep.subr.mxu1 %v999_v28  ;;  %v980_v37 = vld [vmem:[%s5229_s6 + $0x48] sm:$0xff]  ;;  %v3543_v41 = vld [vmem:[#allocation6 + $0xb4] ss:$8 sps:$4 sm:$0xff]   ;;  %v3545_v42 = vld [vmem:[#allocation6 + $0xb0] ss:$8 sps:$4 sm:$0xff]   ;;  %s655_s25 = scalar_select %p654_p1, %s4195_s13, 1 }
  0x91   : > { %889 = vmatpush1.bf16.msra.mxu0 %v3518_v7  ;;  %3291 = vmatpush3.msra.mxu1 %v983_v29  ;;  %v3542_v40 = vld [vmem:[#allocation6 + $0xc0] ss:$8 sps:$4 sm:$0xff]   ;;  %v3546_v43 = vld [vmem:[#allocation6 + $0xa4] ss:$8 sps:$4 sm:$0xff]   ;;  %v3549_v45 = vld [vmem:[#allocation6 + $0x94] ss:$8 sps:$4 sm:$0xff]  }
  0x92   : > { %890 = vmatprep.subr.bf16.mxu0 %v3519_v8  ;;  %3292 = vmatprep.subr.mxu1 %v998_v30  ;;  %v3548_v44 = vld [vmem:[#allocation6 + $0xa0] ss:$8 sps:$4 sm:$0xff]   ;;  %v3551_v46 = vld [vmem:[#allocation6 + $0x90] ss:$8 sps:$4 sm:$0xff]   ;;  %v3552_v47 = vld [vmem:[#allocation6 + $0x84] ss:$8 sps:$4 sm:$0xff]  }
  0x93   : > { %3293 = vmatpush3.msra.mxu1 %v982_v31  ;;  %v3554_v48 = vld [vmem:[#allocation6 + $0x80] ss:$8 sps:$4 sm:$0xff]   ;;  %v4394_v50 = vld [vmem:[%s4329_s19 + $0x10] sm:$0xff]  ;;  %v4400_v52 = vld [vmem:[%s4329_s19 + $0x38] sm:$0xff]  ;;  %s3167_s0 = sshll.u32 %s655_s25, 3  ;;  %s5131_s30 = sshll.u32 %s4195_s13, 7 }
  0x94   : > { %3294 = vmatprep.subr.mxu1 %v997_v32  ;;  %v4391_v49 = vld [vmem:[%s4329_s19] sm:$0xff]  ;;  %v4397_v51 = vld [vmem:[%s4329_s19 + $0x28] sm:$0xff]  ;;  %v4416_v56 = vld [vmem:[%s4329_s19 + $0x30] sm:$0xff]  ;;  %s5137_s21 = scalar_lea.hbm %s5238_s15, %s5131_s30  ;;  %s5145_s5 = scalar_lea.hbm %s5237_s14, %s5131_s30 }
  0x95   : > { %891 = vmatpush1.bf16.msra.mxu0 %v3521_v9  ;;  %3295 = vmatpush3.msra.mxu1 %v981_v34  ;;  %v4404_v53 = vpack.c.bf16 %v4394_v50, %v4391_v49  ;;  %v4408_v54 = vpack.c.bf16 %v4400_v52, %v4397_v51  ;;  %v4413_v55 = vld [vmem:[%s4329_s19 + $0x20] sm:$0xff]  ;;  %v4419_v57 = vld [vmem:[%s4329_s19 + $0x48] sm:$0xff]  ;;  %v4422_v58 = vld [vmem:[%s4329_s19 + $0x58] sm:$0xff]  ;;  %p5304_p13 = scmp.ne.s32.totalorder %s5280_s18, 0  ;;  %s4083_s13 = smov [#allocation13]  }
  0x96   : > { %892 = vmatprep.subr.bf16.mxu0 %v3522_v10  ;;  %3296 = vmatprep.subr.mxu1 %v996_v36  ;;  %v4426_v59 = vpack.c.bf16 %v4416_v56, %v4413_v55  ;;  %v4430_v60 = vpack.c.bf16 %v4422_v58, %v4419_v57  ;;  %v4435_v61 = vld [vmem:[%s4329_s19 + $0x40] sm:$0xff]  ;;  %v4438_v62 = vld [vmem:[%s4329_s19 + $0x50] sm:$0xff]  ;;  %v4441_v63 = vld [vmem:[%s4329_s19 + $0x68] sm:$0xff]  ;;  %s3944_s17 = sshll.u32 %s4083_s13, 4  ;;  %s3945_s17 = int_to_ptr.vmem [resolvable:$false] %s3944_s17 }
  0x97   : > { %3297 = vmatpush3.msra.mxu1 %v980_v37  ;;  %5291 = vst [vmem:[#allocation25_spill] sm:$0xff] %v4408_v54  ;;  %v4444_v0 = vld [vmem:[%s4329_s19 + $0x78] sm:$0xff]  ;;  %v4448_v1 = vpack.c.bf16 %v4438_v62, %v4435_v61  ;;  %v4457_v3 = vld [vmem:[%s4329_s19 + $0x60] sm:$0xff]  ;;  %v4460_v4 = vld [vmem:[%s4329_s19 + $0x70] sm:$0xff]  ;;  %s3946_s23 = scalar_lea.vmem %s3945_s17, 256 }
  0x98   : > { %5292 = vst [vmem:[#allocation26_spill] sm:$0xff] %v4426_v59  ;;  %5293 = vst [vmem:[#allocation27_spill] sm:$0xff] %v4430_v60  ;;  %v4452_v2 = vpack.c.bf16 %v4444_v0, %v4441_v63  ;;  %v4464_v5 = vpack.c.bf16 %v4460_v4, %v4457_v3  ;;  %v995_v6 = vld [vmem:[%s5229_s6 + $0xc0] sm:$0xff]  ;;  %v994_v8 = vld [vmem:[%s5229_s6 + $0xb8] sm:$0xff] }
  0x99   : > { %893 = vmatpush1.bf16.msra.mxu0 %v3524_v11  ;;  %5294 = vst [vmem:[#allocation28_spill] sm:$0xff] %v4448_v1  ;;  %3298 = vmatprep.subr.mxu1 %v995_v6  ;;  %v979_v7 = vld [vmem:[%s5229_s6 + $0x40] sm:$0xff]  ;;  %v978_v9 = vld [vmem:[%s5229_s6 + $0x38] sm:$0xff]  ;;  %v993_v10 = vld [vmem:[%s5229_s6 + $0xb0] sm:$0xff] }
  0x9a   : > { %894 = vmatprep.subr.bf16.mxu0 %v3525_v12  ;;  %5295 = vst [vmem:[#allocation29_spill] sm:$0xff] %v4452_v2  ;;  %5296 = vst [vmem:[#allocation30_spill] sm:$0xff] %v4464_v5  ;;  %3299 = vmatpush3.msra.mxu1 %v979_v7  ;;  %v977_v11 = vld [vmem:[%s5229_s6 + $0x30] sm:$0xff]  ;;  %v992_v12 = vld [vmem:[%s5229_s6 + $0xa8] sm:$0xff] }
  0x9b   : > { %3300 = vmatprep.subr.mxu1 %v994_v8  ;;  %v976_v13 = vld [vmem:[%s5229_s6 + $0x28] sm:$0xff]  ;;  %v991_v14 = vld [vmem:[%s5229_s6 + $0xa0] sm:$0xff]  ;;  %v989_v19 = vld [vmem:[%s5229_s6 + $0x90] sm:$0xff] }
  0x9c   : > { %3301 = vmatpush3.msra.mxu1 %v978_v9  ;;  %v973_v20 = vld [vmem:[%s5229_s6 + $0x10] sm:$0xff]  ;;  %v988_v21 = vld [vmem:[%s5229_s6 + $0x88] sm:$0xff]  ;;  %v971_v24 = vld [vmem:[%s5229_s6] sm:$0xff] }
  0x9d   : > { %895 = vmatpush1.bf16.msra.mxu0 %v3527_v16  ;;  %3302 = vmatprep.subr.mxu1 %v993_v10  ;;  %v975_v16 = vld [vmem:[%s5229_s6 + $0x20] sm:$0xff]  ;;  %v972_v22 = vld [vmem:[%s5229_s6 + $0x8] sm:$0xff] }
  0x9e   : > { %896 = vmatprep.subr.bf16.mxu0 %v3528_v17  ;;  %3303 = vmatpush3.msra.mxu1 %v977_v11  ;;  %v990_v17 = vld [vmem:[%s5229_s6 + $0x98] sm:$0xff] }
  0x9f   : > { %3304 = vmatprep.subr.mxu1 %v992_v12 }
  0xa0   : > { %3305 = vmatpush3.msra.mxu1 %v976_v13 }
  0xa1   : > { %897 = vmatpush1.bf16.msra.mxu0 %v3530_v18  ;;  %3306 = vmatprep.subr.mxu1 %v991_v14  ;;  %v974_v18 = vld [vmem:[%s5229_s6 + $0x18] sm:$0xff]  ;;  %v5252_v14 = vmov 0  }
  0xa2   : > { %898 = vmatprep.subr.bf16.mxu0 %v3531_v23  ;;  %3307 = vmatpush3.msra.mxu1 %v975_v16  ;;  %v987_v23 = vld [vmem:[%s5229_s6 + $0x80] sm:$0xff] }
  0xa3   : > { %3308 = vmatprep.subr.mxu1 %v990_v17  ;;  %3502 = vset.pattern.permute.xlu1 %v5252_v14  ;;  %v4530_v17 = vld [vmem:[%s4527_s28] sm:$0xff] }
  0xa4   : > { %3309 = vmatpush3.msra.mxu1 %v974_v18  ;;  %3501 = vset.pattern.permute.xlu0 %v5252_v14 }
  0xa5   : > { %899 = vmatpush2.bf16.msra.mxu0 %v3533_v25  ;;  %3310 = vmatprep.subr.mxu1 %v989_v19 }
  0xa6   : > { %900 = vmatprep.subr.bf16.mxu0 %v3534_v27  ;;  %3311 = vmatpush3.msra.mxu1 %v973_v20 }
  0xa7   : > { %3312 = vmatprep.subr.mxu1 %v988_v21 }
  0xa8   : > { %3313 = vmatpush3.msra.mxu1 %v972_v22  ;;  %v4536_v22 = vld [vmem:[%s4527_s28 + $0x8] sm:$0xff] }
  0xa9   : > { %901 = vmatpush2.bf16.msra.mxu0 %v3536_v33  ;;  %3314 = vmatprep.subr.mxu1 %v987_v23 }
  0xaa   : > { %902 = vmatprep.subr.bf16.mxu0 %v3537_v35  ;;  %3315 = vmatpush3.msra.mxu1 %v971_v24 }
  0xad   : > { %903 = vmatpush2.bf16.msra.mxu0 %v3539_v38 }
  0xae   : > { %904 = vmatprep.subr.bf16.mxu0 %v3540_v39 }
  0xb1   : > { %905 = vmatpush2.bf16.msra.mxu0 %v3542_v40 }
  0xb2   : > { %906 = vmatprep.subr.bf16.mxu0 %v3543_v41 }
  0xb5   : > { %907 = vmatpush2.bf16.msra.mxu0 %v3545_v42 }
  0xb6   : > { %908 = vmatprep.subr.bf16.mxu0 %v3546_v43 }
  0xb9   : > { %909 = vmatpush2.bf16.msra.mxu0 %v3548_v44 }
  0xba   : > { %910 = vmatprep.subr.bf16.mxu0 %v3549_v45 }
  0xbd   : > { %911 = vmatpush2.bf16.msra.mxu0 %v3551_v46 }
  0xbe   : > { %912 = vmatprep.subr.bf16.mxu0 %v3552_v47 }
  0xc1   : > { %913 = vmatpush2.bf16.msra.mxu0 %v3554_v48 }
  0xc4   : > { %915 = vmatmul.mubr.bf16.vlgmr.msra.gmra.mxu0 %v4404_v53 }
  0xc5   : > { %924 = vmatprep.mubr.bf16.mxu0 %v4408_v54 }
  0xcc   : > { %925 = vmatmul.mubr.bf16.gmra.mxu0 %v4426_v59 }
  0xcd   : > { %934 = vmatprep.mubr.bf16.mxu0 %v4430_v60 }
  0xd4   : > { %935 = vmatmul.mubr.bf16.gmra.mxu0 %v4448_v1 }
  0xd5   : > { %944 = vmatprep.mubr.bf16.mxu0 %v4452_v2 }
  0xdc   : > { %945 = vmatmul.mubr.bf16.gmra.mxu0 %v4464_v5 }
 0x184   : > { %v916_v25 = vpop.f32.mrf.mxu0 }
 0x186   : > { %v918_v26 = vpop.f32.mrf.mxu0 }
 0x187   : > { %3651 = vtanh.f32 %v918_v26 }
 0x188   : > { %3653 = vtanh.f32 %v916_v25  ;;  %v920_v27 = vpop.f32.mrf.mxu0 }
 0x18a   : > { %v922_v28 = vpop.f32.mrf.mxu0 }
 0x18b   : > { %3655 = vtanh.f32 %v922_v28 }
 0x18c   : > { %3657 = vtanh.f32 %v920_v27  ;;  %v926_v29 = vpop.f32.mrf.mxu0 }
 0x18e   : > { %v928_v30 = vpop.f32.mrf.mxu0 }
 0x18f   : > { %3659 = vtanh.f32 %v928_v30  ;;  %v4544_v30 = vld [vmem:[%s4527_s28 + $0x10] sm:$0xff] }
 0x190   : > { %3661 = vtanh.f32 %v926_v29  ;;  %v930_v31 = vpop.f32.mrf.mxu0 }
 0x192   : > { %v932_v32 = vpop.f32.mrf.mxu0 }
 0x193   : > { %3663 = vtanh.f32 %v932_v32 }
 0x194   : > { %v3652_v33 = vpop.eup %3651  ;;  %3665 = vtanh.f32 %v930_v31  ;;  %v936_v34 = vpop.f32.mrf.mxu0 }
 0x195   : > { %v3654_v35 = vpop.eup %3653  ;;  %1067 = vmatprep.mubr.f32.mxu1 %v3652_v33 }
 0x196   : > { %v938_v36 = vpop.f32.mrf.mxu0  ;;  %1068 = vmatmul.mubr.f32.vlgmr.msra.gmra.mxu1 %v3654_v35 }
 0x197   : > { %3667 = vtanh.f32 %v938_v36 }
 0x198   : > { %v3656_v37 = vpop.eup %3655  ;;  %3669 = vtanh.f32 %v936_v34  ;;  %v940_v38 = vpop.f32.mrf.mxu0 }
 0x199   : > { %v3658_v39 = vpop.eup %3657  ;;  %1072 = vmatprep.mubr.f32.mxu1 %v3656_v37 }
 0x19a   : > { %v942_v40 = vpop.f32.mrf.mxu0  ;;  %1073 = vmatmul.mubr.f32.gmra.mxu1 %v3658_v39 }
 0x19b   : > { %3671 = vtanh.f32 %v942_v40 }
 0x19c   : > { %v3660_v41 = vpop.eup %3659  ;;  %3673 = vtanh.f32 %v940_v38  ;;  %v946_v42 = vpop.f32.mrf.mxu0  ;;  %v4550_v38 = vld [vmem:[%s4527_s28 + $0x18] sm:$0xff] }
 0x19d   : > { %v3662_v43 = vpop.eup %3661  ;;  %1077 = vmatprep.mubr.f32.mxu1 %v3660_v41 }
 0x19e   : > { %v948_v44 = vpop.f32.mrf.mxu0  ;;  %1078 = vmatmul.mubr.f32.gmra.mxu1 %v3662_v43 }
 0x19f   : > { %3675 = vtanh.f32 %v948_v44 }
 0x1a0   : > { %v3664_v45 = vpop.eup %3663  ;;  %3677 = vtanh.f32 %v946_v42  ;;  %v950_v46 = vpop.f32.mrf.mxu0 }
 0x1a1   : > { %v3666_v47 = vpop.eup %3665  ;;  %1082 = vmatprep.mubr.f32.mxu1 %v3664_v45 }
 0x1a2   : > { %v952_v48 = vpop.f32.mrf.mxu0  ;;  %1083 = vmatmul.mubr.f32.gmra.mxu1 %v3666_v47 }
 0x1a3   : > { %3679 = vtanh.f32 %v952_v48  ;;  %v4555_v48 = vld [vmem:[%s4527_s28 + $0x20] sm:$0xff] }
 0x1a4   : > { %v3668_v6 = vpop.eup %3667  ;;  %3681 = vtanh.f32 %v950_v46 }
 0x1a5   : > { %v3670_v7 = vpop.eup %3669  ;;  %1087 = vmatprep.mubr.f32.mxu1 %v3668_v6 }
 0x1a6   : > { %1088 = vmatmul.mubr.f32.gmra.mxu1 %v3670_v7 }
 0x1a8   : > { %v3672_v8 = vpop.eup %3671 }
 0x1a9   : > { %v3674_v9 = vpop.eup %3673  ;;  %1092 = vmatprep.mubr.f32.mxu1 %v3672_v8 }
 0x1aa   : > { %1093 = vmatmul.mubr.f32.gmra.mxu1 %v3674_v9 }
 0x1ac   : > { %v3676_v10 = vpop.eup %3675 }
 0x1ad   : > { %v3678_v11 = vpop.eup %3677  ;;  %1097 = vmatprep.mubr.f32.mxu1 %v3676_v10 }
 0x1ae   : > { %1098 = vmatmul.mubr.f32.gmra.mxu1 %v3678_v11 }
 0x1b0   : > { %v3680_v12 = vpop.eup %3679 }
 0x1b1   : > { %v3682_v13 = vpop.eup %3681  ;;  %1102 = vmatprep.mubr.f32.mxu1 %v3680_v12 }
 0x1b2   : > { %1103 = vmatmul.mubr.f32.gmra.mxu1 %v3682_v13 }
 0x256   : > { %v3316_v16 = vpop.f32.mrf.mxu1 }
 0x258   : > { %v3317_v18 = vpop.f32.mrf.mxu1 }
 0x259   : > { %v3318_v19 = vadd.f32 %v3317_v18, %v3316_v16 }
 0x25a   : > { %v3319_v20 = vpop.f32.mrf.mxu1 }
 0x25b   : > { %v4533_v21 = vadd.f32 %v3318_v19, %v4530_v17 }
 0x25c   : > { %v3320_v23 = vpop.f32.mrf.mxu1 }
 0x25d   : > { %v1109_v24 = vsel %vm1108_vm0, %v4533_v21, -inf  ;;  %v3321_v25 = vadd.f32 %v3320_v23, %v3319_v20  ;;  %v4560_v20 = vld [vmem:[%s4527_s28 + $0x28] sm:$0xff] }
 0x25e   : > { %v1110_v26 = vrot.slane %v1109_v24, 4  ;;  %v3322_v27 = vpop.f32.mrf.mxu1 }
 0x25f   : > { %v4541_v28 = vadd.f32 %v3321_v25, %v4536_v22 }
 0x260   : > { %v1111_v29 = vmax.f32 %v1109_v24, %v1110_v26  ;;  %v3323_v31 = vpop.f32.mrf.mxu1 }
 0x261   : > { %v1116_v32 = vsel %vm1108_vm0, %v4541_v28, -inf  ;;  %v3324_v33 = vadd.f32 %v3323_v31, %v3322_v27 }
 0x262   : > { %v1112_v34 = vrot.slane %v1111_v29, 2  ;;  %v3325_v35 = vpop.f32.mrf.mxu1  ;;  %v1117_v36 = vrot.slane %v1116_v32, 4 }
 0x263   : > { %v1080_v37 = vadd.f32 %v3324_v33, %v4544_v30 }
 0x264   : > { %v3326_v39 = vpop.f32.mrf.mxu1  ;;  %v1113_v42 = vmax.f32 %v1111_v29, %v1112_v34  ;;  %v1118_v45 = vmax.f32 %v1116_v32, %v1117_v36 }
 0x265   : > { %v1123_v40 = vsel %vm1108_vm0, %v1080_v37, -inf  ;;  %v3327_v41 = vadd.f32 %v3326_v39, %v3325_v35  ;;  %v4565_v39 = vld [vmem:[%s4527_s28 + $0x30] sm:$0xff] }
 0x266   : > { %v1124_v43 = vrot.slane %v1123_v40, 4  ;;  %v3328_v44 = vpop.f32.mrf.mxu1  ;;  %v1114_v9 = vrot.slane %v1113_v42, 1  ;;  %v1119_v13 = vrot.slane %v1118_v45, 2 }
 0x267   : > { %v1085_v46 = vadd.f32 %v3327_v41, %v4550_v38 }
 0x268   : > { %v1125_v47 = vmax.f32 %v1123_v40, %v1124_v43  ;;  %v3329_v6 = vpop.f32.mrf.mxu1  ;;  %v1115_v26 = vmax.f32 %v1113_v42, %v1114_v9  ;;  %v1120_v32 = vmax.f32 %v1118_v45, %v1119_v13 }
 0x269   : > { %v1130_v7 = vsel %vm1108_vm0, %v1085_v46, -inf  ;;  %v3330_v8 = vadd.f32 %v3329_v6, %v3328_v44 }
 0x26a   : > { %v1126_v10 = vrot.slane %v1125_v47, 2  ;;  %v1131_v11 = vrot.slane %v1130_v7, 4  ;;  %v3331_v12 = vpop.f32.mrf.mxu1  ;;  %v1121_v45 = vrot.slane %v1120_v32, 1 }
 0x26b   : > { %v1090_v16 = vadd.f32 %v3330_v8, %v4555_v48 }
 0x26c   : > { %v1127_v18 = vmax.f32 %v1125_v47, %v1126_v10  ;;  %v1132_v19 = vmax.f32 %v1130_v7, %v1131_v11  ;;  %v3332_v23 = vpop.f32.mrf.mxu1  ;;  %v1165_v47 = vsub.f32 %v4533_v21, %v1115_v26 }
 0x26d   : > { %v1137_v24 = vsel %vm1108_vm0, %v1090_v16, -inf  ;;  %v3333_v25 = vadd.f32 %v3332_v23, %v3331_v12 }
 0x26e   : > { %v1128_v27 = vrot.slane %v1127_v18, 1  ;;  %v1133_v29 = vrot.slane %v1132_v19, 2  ;;  %v3334_v31 = vpop.f32.mrf.mxu1  ;;  %v1138_v33 = vrot.slane %v1137_v24, 4 }
 0x26f   : > { %v1095_v34 = vadd.f32 %v3333_v25, %v4560_v20 }
 0x270   : > { %v1129_v35 = vmax.f32 %v1127_v18, %v1128_v27  ;;  %v1134_v36 = vmax.f32 %v1132_v19, %v1133_v29  ;;  %v3335_v40 = vpop.f32.mrf.mxu1  ;;  %v1139_v41 = vmax.f32 %v1137_v24, %v1138_v33  ;;  %v4571_v18 = vld [vmem:[%s4527_s28 + $0x38] sm:$0xff]  ;;  %v1173_v27 = vmul.f32 1.442695, %v1165_v47 }
 0x271   : > { %v1144_v43 = vsel %vm1108_vm0, %v1095_v34, -inf  ;;  %v3336_v44 = vadd.f32 %v3335_v40, %v3334_v31  ;;  %v1122_v29 = vmax.f32 %v1120_v32, %v1121_v45 }
 0x272   : > { %v1167_v42 = vsub.f32 %v1080_v37, %v1129_v35  ;;  %v1135_v6 = vrot.slane %v1134_v36, 1  ;;  %v1145_v7 = vrot.slane %v1144_v43, 4  ;;  %v3337_v8 = vpop.f32.mrf.mxu1  ;;  %v1140_v9 = vrot.slane %v1139_v41, 2 }
 0x273   : > { %v1100_v10 = vadd.f32 %v3336_v44, %v4565_v39  ;;  %v1166_v47 = vsub.f32 %v4541_v28, %v1122_v29 }
 0x274   : > { %v1177_v11 = vmul.f32 1.442695, %v1167_v42  ;;  %v1136_v12 = vmax.f32 %v1134_v36, %v1135_v6  ;;  %v1146_v13 = vmax.f32 %v1144_v43, %v1145_v7  ;;  %v3338_v19 = vpop.f32.mrf.mxu1  ;;  %v1141_v23 = vmax.f32 %v1139_v41, %v1140_v9 }
 0x275   : > { %v1151_v24 = vsel %vm1108_vm0, %v1100_v10, -inf  ;;  %v3339_v25 = vadd.f32 %v3338_v19, %v3337_v8 }
 0x276   : > { %v1168_v21 = vsub.f32 %v1085_v46, %v1136_v12  ;;  %v1147_v37 = vrot.slane %v1146_v13, 2  ;;  %v1152_v26 = vrot.slane %v1151_v24, 4  ;;  %3683 = vpow2.f32 %v1177_v11 }
 0x277   : > { %v1142_v31 = vrot.slane %v1141_v23, 1  ;;  %v1105_v33 = vadd.f32 %v3339_v25, %v4571_v18  ;;  %3685 = vpow2.f32 %v1173_v27 }
 0x278   : > { %v1148_v35 = vmax.f32 %v1146_v13, %v1147_v37  ;;  %v1153_v40 = vmax.f32 %v1151_v24, %v1152_v26  ;;  %v1179_v44 = vmul.f32 1.442695, %v1168_v21  ;;  %v1175_v13 = vmul.f32 1.442695, %v1166_v47 }
 0x279   : > { %v1143_v36 = vmax.f32 %v1141_v23, %v1142_v31  ;;  %v1158_v43 = vsel %vm1108_vm0, %v1105_v33, -inf }
 0x27a   : > { %v1149_v42 = vrot.slane %v1148_v35, 1  ;;  %v1154_v41 = vrot.slane %v1153_v40, 2  ;;  %v1159_v6 = vrot.slane %v1158_v43, 4  ;;  %3687 = vpow2.f32 %v1179_v44 }
 0x27b   : > { %v1169_v46 = vsub.f32 %v1090_v16, %v1143_v36 }
 0x27c   : > { %v1150_v7 = vmax.f32 %v1148_v35, %v1149_v42  ;;  %v1155_v8 = vmax.f32 %v1153_v40, %v1154_v41  ;;  %v1160_v32 = vmax.f32 %v1158_v43, %v1159_v6 }
 0x27d   : > { %v1181_v45 = vmul.f32 1.442695, %v1169_v46 }
 0x27e   : > { %v1170_v9 = vsub.f32 %v1095_v34, %v1150_v7  ;;  %v1156_v11 = vrot.slane %v1155_v8, 1  ;;  %v1161_v12 = vrot.slane %v1160_v32, 2 }
 0x27f   : > { %3689 = vpow2.f32 %v1181_v45 }
 0x280   : > { %v1183_v19 = vmul.f32 1.442695, %v1170_v9  ;;  %v1157_v23 = vmax.f32 %v1155_v8, %v1156_v11  ;;  %v1162_v24 = vmax.f32 %v1160_v32, %v1161_v12 }
 0x282   : > { %3691 = vpow2.f32 %v1183_v19  ;;  %v1171_v25 = vsub.f32 %v1100_v10, %v1157_v23  ;;  %v1163_v21 = vrot.slane %v1162_v24, 1 }
 0x283   : > { %3693 = vpow2.f32 %v1175_v13  ;;  %v4577_v27 = vpop.eup %3683 }
 0x284   : > { %v1185_v28 = vmul.f32 1.442695, %v1171_v25  ;;  %v1164_v16 = vmax.f32 %v1162_v24, %v1163_v21  ;;  %v1203_v34 = vsel %vm1108_vm0, %v4577_v27, 0.0  ;;  %v4581_v26 = vpop.eup %3685 }
 0x285   : > { %v1204_v31 = vrot.slane %v1203_v34, 4  ;;  %v1189_v10 = vsel %vm1108_vm0, %v4581_v26, 0.0 }
 0x286   : > { %3695 = vpow2.f32 %v1185_v28  ;;  %v1172_v37 = vsub.f32 %v1105_v33, %v1164_v16  ;;  %v1190_v43 = vrot.slane %v1189_v10, 4 }
 0x287   : > { %v4583_v35 = vpop.eup %3687  ;;  %v1205_v33 = vadd.f32 %v1204_v31, %v1203_v34 }
 0x288   : > { %v1187_v29 = vmul.f32 1.442695, %v1172_v37  ;;  %v1210_v41 = vsel %vm1108_vm0, %v4583_v35, 0.0  ;;  %v1191_v8 = vadd.f32 %v1190_v43, %v1189_v10 }
 0x289   : > { %v1211_v32 = vrot.slane %v1210_v41, 4  ;;  %v1206_v9 = vrot.slane %v1205_v33, 2 }
 0x28a   : > { %3697 = vpow2.f32 %v1187_v29  ;;  %v1192_v37 = vrot.slane %v1191_v8, 2 }
 0x28b   : > { %v1212_v28 = vadd.f32 %v1211_v32, %v1210_v41  ;;  %v1207_v16 = vadd.f32 %v1206_v9, %v1205_v33 }
 0x28c   : > { %v4587_v40 = vpop.eup %3689  ;;  %v1193_v5 = vadd.f32 %v1192_v37, %v1191_v8 }
 0x28d   : > { %v1217_v36 = vsel %vm1108_vm0, %v4587_v40, 0.0  ;;  %v1213_v2 = vrot.slane %v1212_v28, 2 }
 0x28e   : > { %v1218_v44 = vrot.slane %v1217_v36, 4  ;;  %v1194_v32 = vrot.slane %v1193_v5, 1 }
 0x28f   : > { %v3692_v42 = vpop.eup %3691 }
 0x290   : > { %v4593_v6 = vpop.eup %3693  ;;  %v1219_v47 = vadd.f32 %v1218_v44, %v1217_v36  ;;  %v1224_v46 = vsel %vm1108_vm0, %v3692_v42, 0.0  ;;  %v1195_v59 = vadd.f32 %v1194_v32, %v1193_v5  ;;  %v3570_v32 = vld [vmem:[#allocation9 + $0x20] ss:$8 sps:$4 sm:$0xff]  }
 0x291   : > { %v1225_v7 = vrot.slane %v1224_v46, 4  ;;  %v1196_v12 = vsel %vm1108_vm0, %v4593_v6, 0.0 }
 0x292   : > { %v1220_v45 = vrot.slane %v1219_v47, 2  ;;  %v1197_v21 = vrot.slane %v1196_v12, 4 }
 0x293   : > { %v4596_v11 = vpop.eup %3695  ;;  %v1226_v13 = vadd.f32 %v1225_v7, %v1224_v46  ;;  %v1208_v7 = vrot.slane %v1207_v16, 1 }
 0x294   : > { %v1231_v19 = vsel %vm1108_vm0, %v4596_v11, 0.0  ;;  %v1221_v23 = vadd.f32 %v1220_v45, %v1219_v47  ;;  %v1198_v46 = vadd.f32 %v1197_v21, %v1196_v12 }
 0x295   : > { %v1232_v24 = vrot.slane %v1231_v19, 4  ;;  %v1227_v25 = vrot.slane %v1226_v13, 2  ;;  %v1209_v41 = vadd.f32 %v1208_v7, %v1207_v16  ;;  %v3560_v7 = vld [vmem:[#allocation9 + $0x64] ss:$8 sps:$4 sm:$0xff]  }
 0x296   : > { %v1222_v10 = vrot.slane %v1221_v23, 1  ;;  %v1199_v9 = vrot.slane %v1198_v46, 2 }
 0x297   : > { %v3698_v34 = vpop.eup %3697  ;;  %v1233_v29 = vadd.f32 %v1232_v24, %v1231_v19  ;;  %v1228_v31 = vadd.f32 %v1227_v25, %v1226_v13  ;;  %v1214_v24 = vadd.f32 %v1213_v2, %v1212_v28 }
 0x298   : > { %v1238_v36 = vsel %vm1108_vm0, %v3698_v34, 0.0  ;;  %v1223_v45 = vadd.f32 %v1222_v10, %v1221_v23  ;;  %v1200_v54 = vadd.f32 %v1199_v9, %v1198_v46  ;;  %v4080_v46 = vmov 0.0   ;;  %v3575_v9 = vld [vmem:[#allocation9 + $0x14] ss:$8 sps:$4 sm:$0xff]  }
 0x299   : > { %v1239_v43 = vrot.slane %v1238_v36, 4  ;;  %v1229_v44 = vrot.slane %v1228_v31, 1  ;;  %v1234_v14 = vrot.slane %v1233_v29, 2  ;;  %v1215_v21 = vrot.slane %v1214_v24, 1  ;;  %1386 = vmatprep.mubr.f32.mxu1 %v4080_v46 }
 0x29a   : > { %v1201_v23 = vrot.slane %v1200_v54, 1 }
 0x29b   : > { %v1230_v47 = vadd.f32 %v1229_v44, %v1228_v31  ;;  %v1240_v1 = vadd.f32 %v1239_v43, %v1238_v36  ;;  %v1235_v60 = vadd.f32 %v1234_v14, %v1233_v29  ;;  %v1216_v14 = vadd.f32 %v1215_v21, %v1214_v24  ;;  %v3576_v24 = vld [vmem:[#allocation9] ss:$8 sps:$4 sm:$0xff]  }
 0x29c   : > { %v1202_v29 = vadd.f32 %v1201_v23, %v1200_v54  ;;  %v3582_v21 = vld [vmem:[#allocation9 + $0xe0] ss:$8 sps:$4 sm:$0xff]   ;;  %v3585_v23 = vld [vmem:[#allocation9 + $0xd0] ss:$8 sps:$4 sm:$0xff]  }
 0x29d   : > { %3699 = vrcp.f32 %v1230_v47  ;;  %v1241_v33 = vrot.slane %v1240_v1, 2  ;;  %v1236_v19 = vrot.slane %v1235_v60, 1  ;;  %v3561_v47 = vld [vmem:[#allocation9 + $0x50] ss:$8 sps:$4 sm:$0xff]  }
 0x29e   : > { %3701 = vrcp.f32 %v1223_v45  ;;  %v3564_v45 = vld [vmem:[#allocation9 + $0x40] ss:$8 sps:$4 sm:$0xff]  }
 0x29f   : > { %v1242_v13 = vadd.f32 %v1241_v33, %v1240_v1  ;;  %3703 = vrcp.f32 %v1209_v41  ;;  %v1237_v8 = vadd.f32 %v1236_v19, %v1235_v60  ;;  %v3567_v33 = vld [vmem:[#allocation9 + $0x30] ss:$8 sps:$4 sm:$0xff]   ;;  %v3572_v41 = vld [vmem:[#allocation9 + $0x24] ss:$8 sps:$4 sm:$0xff]  }
 0x2a0   : > { %v3578_v19 = vld [vmem:[#allocation9 + $0x4] ss:$8 sps:$4 sm:$0xff]  }
 0x2a1   : > { %v1243_v25 = vrot.slane %v1242_v13, 1 }
 0x2a3   : > { %v1244_v12 = vadd.f32 %v1243_v25, %v1242_v13  ;;  %v3573_v13 = vld [vmem:[#allocation9 + $0x10] ss:$8 sps:$4 sm:$0xff]   ;;  %v3581_v25 = vld [vmem:[#allocation9 + $0xf4] ss:$8 sps:$4 sm:$0xff]  }
 0x2a5   : > { %3705 = vrcp.f32 %v1244_v12  ;;  %v3579_v12 = vld [vmem:[#allocation9 + $0xf0] ss:$8 sps:$4 sm:$0xff]  }
 0x2a6   : > { %3707 = vrcp.f32 %v1195_v59 }
 0x2a7   : > { %3709 = vrcp.f32 %v1237_v8  ;;  %v3584_v8 = vld [vmem:[#allocation9 + $0xe4] ss:$8 sps:$4 sm:$0xff]  }
 0x2a8   : > { %3711 = vrcp.f32 %v1216_v14  ;;  %v3587_v14 = vld [vmem:[#allocation9 + $0xd4] ss:$8 sps:$4 sm:$0xff]  }
 0x2a9   : > { %3713 = vrcp.f32 %v1202_v29  ;;  %v3593_v29 = vld [vmem:[#allocation9 + $0xb4] ss:$8 sps:$4 sm:$0xff]  }
 0x2aa   : > { %v3700_v37 = vpop.eup %3699 }
 0x2ab   : > { %v1258_v16 = vmul.f32 %v3700_v37, %v3692_v42  ;;  %v3702_v31 = vpop.eup %3701  ;;  %v3590_v37 = vld [vmem:[#allocation9 + $0xc4] ss:$8 sps:$4 sm:$0xff]  }
 0x2ac   : > { %v1257_v1 = vmul.f32 %v3702_v31, %v4587_v40  ;;  %v3704_v2 = vpop.eup %3703  ;;  %v3591_v31 = vld [vmem:[#allocation9 + $0xb0] ss:$8 sps:$4 sm:$0xff]  }
 0x2ad   : > { %1289 = vperm.xlu1 %3502, %v1258_v16   ;;  %v1255_v60 = vmul.f32 %v3704_v2, %v4577_v27  ;;  %v3555_v27 = vld [vmem:[#allocation9 + $0x70] ss:$8 sps:$4 sm:$0xff]   ;;  %v3588_v16 = vld [vmem:[#allocation9 + $0xc0] ss:$8 sps:$4 sm:$0xff]  }
 0x2ae   : > { %v3594_v2 = vld [vmem:[#allocation9 + $0xa0] ss:$8 sps:$4 sm:$0xff]  }
 0x2b1   : > { %1284 = vperm.xlu1 %3502, %v1257_v1   ;;  %v3596_v1 = vld [vmem:[#allocation9 + $0xa4] ss:$8 sps:$4 sm:$0xff]  }
 0x2b2   : > { %v3706_v5 = vpop.eup %3705 }
 0x2b3   : > { %v3708_v28 = vpop.eup %3707  ;;  %v1260_v10 = vmul.f32 %v3706_v5, %v3698_v34  ;;  %v3557_v34 = vld [vmem:[#allocation9 + $0x74] ss:$8 sps:$4 sm:$0xff]  }
 0x2b4   : > { %v3710_v59 = vpop.eup %3709  ;;  %v1253_v36 = vmul.f32 %v3708_v28, %v4581_v26  ;;  %1587 = vmatprep.subr.bf16.mxu0 %v3557_v34  ;;  %v3558_v26 = vld [vmem:[#allocation9 + $0x60] ss:$8 sps:$4 sm:$0xff]   ;;  %v3599_v5 = vld [vmem:[#allocation9 + $0x94] ss:$8 sps:$4 sm:$0xff]   ;;  %v3597_v28 = vld [vmem:[#allocation9 + $0x90] ss:$8 sps:$4 sm:$0xff]  }
 0x2b5   : > { %1274 = vperm.xlu1 %3502, %v1255_v60   ;;  %1299 = vperm.xlu0 %3501, %v1260_v10   ;;  %v1259_v42 = vmul.f32 %v3710_v59, %v4596_v11  ;;  %v3712_v54 = vpop.eup %3711  ;;  %v3563_v11 = vld [vmem:[#allocation9 + $0x54] ss:$8 sps:$4 sm:$0xff]  }
 0x2b6   : > { %v1256_v40 = vmul.f32 %v3712_v54, %v4583_v35  ;;  %v3714_v43 = vpop.eup %3713  ;;  %1588 = vmatpush1.bf16.msra.mxu0 %v3555_v27  ;;  %v3566_v35 = vld [vmem:[#allocation9 + $0x44] ss:$8 sps:$4 sm:$0xff]  }
 0x2b7   : > { %v1254_v44 = vmul.f32 %v3714_v43, %v4593_v6  ;;  %1589 = vmatprep.subr.bf16.mxu0 %v3560_v7  ;;  %v3569_v6 = vld [vmem:[#allocation9 + $0x34] ss:$8 sps:$4 sm:$0xff]  }
 0x2b9   : > { %1264 = vperm.xlu1 %3502, %v1253_v36   ;;  %1294 = vperm.xlu0 %3501, %v1259_v42  }
 0x2ba   : > { %1590 = vmatpush1.bf16.msra.mxu0 %v3558_v26 }
 0x2bb   : > { %1591 = vmatprep.subr.bf16.mxu0 %v3563_v11 }
 0x2bd   : > { %1279 = vperm.xlu0 %3501, %v1256_v40  }
 0x2be   : > { %1592 = vmatpush1.bf16.msra.mxu0 %v3561_v47 }
 0x2bf   : > { %1593 = vmatprep.subr.bf16.mxu0 %v3566_v35  ;;  %v3788_v35 = vld [vmem:[%s4329_s19 + $0x8] sm:$0xff] }
 0x2c1   : > { %1269 = vperm.xlu0 %3501, %v1254_v44  }
 0x2c2   : > { %1594 = vmatpush1.bf16.msra.mxu0 %v3564_v45 }
 0x2c3   : > { %1595 = vmatprep.subr.bf16.mxu0 %v3569_v6 }
 0x2c6   : > { %1596 = vmatpush1.bf16.msra.mxu0 %v3567_v33 }
 0x2c7   : > { %1597 = vmatprep.subr.bf16.mxu0 %v3572_v41  ;;  %v4081_v41 = vmov 2  }
 0x2c8   : > { %3503 = vset.pattern.permute.xlu0 %v4081_v41  ;;  %3504 = vset.pattern.permute.xlu1 %v4081_v41  ;;  %v2153_v41 = vld [vmem:[%s5233_s10 + $0x70] sm:$0xff] }
 0x2c9   : > { %2042 = vperm.xlu0 %3503, %v4530_v17   ;;  %2047 = vperm.xlu1 %3504, %v4536_v22   ;;  %v3605_v17 = vld [vmem:[#allocation8 + $0x74] ss:$8 sps:$4 sm:$0xff]   ;;  %v1660_v22 = vld [vmem:[%s5227_s4] sm:$0xff] }
 0x2ca   : > { %1598 = vmatpush1.bf16.msra.mxu0 %v3570_v32  ;;  %v5297_v32 = vmov 0  }
 0x2cb   : > { %1599 = vmatprep.subr.bf16.mxu0 %v3575_v9 }
 0x2cd   : > { %2057 = vperm.xlu0 %3503, %v4550_v38   ;;  %2052 = vperm.xlu1 %3504, %v4544_v30  }
 0x2ce   : > { %1600 = vmatpush1.bf16.msra.mxu0 %v3573_v13 }
 0x2cf   : > { %1601 = vmatprep.subr.bf16.mxu0 %v3578_v19  ;;  %v3603_v19 = vld [vmem:[#allocation8 + $0x70] ss:$8 sps:$4 sm:$0xff]  }
 0x2d1   : > { %2067 = vperm.xlu0 %3503, %v4560_v20   ;;  %2062 = vperm.xlu1 %3504, %v4555_v48  }
 0x2d2   : > { %1602 = vmatpush1.bf16.msra.mxu0 %v3576_v24  ;;  %v3608_v24 = vld [vmem:[#allocation8 + $0x64] ss:$8 sps:$4 sm:$0xff]  }
 0x2d3   : > { %1603 = vmatprep.subr.bf16.mxu0 %v3581_v25 }
 0x2d5   : > { %2077 = vperm.xlu0 %3503, %v4571_v18   ;;  %2072 = vperm.xlu1 %3504, %v4565_v39  }
 0x2d6   : > { %1604 = vmatpush2.bf16.msra.mxu0 %v3579_v12 }
 0x2d7   : > { %1605 = vmatprep.subr.bf16.mxu0 %v3584_v8  ;;  %v3606_v8 = vld [vmem:[#allocation8 + $0x60] ss:$8 sps:$4 sm:$0xff]  }
 0x2d9   : > { %3505 = vset.pattern.permute.xlu0 %v5297_v32  ;;  %3506 = vset.pattern.permute.xlu1 %v5297_v32  ;;  %v2168_v32 = vld [vmem:[%s5233_s10 + $0xe8] sm:$0xff] }
 0x2da   : > { %1606 = vmatpush2.bf16.msra.mxu0 %v3582_v21  ;;  %v1661_v21 = vld [vmem:[%s5227_s4 + $0x8] sm:$0xff]  ;;  %2183 = vrot.lane.b32.xlu0 %v4565_v39, %s4082_s7 }
 0x2db   : > { %1607 = vmatprep.subr.bf16.mxu0 %v3587_v14  ;;  %v3611_v14 = vld [vmem:[#allocation8 + $0x54] ss:$8 sps:$4 sm:$0xff]   ;;  %2185 = vrot.lane.b32.xlu1 %v4571_v18, %s4082_s7 }
 0x2de   : > { %1608 = vmatpush2.bf16.msra.mxu0 %v3585_v23  ;;  %v3609_v23 = vld [vmem:[#allocation8 + $0x50] ss:$8 sps:$4 sm:$0xff]   ;;  %2179 = vrot.lane.b32.xlu0 %v4555_v48, %s4082_s7 }
 0x2df   : > { %1609 = vmatprep.subr.bf16.mxu0 %v3590_v37  ;;  %v1662_v37 = vld [vmem:[%s5227_s4 + $0x10] sm:$0xff]  ;;  %2181 = vrot.lane.b32.xlu1 %v4560_v20, %s4082_s7 }
 0x2e2   : > { %1610 = vmatpush2.bf16.msra.mxu0 %v3588_v16  ;;  %v3614_v16 = vld [vmem:[#allocation8 + $0x44] ss:$8 sps:$4 sm:$0xff]   ;;  %2175 = vrot.lane.b32.xlu0 %v4544_v30, %s4082_s7 }
 0x2e3   : > { %1611 = vmatprep.subr.bf16.mxu0 %v3593_v29  ;;  %v3612_v29 = vld [vmem:[#allocation8 + $0x40] ss:$8 sps:$4 sm:$0xff]   ;;  %2177 = vrot.lane.b32.xlu1 %v4550_v38, %s4082_s7  ;;  %v2081_v38 = vlaneseq }
 0x2e6   : > { %1612 = vmatpush2.bf16.msra.mxu0 %v3591_v31  ;;  %v1663_v31 = vld [vmem:[%s5227_s4 + $0x18] sm:$0xff] }
 0x2e7   : > { %1613 = vmatprep.subr.bf16.mxu0 %v3596_v1  ;;  %v3617_v1 = vld [vmem:[#allocation8 + $0x34] ss:$8 sps:$4 sm:$0xff]  }
 0x2ea   : > { %1614 = vmatpush2.bf16.msra.mxu0 %v3594_v2  ;;  %v3615_v2 = vld [vmem:[#allocation8 + $0x30] ss:$8 sps:$4 sm:$0xff]  }
 0x2eb   : > { %1615 = vmatprep.subr.bf16.mxu0 %v3599_v5  ;;  %v1664_v5 = vld [vmem:[%s5227_s4 + $0x20] sm:$0xff] }
 0x2ee   : > { %1616 = vmatpush2.bf16.msra.mxu0 %v3597_v28  ;;  %v3620_v28 = vld [vmem:[#allocation8 + $0x24] ss:$8 sps:$4 sm:$0xff]  }
 0x328   : > { %v1290_v60 = vpop.permute.xlu1 %1289 }
 0x329   : > { %v1313_v44 = vmul.f32 %v1290_v60, %v4422_v58  ;;  %v1312_v27 = vmul.f32 %v1290_v60, %v4438_v62  ;;  %v3618_v60 = vld [vmem:[#allocation8 + $0x20] ss:$8 sps:$4 sm:$0xff]  }
 0x32c   : > { %v1285_v42 = vpop.permute.xlu1 %1284 }
 0x330   : > { %v1300_v10 = vpop.permute.xlu0 %1299  ;;  %v1275_v34 = vpop.permute.xlu1 %1274 }
 0x331   : > { %v1316_v59 = vmul.f32 %v1300_v10, %v4460_v4  ;;  %v1317_v36 = vmul.f32 %v1300_v10, %v4444_v0  ;;  %v1311_v4 = vmul.f32 %v1285_v42, %v4419_v57  ;;  %v1310_v0 = vmul.f32 %v1285_v42, %v4435_v61  ;;  %v3787_v57 = vld [vmem:[%s4329_s19 + $0x18] sm:$0xff]  ;;  %v1665_v10 = vld [vmem:[%s5227_s4 + $0x28] sm:$0xff]  ;;  %v1666_v42 = vld [vmem:[%s5227_s4 + $0x30] sm:$0xff] }
 0x332   : > { %v1307_v62 = vmul.f32 %v1275_v34, %v4397_v51  ;;  %v1306_v26 = vmul.f32 %v1275_v34, %v4413_v55  ;;  %v1261_v51 = vld [vmem:[%s5226_s3] sm:$0xff] }
 0x333   : > { %1338 = vmatprep.subr.mxu1 %v1317_v36  ;;  %v3602_v55 = vld [vmem:[#allocation9 + $0x84] ss:$8 sps:$4 sm:$0xff]   ;;  %v3621_v36 = vld [vmem:[#allocation8 + $0x10] ss:$8 sps:$4 sm:$0xff]  }
 0x334   : > { %1339 = vmatpush1.msra.mxu1 %v1316_v59  ;;  %v1295_v54 = vpop.permute.xlu0 %1294  ;;  %v1265_v11 = vpop.permute.xlu1 %1264  ;;  %1617 = vmatprep.subr.bf16.mxu0 %v3602_v55  ;;  %v3623_v59 = vld [vmem:[#allocation8 + $0x14] ss:$8 sps:$4 sm:$0xff]   ;;  %v3632_v34 = vld [vmem:[#allocation8 + $0xe4] ss:$8 sps:$4 sm:$0xff]  }
 0x335   : > { %v1314_v40 = vmul.f32 %v1295_v54, %v4457_v3  ;;  %v1315_v43 = vmul.f32 %v1295_v54, %v4441_v63  ;;  %v3626_v54 = vld [vmem:[#allocation8 + $0x4] ss:$8 sps:$4 sm:$0xff]   ;;  %v5302_v55 = vld [vmem:[#allocation29_spill] sm:$0xff] }
 0x337   : > { %1340 = vmatprep.subr.mxu1 %v1315_v43  ;;  %v1667_v43 = vld [vmem:[%s5227_s4 + $0x38] sm:$0xff] }
 0x338   : > { %1341 = vmatpush1.msra.mxu1 %v1314_v40  ;;  %v1280_v7 = vpop.permute.xlu0 %1279  ;;  %v3624_v40 = vld [vmem:[#allocation8] ss:$8 sps:$4 sm:$0xff]  }
 0x339   : > { %1342 = vmatprep.subr.mxu1 %v1313_v44  ;;  %v1309_v3 = vmul.f32 %v1280_v7, %v4400_v52  ;;  %v1308_v63 = vmul.f32 %v1280_v7, %v4416_v56  ;;  %v1303_v52 = vmul.f32 %v3788_v35, %v1265_v11  ;;  %v1302_v56 = vmul.f32 %v1265_v11, %v4391_v49  ;;  %v3629_v44 = vld [vmem:[#allocation8 + $0xf4] ss:$8 sps:$4 sm:$0xff]   ;;  %v3630_v7 = vld [vmem:[#allocation8 + $0xe0] ss:$8 sps:$4 sm:$0xff]  }
 0x33a   : > { %1343 = vmatpush1.msra.mxu1 %v1312_v27  ;;  %v3627_v27 = vld [vmem:[#allocation8 + $0xf0] ss:$8 sps:$4 sm:$0xff]   ;;  %v3647_v11 = vld [vmem:[#allocation8 + $0x94] ss:$8 sps:$4 sm:$0xff]  }
 0x33b   : > { %1344 = vmatprep.subr.mxu1 %v1311_v4  ;;  %v3635_v4 = vld [vmem:[#allocation8 + $0xd4] ss:$8 sps:$4 sm:$0xff]  }
 0x33c   : > { %1345 = vmatpush1.msra.mxu1 %v1310_v0  ;;  %v1270_v58 = vpop.permute.xlu0 %1269  ;;  %v3633_v0 = vld [vmem:[#allocation8 + $0xd0] ss:$8 sps:$4 sm:$0xff]  }
 0x33d   : > { %1346 = vmatprep.subr.mxu1 %v1309_v3  ;;  %v1305_v47 = vmul.f32 %v3787_v57, %v1270_v58  ;;  %v1304_v61 = vmul.f32 %v1270_v58, %v4394_v50  ;;  %v3600_v50 = vld [vmem:[#allocation9 + $0x80] ss:$8 sps:$4 sm:$0xff]   ;;  %v3638_v3 = vld [vmem:[#allocation8 + $0xc4] ss:$8 sps:$4 sm:$0xff]   ;;  %v3641_v58 = vld [vmem:[#allocation8 + $0xb4] ss:$8 sps:$4 sm:$0xff]  }
 0x33e   : > { %1347 = vmatpush1.msra.mxu1 %v1308_v63  ;;  %1618 = vmatpush2.bf16.msra.mxu0 %v3600_v50  ;;  %v3636_v63 = vld [vmem:[#allocation8 + $0xc0] ss:$8 sps:$4 sm:$0xff]   ;;  %v3645_v57 = vld [vmem:[#allocation8 + $0x90] ss:$8 sps:$4 sm:$0xff]  }
 0x33f   : > { %1348 = vmatprep.subr.mxu1 %v1307_v62  ;;  %v3639_v62 = vld [vmem:[#allocation8 + $0xb0] ss:$8 sps:$4 sm:$0xff]  }
 0x340   : > { %1349 = vmatpush1.msra.mxu1 %v1306_v26  ;;  %v3644_v26 = vld [vmem:[#allocation8 + $0xa4] ss:$8 sps:$4 sm:$0xff]   ;;  %v5298_v35 = vld [vmem:[#allocation25_spill] sm:$0xff]  ;;  %v5303_v50 = vld [vmem:[#allocation30_spill] sm:$0xff] }
 0x341   : > { %1350 = vmatprep.subr.mxu1 %v1305_v47  ;;  %v3650_v47 = vld [vmem:[#allocation8 + $0x84] ss:$8 sps:$4 sm:$0xff]  }
 0x342   : > { %1351 = vmatpush1.msra.mxu1 %v1304_v61  ;;  %v3648_v61 = vld [vmem:[#allocation8 + $0x80] ss:$8 sps:$4 sm:$0xff]  }
 0x343   : > { %1352 = vmatprep.subr.mxu1 %v1303_v52  ;;  %v5299_v52 = vld [vmem:[#allocation26_spill] sm:$0xff] }
 0x344   : > { %1353 = vmatpush1.msra.mxu1 %v1302_v56  ;;  %v5300_v56 = vld [vmem:[#allocation27_spill] sm:$0xff] }
 0x345   : > { %3200 = vmatmul.mubr.msk.f32.vlgmr.msra.gmra.mxu1 %vm1318_vm1, %v1261_v51  ;;  %v5301_v51 = vld [vmem:[#allocation28_spill] sm:$0xff] }
 0x346   : > { %1757 = vmatprep.mubr.f32.mxu1 %v4080_v46 }
 0x405   : > { %v4631_v45 = vpop.f32.mrf.mxu1 }
 0x406   : > { %v1393_v33 = vpack.c.bf16 %v4631_v45, %v4631_v45 }
 0x407   : > { %v4633_v6 = vpop.f32.mrf.mxu1 }
 0x408   : > { %v1394_v49 = vpack.c.bf16 %v4633_v6, %v4633_v6 }
 0x40a   : > { %1619 = vmatprep.mubr.bf16.mxu0 %v1394_v49  ;;  %v2170_v49 = vld [vmem:[%s5233_s10 + $0xf8] sm:$0xff] }
 0x40b   : > { %1620 = vmatmul.mubr.bf16.vlgmr.msra.gmra.mxu0 %v1393_v33  ;;  %3340 = vmatprep.subr.mxu0 %v2170_v49  ;;  %v2169_v33 = vld [vmem:[%s5233_s10 + $0xf0] sm:$0xff] }
 0x4cb   : > { %v1621_v9 = vpop.f32.mrf.mxu0 }
 0x4cd   : > { %v1623_v13 = vpop.f32.mrf.mxu0 }
 0x4ce   : > { %1723 = vmatprep.subr.mxu1 %v1623_v13  ;;  %v2166_v13 = vld [vmem:[%s5233_s10 + $0xd8] sm:$0xff] }
 0x4cf   : > { %v1625_v25 = vpop.f32.mrf.mxu0  ;;  %1724 = vmatpush1.msra.mxu1 %v1621_v9  ;;  %v2152_v9 = vld [vmem:[%s5233_s10 + $0x68] sm:$0xff] }
 0x4d0   : > { %3233 = vmatmul.mubr.msk.f32.vlgmr.msra.gmra.mxu1 %vm1668_vm2, %v1660_v22  ;;  %1966 = vmatprep.subr.bf16.mxu1 %v3605_v17  ;;  %v2151_v17 = vld [vmem:[%s5233_s10 + $0x60] sm:$0xff]  ;;  %v2150_v22 = vld [vmem:[%s5233_s10 + $0x58] sm:$0xff]  ;;  %v2164_v25 = vld [vmem:[%s5233_s10 + $0xc8] sm:$0xff] }
 0x4d1   : > { %v1626_v12 = vpop.f32.mrf.mxu0  ;;  %1967 = vmatpush1.bf16.msra.mxu1 %v3603_v19  ;;  %1763 = vmatprep.mubr.f32.mxu1 %v4080_v46  ;;  %v2165_v19 = vld [vmem:[%s5233_s10 + $0xd0] sm:$0xff] }
 0x4d2   : > { %1968 = vmatprep.subr.bf16.mxu1 %v3608_v24  ;;  %v2149_v24 = vld [vmem:[%s5233_s10 + $0x50] sm:$0xff]  ;;  %v2148_v12 = vld [vmem:[%s5233_s10 + $0x48] sm:$0xff] }
 0x4d4   : > { %3234 = vmatmul.mubr.msk.f32.gmra.mxu1 %vm1668_vm2, %v1661_v21  ;;  %v2147_v21 = vld [vmem:[%s5233_s10 + $0x40] sm:$0xff] }
 0x4d5   : > { %1969 = vmatpush1.bf16.msra.mxu1 %v3606_v8  ;;  %1769 = vmatprep.mubr.f32.mxu1 %v4080_v46  ;;  %v2163_v8 = vld [vmem:[%s5233_s10 + $0xc0] sm:$0xff] }
 0x4d6   : > { %1970 = vmatprep.subr.bf16.mxu1 %v3611_v14  ;;  %v2162_v14 = vld [vmem:[%s5233_s10 + $0xb8] sm:$0xff] }
 0x4d8   : > { %3235 = vmatmul.mubr.msk.f32.gmra.mxu1 %vm1668_vm2, %v1662_v37  ;;  %v2161_v37 = vld [vmem:[%s5233_s10 + $0xb0] sm:$0xff] }
 0x4d9   : > { %1971 = vmatpush1.bf16.msra.mxu1 %v3609_v23  ;;  %1775 = vmatprep.mubr.f32.mxu1 %v4080_v46  ;;  %v2146_v23 = vld [vmem:[%s5233_s10 + $0x38] sm:$0xff] }
 0x4da   : > { %1972 = vmatprep.subr.bf16.mxu1 %v3614_v16  ;;  %v2145_v16 = vld [vmem:[%s5233_s10 + $0x30] sm:$0xff] }
 0x4dc   : > { %3236 = vmatmul.mubr.msk.f32.gmra.mxu1 %vm1668_vm2, %v1663_v31  ;;  %v2144_v31 = vld [vmem:[%s5233_s10 + $0x28] sm:$0xff] }
 0x4dd   : > { %1973 = vmatpush1.bf16.msra.mxu1 %v3612_v29  ;;  %1781 = vmatprep.mubr.f32.mxu1 %v4080_v46  ;;  %v2160_v29 = vld [vmem:[%s5233_s10 + $0xa8] sm:$0xff] }
 0x4de   : > { %1974 = vmatprep.subr.bf16.mxu1 %v3617_v1  ;;  %v2159_v1 = vld [vmem:[%s5233_s10 + $0xa0] sm:$0xff] }
 0x4e0   : > { %3237 = vmatmul.mubr.msk.f32.gmra.mxu1 %vm1668_vm2, %v1664_v5  ;;  %v2158_v5 = vld [vmem:[%s5233_s10 + $0x98] sm:$0xff] }
 0x4e1   : > { %1975 = vmatpush1.bf16.msra.mxu1 %v3615_v2  ;;  %1787 = vmatprep.mubr.f32.mxu1 %v4080_v46  ;;  %v2143_v2 = vld [vmem:[%s5233_s10 + $0x20] sm:$0xff] }
 0x4e2   : > { %1976 = vmatprep.subr.bf16.mxu1 %v3620_v28  ;;  %v2142_v28 = vld [vmem:[%s5233_s10 + $0x18] sm:$0xff] }
 0x4e4   : > { %3238 = vmatmul.mubr.msk.f32.gmra.mxu1 %vm1668_vm2, %v1665_v10  ;;  %v2141_v10 = vld [vmem:[%s5233_s10 + $0x10] sm:$0xff] }
 0x4e5   : > { %1977 = vmatpush1.bf16.msra.mxu1 %v3618_v60  ;;  %1793 = vmatprep.mubr.f32.mxu1 %v4080_v46  ;;  %v2157_v60 = vld [vmem:[%s5233_s10 + $0x90] sm:$0xff] }
 0x4e6   : > { %1978 = vmatprep.subr.bf16.mxu1 %v3623_v59  ;;  %v2156_v59 = vld [vmem:[%s5233_s10 + $0x88] sm:$0xff] }
 0x4e8   : > { %3239 = vmatmul.mubr.msk.f32.gmra.mxu1 %vm1668_vm2, %v1666_v42  ;;  %v2155_v42 = vld [vmem:[%s5233_s10 + $0x80] sm:$0xff] }
 0x4e9   : > { %1979 = vmatpush1.bf16.msra.mxu1 %v3621_v36  ;;  %1799 = vmatprep.mubr.f32.mxu1 %v4080_v46  ;;  %v2140_v36 = vld [vmem:[%s5233_s10 + $0x8] sm:$0xff] }
 0x4ea   : > { %1980 = vmatprep.subr.bf16.mxu1 %v3626_v54  ;;  %v2139_v54 = vld [vmem:[%s5233_s10] sm:$0xff] }
 0x4ec   : > { %3240 = vmatmul.mubr.msk.f32.gmra.mxu1 %vm1668_vm2, %v1667_v43  ;;  %v3790_v43 = vld [vmem:[%s4527_s28 + $0x8] sm:$0xff] }
 0x4ed   : > { %1981 = vmatpush1.bf16.msra.mxu1 %v3624_v40  ;;  %1998 = vmatprep.mubr.bf16.mxu1 %v4345_v15  ;;  %v3642_v15 = vld [vmem:[#allocation8 + $0xa0] ss:$8 sps:$4 sm:$0xff]  }
 0x4ee   : > { %1982 = vmatprep.subr.bf16.mxu1 %v3629_v44  ;;  %v3789_v40 = vld [vmem:[%s4527_s28] sm:$0xff]  ;;  %2173 = vrot.lane.b32.xlu1 %v3790_v43, %s4082_s7  ;;  %s657_s28 = scalar_lea.vmem %s5225_s2, %s3167_s0 }
 0x4ef   : > { %2171 = vrot.lane.b32.xlu0 %v3789_v40, %s4082_s7  ;;  %s5147_s7 = scalar_lea.sflag [#allocation14], %s2907_s8 }
 0x4f1   : > { %1983 = vmatpush2.bf16.msra.mxu1 %v3627_v27 }
 0x4f2   : > { %1984 = vmatprep.subr.bf16.mxu1 %v3632_v34 }
 0x4f5   : > { %1985 = vmatpush2.bf16.msra.mxu1 %v3630_v7 }
 0x4f6   : > { %1986 = vmatprep.subr.bf16.mxu1 %v3635_v4 }
 0x4f9   : > { %1987 = vmatpush2.bf16.msra.mxu1 %v3633_v0 }
 0x4fa   : > { %1988 = vmatprep.subr.bf16.mxu1 %v3638_v3 }
 0x4fd   : > { %1989 = vmatpush2.bf16.msra.mxu1 %v3636_v63 }
 0x4fe   : > { %1990 = vmatprep.subr.bf16.mxu1 %v3641_v58  ;;  %v2082_v58 = vshrl.u32 %v2081_v38, 7 }
 0x501   : > { %1991 = vmatpush2.bf16.msra.mxu1 %v3639_v62 }
 0x502   : > { %1992 = vmatprep.subr.bf16.mxu1 %v3644_v26  ;;  %v2083_v26 = vsub.s32 0, %v2082_v58 }
 0x505   : > { %1993 = vmatpush2.bf16.msra.mxu1 %v3642_v15  ;;  %v2039_v15 = vld [vmem:[%s5232_s9] sm:$0x3] }
 0x506   : > { %1994 = vmatprep.subr.bf16.mxu1 %v3647_v11  ;;  %v2087_v11 = vsub.s32 1, %v2082_v58 }
 0x509   : > { %1995 = vmatpush2.bf16.msra.mxu1 %v3645_v57 }
 0x50a   : > { %1996 = vmatprep.subr.bf16.mxu1 %v3650_v47  ;;  %v4817_v47 = vrot.slane %v2039_v15, %v2083_v26 }
 0x50d   : > { %1997 = vmatpush2.bf16.msra.mxu1 %v3648_v61  ;;  %v4819_v61 = vrot.slane %v2039_v15, %v2087_v11 }
 0x510   : > { %1999 = vmatmul.mubr.bf16.vlgmr.msra.gmra.mxu1 %v4404_v53  ;;  %v2154_v53 = vld [vmem:[%s5233_s10 + $0x78] sm:$0xff] }
 0x511   : > { %2008 = vmatprep.mubr.bf16.mxu1 %v5298_v35  ;;  %3341 = vmatpush3.msra.mxu0 %v2154_v53  ;;  %v2048_v53 = vpop.permute.xlu1 %2047 }
 0x512   : > { %3342 = vmatprep.subr.mxu0 %v2169_v33 }
 0x513   : > { %3343 = vmatpush3.msra.mxu0 %v2153_v41  ;;  %v2093_v41 = vmul.f32 %v4817_v47, %v2048_v53 }
 0x514   : > { %3344 = vmatprep.subr.mxu0 %v2168_v32 }
 0x515   : > { %3345 = vmatpush3.msra.mxu0 %v2152_v9 }
 0x518   : > { %2009 = vmatmul.mubr.bf16.gmra.mxu1 %v5299_v52  ;;  %v2043_v52 = vpop.permute.xlu0 %2042 }
 0x519   : > { %2018 = vmatprep.mubr.bf16.mxu1 %v5300_v56  ;;  %v2091_v56 = vmul.f32 %v4817_v47, %v2043_v52 }
 0x520   : > { %2019 = vmatmul.mubr.bf16.gmra.mxu1 %v5301_v51 }
 0x521   : > { %2028 = vmatprep.mubr.bf16.mxu1 %v5302_v55  ;;  %v2092_v55 = vmul.f32 %v4819_v61, %v2043_v52 }
 0x528   : > { %2029 = vmatmul.mubr.bf16.gmra.mxu1 %v5303_v50 }
 0x529   : > { %2572 = vmatprep.mubr.f32.mxu1 %v4080_v46  ;;  %v2167_v46 = vld [vmem:[%s5233_s10 + $0xe0] sm:$0xff] }
 0x52a   : > { %3346 = vmatprep.subr.mxu0 %v2167_v46  ;;  %v2094_v46 = vmul.f32 %v4819_v61, %v2048_v53 }
 0x52b   : > { %3347 = vmatpush3.msra.mxu0 %v2151_v17 }
 0x52c   : > { %3348 = vmatprep.subr.mxu0 %v2166_v13 }
 0x52d   : > { %3349 = vmatpush3.msra.mxu0 %v2150_v22 }
 0x52e   : > { %3350 = vmatprep.subr.mxu0 %v2165_v19 }
 0x52f   : > { %3351 = vmatpush3.msra.mxu0 %v2149_v24 }
 0x530   : > { %3352 = vmatprep.subr.mxu0 %v2164_v25 }
 0x531   : > { %3353 = vmatpush3.msra.mxu0 %v2148_v12  ;;  %v2053_v12 = vpop.permute.xlu1 %2052 }
 0x532   : > { %3354 = vmatprep.subr.mxu0 %v2163_v8 }
 0x533   : > { %3355 = vmatpush3.msra.mxu0 %v2147_v21 }
 0x534   : > { %3356 = vmatprep.subr.mxu0 %v2162_v14  ;;  %v2095_v14 = vmul.f32 %v4817_v47, %v2053_v12 }
 0x535   : > { %3357 = vmatpush3.msra.mxu0 %v2146_v23 }
 0x536   : > { %3358 = vmatprep.subr.mxu0 %v2161_v37  ;;  %v2096_v37 = vmul.f32 %v4819_v61, %v2053_v12 }
 0x537   : > { %3359 = vmatpush3.msra.mxu0 %v2145_v16 }
 0x538   : > { %3360 = vmatprep.subr.mxu0 %v2160_v29 }
 0x539   : > { %3361 = vmatpush3.msra.mxu0 %v2144_v31 }
 0x53a   : > { %3362 = vmatprep.subr.mxu0 %v2159_v1  ;;  %v2058_v1 = vpop.permute.xlu0 %2057 }
 0x53b   : > { %3363 = vmatpush3.msra.mxu0 %v2143_v2 }
 0x53c   : > { %3364 = vmatprep.subr.mxu0 %v2158_v5 }
 0x53d   : > { %3365 = vmatpush3.msra.mxu0 %v2142_v28  ;;  %v2097_v28 = vmul.f32 %v4817_v47, %v2058_v1 }
 0x53e   : > { %3366 = vmatprep.subr.mxu0 %v2157_v60 }
 0x53f   : > { %3367 = vmatpush3.msra.mxu0 %v2141_v10  ;;  %v2098_v10 = vmul.f32 %v4819_v61, %v2058_v1 }
 0x540   : > { %3368 = vmatprep.subr.mxu0 %v2156_v59 }
 0x541   : > { %3369 = vmatpush3.msra.mxu0 %v2140_v36 }
 0x542   : > { %3370 = vmatprep.subr.mxu0 %v2155_v42 }
 0x543   : > { %3371 = vmatpush3.msra.mxu0 %v2139_v54  ;;  %v2063_v54 = vpop.permute.xlu1 %2062 }
 0x590   : > { %v1759_v44 = vpop.f32.mrf.mxu1 }
 0x592   : > { %v1761_v27 = vpop.f32.mrf.mxu1 }
 0x594   : > { %v1765_v34 = vpop.f32.mrf.mxu1 }
 0x596   : > { %v1767_v7 = vpop.f32.mrf.mxu1 }
 0x598   : > { %v1771_v4 = vpop.f32.mrf.mxu1 }
 0x59a   : > { %v1773_v39 = vpop.f32.mrf.mxu1 }
 0x59c   : > { %v1777_v0 = vpop.f32.mrf.mxu1 }
 0x59e   : > { %v1779_v18 = vpop.f32.mrf.mxu1 }
 0x5a0   : > { %v1783_v3 = vpop.f32.mrf.mxu1 }
 0x5a2   : > { %v4801_v48 = vpop.f32.mrf.mxu1 }
 0x5a4   : > { %v4803_v20 = vpop.f32.mrf.mxu1 }
 0x5a6   : > { %v4805_v30 = vpop.f32.mrf.mxu1 }
 0x5a8   : > { %v4807_v63 = vpop.f32.mrf.mxu1 }
 0x5aa   : > { %v4810_v62 = vpop.f32.mrf.mxu1 }
 0x5ac   : > { %v4815_v57 = vpop.f32.mrf.mxu1 }
 0x5ae   : > { %v4821_v35 = vpop.f32.mrf.mxu1 }
 0x5d0   : > { %v2000_v51 = vpop.f32.mrf.mxu1 }
 0x5d1   : > { %v2001_v50 = vadd.f32 %v2000_v51, %v1759_v44  ;;  %v2099_v44 = vmul.f32 %v4817_v47, %v2063_v54 }
 0x5d2   : > { %v2002_v49 = vpop.f32.mrf.mxu1 }
 0x5d3   : > { %v2003_v33 = vadd.f32 %v2002_v49, %v1761_v27  ;;  %v2107_v32 = vadd.f32 %v2091_v56, %v2001_v50  ;;  %v2073_v56 = vpop.permute.xlu1 %2072 }
 0x5d4   : > { %v2004_v9 = vpop.f32.mrf.mxu1 }
 0x5d5   : > { %v2108_v17 = vadd.f32 %v2092_v55, %v2003_v33  ;;  %v2005_v13 = vadd.f32 %v2004_v9, %v1765_v34  ;;  %v2100_v34 = vmul.f32 %v4819_v61, %v2063_v54  ;;  %v2104_v9 = vmul.f32 %v4819_v61, %v2073_v56 }
 0x5d6   : > { %v2006_v22 = vpop.f32.mrf.mxu1 }
 0x5d7   : > { %3715 = vtanh.f32 %v2108_v17  ;;  %v2007_v19 = vadd.f32 %v2006_v22, %v1767_v7  ;;  %v2109_v24 = vadd.f32 %v2093_v41, %v2005_v13 }
 0x5d8   : > { %3717 = vtanh.f32 %v2107_v32  ;;  %v2010_v25 = vpop.f32.mrf.mxu1 }
 0x5d9   : > { %v2110_v8 = vadd.f32 %v2094_v46, %v2007_v19  ;;  %v2011_v21 = vadd.f32 %v2010_v25, %v1771_v4 }
 0x5da   : > { %v2012_v23 = vpop.f32.mrf.mxu1 }
 0x5db   : > { %3719 = vtanh.f32 %v2110_v8  ;;  %v2013_v16 = vadd.f32 %v2012_v23, %v1773_v39  ;;  %v2111_v29 = vadd.f32 %v2095_v14, %v2011_v21 }
 0x5dc   : > { %3721 = vtanh.f32 %v2109_v24  ;;  %v2014_v31 = vpop.f32.mrf.mxu1 }
 0x5dd   : > { %v2112_v2 = vadd.f32 %v2096_v37, %v2013_v16  ;;  %v2015_v5 = vadd.f32 %v2014_v31, %v1777_v0 }
 0x5de   : > { %v2016_v60 = vpop.f32.mrf.mxu1 }
 0x5df   : > { %3723 = vtanh.f32 %v2112_v2  ;;  %v2017_v59 = vadd.f32 %v2016_v60, %v1779_v18  ;;  %v2113_v36 = vadd.f32 %v2097_v28, %v2015_v5  ;;  %v2068_v18 = vpop.permute.xlu0 %2067  ;;  %v4848_v2 = vpop.permute.xlu1 %2185 }
 0x5e0   : > { %3725 = vtanh.f32 %v2111_v29  ;;  %v2020_v42 = vpop.f32.mrf.mxu1  ;;  %v2102_v52 = vmul.f32 %v4819_v61, %v2068_v18 }
 0x5e1   : > { %v2114_v40 = vadd.f32 %v2098_v10, %v2017_v59  ;;  %v2021_v43 = vadd.f32 %v2020_v42, %v1783_v3  ;;  %v2101_v3 = vmul.f32 %v4817_v47, %v2068_v18 }
 0x5e2   : > { %v2022_v27 = vpop.f32.mrf.mxu1 }
 0x5e3   : > { %3727 = vtanh.f32 %v2114_v40  ;;  %v2023_v7 = vadd.f32 %v2022_v27, %v4801_v48  ;;  %v2115_v39 = vadd.f32 %v2099_v44, %v2021_v43  ;;  %v2078_v32 = vpop.permute.xlu0 %2077  ;;  %v2182_v28 = vpop.permute.xlu1 %2181 }
 0x5e4   : > { %v3716_v4 = vpop.eup %3715  ;;  %3729 = vtanh.f32 %v2113_v36  ;;  %v2024_v0 = vpop.f32.mrf.mxu1  ;;  %v2106_v12 = vmul.f32 %v4819_v61, %v2078_v32 }
 0x5e5   : > { %v3718_v58 = vpop.eup %3717  ;;  %v2116_v26 = vadd.f32 %v2100_v34, %v2023_v7  ;;  %v2025_v15 = vadd.f32 %v2024_v0, %v4803_v20  ;;  %2259 = vmatprep.mubr.f32.mxu0 %v3716_v4  ;;  %v2103_v20 = vmul.f32 %v4817_v47, %v2073_v56 }
 0x5e6   : > { %v2026_v11 = vpop.f32.mrf.mxu1  ;;  %2260 = vmatmul.mubr.f32.vlgmr.msra.gmra.mxu0 %v3718_v58 }
 0x5e7   : > { %3731 = vtanh.f32 %v2116_v26  ;;  %v2027_v48 = vadd.f32 %v2026_v11, %v4805_v30  ;;  %v2117_v55 = vadd.f32 %v2101_v3, %v2025_v15  ;;  %v4846_v1 = vpop.permute.xlu0 %2183  ;;  %v2178_v59 = vpop.permute.xlu1 %2177 }
 0x5e8   : > { %v3720_v51 = vpop.eup %3719  ;;  %3733 = vtanh.f32 %v2115_v39  ;;  %v2030_v50 = vpop.f32.mrf.mxu1 }
 0x5e9   : > { %v3722_v49 = vpop.eup %3721  ;;  %v2118_v53 = vadd.f32 %v2102_v52, %v2027_v48  ;;  %v2031_v33 = vadd.f32 %v2030_v50, %v4807_v63  ;;  %2264 = vmatprep.mubr.f32.mxu0 %v3720_v51  ;;  %v2105_v63 = vmul.f32 %v4817_v47, %v2078_v32 }
 0x5ea   : > { %v2032_v41 = vpop.f32.mrf.mxu1  ;;  %2265 = vmatmul.mubr.f32.gmra.mxu0 %v3722_v49 }
 0x5eb   : > { %3735 = vtanh.f32 %v2118_v53  ;;  %v2033_v46 = vadd.f32 %v2032_v41, %v4810_v62  ;;  %v2119_v17 = vadd.f32 %v2103_v20, %v2031_v33  ;;  %v2180_v5 = vpop.permute.xlu0 %2179  ;;  %v2174_v44 = vpop.permute.xlu1 %2173 }
 0x5ec   : > { %v3724_v30 = vpop.eup %3723  ;;  %3737 = vtanh.f32 %v2117_v55  ;;  %v2034_v13 = vpop.f32.mrf.mxu1 }
 0x5ed   : > { %v3726_v22 = vpop.eup %3725  ;;  %v2120_v19 = vadd.f32 %v2104_v9, %v2033_v46  ;;  %v2035_v24 = vadd.f32 %v2034_v13, %v4815_v57  ;;  %2269 = vmatprep.mubr.f32.mxu0 %v3724_v30 }
 0x5ee   : > { %v2036_v25 = vpop.f32.mrf.mxu1  ;;  %2270 = vmatmul.mubr.f32.gmra.mxu0 %v3726_v22 }
 0x5ef   : > { %3739 = vtanh.f32 %v2120_v19  ;;  %v2037_v8 = vadd.f32 %v2036_v25, %v4821_v35  ;;  %v2121_v62 = vadd.f32 %v2105_v63, %v2035_v24  ;;  %v2176_v60 = vpop.permute.xlu0 %2175 }
 0x5f0   : > { %v3728_v21 = vpop.eup %3727  ;;  %3741 = vtanh.f32 %v2119_v17 }
 0x5f1   : > { %v3730_v14 = vpop.eup %3729  ;;  %v2122_v23 = vadd.f32 %v2106_v12, %v2037_v8  ;;  %2274 = vmatprep.mubr.f32.mxu0 %v3728_v21 }
 0x5f2   : > { %2275 = vmatmul.mubr.f32.gmra.mxu0 %v3730_v14 }
 0x5f3   : > { %3743 = vtanh.f32 %v2122_v23  ;;  %v2172_v40 = vpop.permute.xlu0 %2171 }
 0x5f4   : > { %v3732_v37 = vpop.eup %3731  ;;  %3745 = vtanh.f32 %v2121_v62 }
 0x5f5   : > { %v3734_v57 = vpop.eup %3733  ;;  %2279 = vmatprep.mubr.f32.mxu0 %v3732_v37 }
 0x5f6   : > { %2280 = vmatmul.mubr.f32.gmra.mxu0 %v3734_v57 }
 0x5f8   : > { %v3736_v47 = vpop.eup %3735 }
 0x5f9   : > { %v3738_v16 = vpop.eup %3737  ;;  %2284 = vmatprep.mubr.f32.mxu0 %v3736_v47 }
 0x5fa   : > { %2285 = vmatmul.mubr.f32.gmra.mxu0 %v3738_v16 }
 0x5fc   : > { %v3740_v61 = vpop.eup %3739 }
 0x5fd   : > { %v3742_v29 = vpop.eup %3741  ;;  %2289 = vmatprep.mubr.f32.mxu0 %v3740_v61 }
 0x5fe   : > { %2290 = vmatmul.mubr.f32.gmra.mxu0 %v3742_v29 }
 0x600   : > { %v3744_v35 = vpop.eup %3743 }
 0x601   : > { %v3746_v31 = vpop.eup %3745  ;;  %2294 = vmatprep.mubr.f32.mxu0 %v3744_v35 }
 0x602   : > { %2295 = vmatmul.mubr.f32.gmra.mxu0 %v3746_v31 }
 0x6a6   : > { %v3372_v10 = vpop.f32.mrf.mxu0 }
 0x6a8   : > { %v3373_v36 = vpop.f32.mrf.mxu0 }
 0x6a9   : > { %v3374_v54 = vadd.f32 %v3373_v36, %v3372_v10 }
 0x6aa   : > { %v3375_v42 = vpop.f32.mrf.mxu0 }
 0x6ab   : > { %v4850_v7 = vadd.f32 %v3374_v54, %v2172_v40 }
 0x6ac   : > { %v3376_v43 = vpop.f32.mrf.mxu0 }
 0x6ad   : > { %v3377_v27 = vadd.f32 %v3376_v43, %v3375_v42  ;;  %v2300_v15 = vsel %vm1108_vm0, %v4850_v7, -inf }
 0x6ae   : > { %v3378_v34 = vpop.f32.mrf.mxu0  ;;  %v2301_v51 = vrot.slane %v2300_v15, 4 }
 0x6af   : > { %v2267_v4 = vadd.f32 %v3377_v27, %v2174_v44 }
 0x6b0   : > { %v3379_v39 = vpop.f32.mrf.mxu0  ;;  %v2302_v46 = vmax.f32 %v2300_v15, %v2301_v51 }
 0x6b1   : > { %v2307_v0 = vsel %vm1108_vm0, %v2267_v4, -inf  ;;  %v3380_v58 = vadd.f32 %v3379_v39, %v3378_v34 }
 0x6b2   : > { %v2308_v18 = vrot.slane %v2307_v0, 4  ;;  %v3381_v26 = vpop.f32.mrf.mxu0  ;;  %v2303_v8 = vrot.slane %v2302_v46, 2 }
 0x6b3   : > { %v4855_v3 = vadd.f32 %v3380_v58, %v2176_v60 }
 0x6b4   : > { %v2309_v11 = vmax.f32 %v2307_v0, %v2308_v18  ;;  %v3382_v52 = vpop.f32.mrf.mxu0  ;;  %v2304_v31 = vmax.f32 %v2302_v46, %v2303_v8 }
 0x6b5   : > { %v2314_v56 = vsel %vm1108_vm0, %v4855_v3, -inf  ;;  %v3383_v48 = vadd.f32 %v3382_v52, %v3381_v26 }
 0x6b6   : > { %v2310_v55 = vrot.slane %v2309_v11, 2  ;;  %v2315_v50 = vrot.slane %v2314_v56, 4  ;;  %v3384_v49 = vpop.f32.mrf.mxu0  ;;  %v2305_v39 = vrot.slane %v2304_v31, 1 }
 0x6b7   : > { %v2277_v53 = vadd.f32 %v3383_v48, %v2178_v59 }
 0x6b8   : > { %v2311_v33 = vmax.f32 %v2309_v11, %v2310_v55  ;;  %v2316_v20 = vmax.f32 %v2314_v56, %v2315_v50  ;;  %v3385_v41 = vpop.f32.mrf.mxu0 }
 0x6b9   : > { %v2321_v32 = vsel %vm1108_vm0, %v2277_v53, -inf  ;;  %v3386_v9 = vadd.f32 %v3385_v41, %v3384_v49 }
 0x6ba   : > { %v2322_v30 = vrot.slane %v2321_v32, 4  ;;  %v3387_v17 = vpop.f32.mrf.mxu0  ;;  %v2312_v13 = vrot.slane %v2311_v33, 1  ;;  %v2317_v22 = vrot.slane %v2316_v20, 2 }
 0x6bb   : > { %v2282_v19 = vadd.f32 %v3386_v9, %v2180_v5 }
 0x6bc   : > { %v2323_v24 = vmax.f32 %v2321_v32, %v2322_v30  ;;  %v3388_v63 = vpop.f32.mrf.mxu0  ;;  %v2313_v14 = vmax.f32 %v2311_v33, %v2312_v13  ;;  %v2318_v23 = vmax.f32 %v2316_v20, %v2317_v22  ;;  %v2306_v33 = vmax.f32 %v2304_v31, %v2305_v39 }
 0x6bd   : > { %v2328_v25 = vsel %vm1108_vm0, %v2282_v19, -inf  ;;  %v3389_v12 = vadd.f32 %v3388_v63, %v3387_v17 }
 0x6be   : > { %v2324_v21 = vrot.slane %v2323_v24, 2  ;;  %v3390_v62 = vpop.f32.mrf.mxu0  ;;  %v2329_v37 = vrot.slane %v2328_v25, 4  ;;  %v2357_v59 = vsub.f32 %v2267_v4, %v2313_v14  ;;  %v2319_v36 = vrot.slane %v2318_v23, 1 }
 0x6bf   : > { %v2287_v57 = vadd.f32 %v3389_v12, %v2182_v28  ;;  %v2356_v13 = vsub.f32 %v4850_v7, %v2306_v33 }
 0x6c0   : > { %v2325_v47 = vmax.f32 %v2323_v24, %v2324_v21  ;;  %v3391_v16 = vpop.f32.mrf.mxu0  ;;  %v2330_v61 = vmax.f32 %v2328_v25, %v2329_v37  ;;  %v2366_v26 = vmul.f32 1.442695, %v2357_v59  ;;  %v2320_v15 = vmax.f32 %v2318_v23, %v2319_v36 }
 0x6c1   : > { %v2335_v29 = vsel %vm1108_vm0, %v2287_v57, -inf  ;;  %v3392_v35 = vadd.f32 %v3391_v16, %v3390_v62  ;;  %v2364_v21 = vmul.f32 1.442695, %v2356_v13 }
 0x6c2   : > { %v2326_v5 = vrot.slane %v2325_v47, 1  ;;  %v2336_v60 = vrot.slane %v2335_v29, 4  ;;  %v3393_v10 = vpop.f32.mrf.mxu0  ;;  %v2331_v42 = vrot.slane %v2330_v61, 2 }
 0x6c3   : > { %v2292_v54 = vadd.f32 %v3392_v35, %v4846_v1 }
 0x6c4   : > { %v2327_v40 = vmax.f32 %v2325_v47, %v2326_v5  ;;  %v2337_v43 = vmax.f32 %v2335_v29, %v2336_v60  ;;  %v3394_v44 = vpop.f32.mrf.mxu0  ;;  %v2332_v27 = vmax.f32 %v2330_v61, %v2331_v42 }
 0x6c5   : > { %v2342_v28 = vsel %vm1108_vm0, %v2292_v54, -inf  ;;  %v3395_v34 = vadd.f32 %v3394_v44, %v3393_v10 }
 0x6c6   : > { %v2359_v0 = vsub.f32 %v2277_v53, %v2327_v40  ;;  %v2338_v58 = vrot.slane %v2337_v43, 2  ;;  %v2343_v18 = vrot.slane %v2342_v28, 4  ;;  %v2333_v11 = vrot.slane %v2332_v27, 1 }
 0x6c7   : > { %v2297_v4 = vadd.f32 %v3395_v34, %v4848_v2  ;;  %v2358_v53 = vsub.f32 %v4855_v3, %v2320_v15 }
 0x6c8   : > { %v2370_v52 = vmul.f32 1.442695, %v2359_v0  ;;  %v2339_v56 = vmax.f32 %v2337_v43, %v2338_v58  ;;  %v2344_v48 = vmax.f32 %v2342_v28, %v2343_v18  ;;  %v2334_v1 = vmax.f32 %v2332_v27, %v2333_v11 }
 0x6c9   : > { %v2349_v51 = vsel %vm1108_vm0, %v2297_v4, -inf  ;;  %v2368_v22 = vmul.f32 1.442695, %v2358_v53 }
 0x6ca   : > { %3747 = vpow2.f32 %v2370_v52  ;;  %v2340_v55 = vrot.slane %v2339_v56, 1  ;;  %v2345_v50 = vrot.slane %v2344_v48, 2  ;;  %v2350_v49 = vrot.slane %v2349_v51, 4 }
 0x6cb   : > { %3749 = vpow2.f32 %v2366_v26  ;;  %v2360_v20 = vsub.f32 %v2282_v19, %v2334_v1 }
 0x6cc   : > { %v2341_v41 = vmax.f32 %v2339_v56, %v2340_v55  ;;  %v2346_v32 = vmax.f32 %v2344_v48, %v2345_v50  ;;  %v2351_v9 = vmax.f32 %v2349_v51, %v2350_v49 }
 0x6cd   : > { %v2372_v46 = vmul.f32 1.442695, %v2360_v20 }
 0x6ce   : > { %v2361_v2 = vsub.f32 %v2287_v57, %v2341_v41  ;;  %v2347_v30 = vrot.slane %v2346_v32, 1  ;;  %v2352_v17 = vrot.slane %v2351_v9, 2 }
 0x6cf   : > { %3751 = vpow2.f32 %v2372_v46 }
 0x6d0   : > { %v2374_v24 = vmul.f32 1.442695, %v2361_v2  ;;  %v2348_v63 = vmax.f32 %v2346_v32, %v2347_v30  ;;  %v2353_v25 = vmax.f32 %v2351_v9, %v2352_v17 }
 0x6d2   : > { %3753 = vpow2.f32 %v2374_v24  ;;  %v2362_v12 = vsub.f32 %v2292_v54, %v2348_v63  ;;  %v2354_v8 = vrot.slane %v2353_v25, 1 }
 0x6d3   : > { %3755 = vpow2.f32 %v2368_v22 }
 0x6d4   : > { %v2376_v3 = vmul.f32 1.442695, %v2362_v12  ;;  %v2355_v19 = vmax.f32 %v2353_v25, %v2354_v8 }
 0x6d6   : > { %3757 = vpow2.f32 %v2376_v3  ;;  %v2363_v62 = vsub.f32 %v2297_v4, %v2355_v19 }
 0x6d7   : > { %v4868_v14 = vpop.eup %3747  ;;  %3759 = vpow2.f32 %v2364_v21 }
 0x6d8   : > { %v4870_v23 = vpop.eup %3749  ;;  %v2401_v7 = vsel %vm1108_vm0, %v4868_v14, 0.0  ;;  %v2378_v37 = vmul.f32 1.442695, %v2363_v62 }
 0x6d9   : > { %v2402_v57 = vrot.slane %v2401_v7, 4  ;;  %v2387_v47 = vsel %vm1108_vm0, %v4870_v23, 0.0 }
 0x6da   : > { %3761 = vpow2.f32 %v2378_v37  ;;  %v2388_v61 = vrot.slane %v2387_v47, 4 }
 0x6db   : > { %v2403_v29 = vadd.f32 %v2402_v57, %v2401_v7 }
 0x6dc   : > { %v4876_v16 = vpop.eup %3751  ;;  %v2389_v59 = vadd.f32 %v2388_v61, %v2387_v47 }
 0x6dd   : > { %v2408_v5 = vsel %vm1108_vm0, %v4876_v16, 0.0  ;;  %v2404_v36 = vrot.slane %v2403_v29, 2 }
 0x6de   : > { %v2409_v40 = vrot.slane %v2408_v5, 4  ;;  %v2390_v34 = vrot.slane %v2389_v59, 2 }
 0x6df   : > { %v4878_v35 = vpop.eup %3753  ;;  %v2405_v0 = vadd.f32 %v2404_v36, %v2403_v29 }
 0x6e0   : > { %v4880_v31 = vpop.eup %3755  ;;  %v2415_v60 = vsel %vm1108_vm0, %v4878_v35, 0.0  ;;  %v2410_v26 = vadd.f32 %v2409_v40, %v2408_v5  ;;  %v2391_v55 = vadd.f32 %v2390_v34, %v2389_v59 }
 0x6e1   : > { %v2416_v10 = vrot.slane %v2415_v60, 4  ;;  %v2394_v54 = vsel %vm1108_vm0, %v4880_v31, 0.0  ;;  %v2406_v51 = vrot.slane %v2405_v0, 1 }
 0x6e2   : > { %v2395_v39 = vrot.slane %v2394_v54, 4  ;;  %v2411_v53 = vrot.slane %v2410_v26, 2  ;;  %v2392_v46 = vrot.slane %v2391_v55, 1 }
 0x6e3   : > { %v3758_v42 = vpop.eup %3757  ;;  %v2417_v43 = vadd.f32 %v2416_v10, %v2415_v60  ;;  %v2407_v9 = vadd.f32 %v2406_v51, %v2405_v0  ;;  %v2674_v0 = vld [vmem:[#allocation11 + $0xf8] sm:$0xff] }
 0x6e4   : > { %v4888_v44 = vpop.eup %3759  ;;  %v2422_v27 = vsel %vm1108_vm0, %v3758_v42, 0.0  ;;  %v2396_v1 = vadd.f32 %v2395_v39, %v2394_v54  ;;  %v2412_v22 = vadd.f32 %v2411_v53, %v2410_v26  ;;  %v2393_v25 = vadd.f32 %v2392_v46, %v2391_v55  ;;  %2707 = vmatprep.subr.mxu0 %v2674_v0  ;;  %v2669_v26 = vld [vmem:[#allocation11 + $0xd0] sm:$0xff]  ;;  %v2658_v51 = vld [vmem:[#allocation11 + $0x78] sm:$0xff]  ;;  %v2648_v46 = vld [vmem:[#allocation11 + $0x28] sm:$0xff] }
 0x6e5   : > { %v2423_v28 = vrot.slane %v2422_v27, 4  ;;  %v2380_v18 = vsel %vm1108_vm0, %v4888_v44, 0.0  ;;  %v2418_v11 = vrot.slane %v2417_v43, 2  ;;  %v2657_v55 = vld [vmem:[#allocation11 + $0x70] sm:$0xff] }
 0x6e6   : > { %v2381_v48 = vrot.slane %v2380_v18, 4  ;;  %v2397_v2 = vrot.slane %v2396_v1, 2  ;;  %v2413_v3 = vrot.slane %v2412_v22, 1  ;;  %v2653_v53 = vld [vmem:[#allocation11 + $0x50] sm:$0xff] }
 0x6e7   : > { %v3762_v58 = vpop.eup %3761  ;;  %v2424_v15 = vadd.f32 %v2423_v28, %v2422_v27  ;;  %v2419_v33 = vadd.f32 %v2418_v11, %v2417_v43  ;;  %v2665_v11 = vld [vmem:[#allocation11 + $0xb0] sm:$0xff] }
 0x6e8   : > { %v2429_v4 = vsel %vm1108_vm0, %v3762_v58, 0.0  ;;  %v2382_v32 = vadd.f32 %v2381_v48, %v2380_v18  ;;  %v2398_v12 = vadd.f32 %v2397_v2, %v2396_v1  ;;  %v2414_v19 = vadd.f32 %v2413_v3, %v2412_v22  ;;  %v2672_v18 = vld [vmem:[#allocation11 + $0xe8] sm:$0xff]  ;;  %v2659_v1 = vld [vmem:[#allocation11 + $0x80] sm:$0xff] }
 0x6e9   : > { %v2430_v52 = vrot.slane %v2429_v4, 4  ;;  %v2425_v56 = vrot.slane %v2424_v15, 2  ;;  %v2420_v13 = vrot.slane %v2419_v33, 1  ;;  %v2660_v48 = vld [vmem:[#allocation11 + $0x88] sm:$0xff]  ;;  %v2647_v2 = vld [vmem:[#allocation11 + $0x20] sm:$0xff] }
 0x6ea   : > { %v2383_v63 = vrot.slane %v2382_v32, 2  ;;  %v2399_v62 = vrot.slane %v2398_v12, 1  ;;  %v2643_v22 = vld [vmem:[#allocation11] sm:$0xff]  ;;  %v2700_v3 = vld [vmem:[#allocation11 + $0x1c8] sm:$0xff] }
 0x6eb   : > { %v2431_v50 = vadd.f32 %v2430_v52, %v2429_v4  ;;  %v2426_v49 = vadd.f32 %v2425_v56, %v2424_v15  ;;  %v2421_v21 = vadd.f32 %v2420_v13, %v2419_v33  ;;  %v2667_v15 = vld [vmem:[#allocation11 + $0xc0] sm:$0xff]  ;;  %v2662_v52 = vld [vmem:[#allocation11 + $0x98] sm:$0xff]  ;;  %v2661_v56 = vld [vmem:[#allocation11 + $0x90] sm:$0xff] }
 0x6ec   : > { %v2384_v7 = vadd.f32 %v2383_v63, %v2382_v32  ;;  %v2400_v37 = vadd.f32 %v2399_v62, %v2398_v12  ;;  %v2663_v4 = vld [vmem:[#allocation11 + $0xa0] sm:$0xff]  ;;  %v2654_v33 = vld [vmem:[#allocation11 + $0x58] sm:$0xff]  ;;  %v2644_v13 = vld [vmem:[#allocation11 + $0x8] sm:$0xff] }
 0x6ed   : > { %v2427_v20 = vrot.slane %v2426_v49, 1  ;;  %v2432_v41 = vrot.slane %v2431_v50, 2  ;;  %v2650_v32 = vld [vmem:[#allocation11 + $0x38] sm:$0xff]  ;;  %v2705_v63 = vld [vmem:[#allocation11 + $0x1f0] sm:$0xff]  ;;  %v2703_v12 = vld [vmem:[#allocation11 + $0x1e0] sm:$0xff] }
 0x6ee   : > { %v2385_v57 = vrot.slane %v2384_v7, 1  ;;  %v2698_v62 = vld [vmem:[#allocation11 + $0x1b8] sm:$0xff] }
 0x6ef   : > { %v2428_v30 = vadd.f32 %v2427_v20, %v2426_v49  ;;  %v2433_v17 = vadd.f32 %v2432_v41, %v2431_v50  ;;  %v2656_v50 = vld [vmem:[#allocation11 + $0x68] sm:$0xff]  ;;  %v2655_v49 = vld [vmem:[#allocation11 + $0x60] sm:$0xff] }
 0x6f0   : > { %v2386_v29 = vadd.f32 %v2385_v57, %v2384_v7  ;;  %v2652_v20 = vld [vmem:[#allocation11 + $0x48] sm:$0xff]  ;;  %v2651_v41 = vld [vmem:[#allocation11 + $0x40] sm:$0xff]  ;;  %v2697_v7 = vld [vmem:[#allocation11 + $0x1b0] sm:$0xff] }
 0x6f1   : > { %3763 = vrcp.f32 %v2428_v30  ;;  %v2434_v24 = vrot.slane %v2433_v17, 1  ;;  %v2646_v30 = vld [vmem:[#allocation11 + $0x18] sm:$0xff]  ;;  %v2695_v57 = vld [vmem:[#allocation11 + $0x1a0] sm:$0xff] }
 0x6f2   : > { %3765 = vrcp.f32 %v2407_v9  ;;  %v2649_v9 = vld [vmem:[#allocation11 + $0x30] sm:$0xff] }
 0x6f3   : > { %v2435_v8 = vadd.f32 %v2434_v24, %v2433_v17  ;;  %v2645_v17 = vld [vmem:[#allocation11 + $0x10] sm:$0xff]  ;;  %v2706_v24 = vld [vmem:[#allocation11 + $0x1f8] sm:$0xff] }
 0x6f5   : > { %3767 = vrcp.f32 %v2435_v8  ;;  %v2702_v8 = vld [vmem:[#allocation11 + $0x1d8] sm:$0xff] }
 0x6f6   : > { %3769 = vrcp.f32 %v2393_v25  ;;  %v2704_v25 = vld [vmem:[#allocation11 + $0x1e8] sm:$0xff] }
 0x6f7   : > { %3771 = vrcp.f32 %v2421_v21  ;;  %v2701_v21 = vld [vmem:[#allocation11 + $0x1d0] sm:$0xff] }
 0x6f8   : > { %3773 = vrcp.f32 %v2414_v19  ;;  %v2699_v19 = vld [vmem:[#allocation11 + $0x1c0] sm:$0xff] }
 0x6f9   : > { %3775 = vrcp.f32 %v2400_v37  ;;  %v2696_v37 = vld [vmem:[#allocation11 + $0x1a8] sm:$0xff] }
 0x6fa   : > { %3777 = vrcp.f32 %v2386_v29 }
 0x6fe   : > { %v3764_v47 = vpop.eup %3763 }
 0x6ff   : > { %v2450_v61 = vmul.f32 %v3764_v47, %v3758_v42  ;;  %v3766_v5 = vpop.eup %3765  ;;  %v2694_v47 = vld [vmem:[#allocation11 + $0x198] sm:$0xff] }
 0x700   : > { %v2447_v36 = vmul.f32 %v3766_v5, %v4868_v14  ;;  %v2693_v5 = vld [vmem:[#allocation11 + $0x190] sm:$0xff] }
 0x701   : > { %2484 = vperm.xlu0 %3505, %v2450_v61  }
 0x702   : > { %v3768_v60 = vpop.eup %3767 }
 0x703   : > { %v3770_v10 = vpop.eup %3769  ;;  %v2451_v59 = vmul.f32 %v3768_v60, %v3762_v58  ;;  %v2673_v58 = vld [vmem:[#allocation11 + $0xf0] sm:$0xff] }
 0x704   : > { %v3772_v54 = vpop.eup %3771  ;;  %v2445_v43 = vmul.f32 %v3770_v10, %v4870_v23  ;;  %2708 = vmatpush1.msra.mxu0 %v2673_v58  ;;  %v2670_v23 = vld [vmem:[#allocation11 + $0xd8] sm:$0xff]  ;;  %v3791_v60 = vld [vmem:[%s4329_s19 + $0x70] sm:$0xff] }
 0x705   : > { %2489 = vperm.xlu1 %3506, %v2451_v59   ;;  %2469 = vperm.xlu0 %3505, %v2447_v36   ;;  %v2449_v40 = vmul.f32 %v3772_v54, %v4878_v35  ;;  %v3774_v27 = vpop.eup %3773  ;;  %v2671_v35 = vld [vmem:[#allocation11 + $0xe0] sm:$0xff]  ;;  %v3792_v59 = vld [vmem:[%s4329_s19 + $0x78] sm:$0xff]  ;;  %v2692_v54 = vld [vmem:[#allocation11 + $0x188] sm:$0xff] }
 0x706   : > { %v2448_v42 = vmul.f32 %v3774_v27, %v4876_v16  ;;  %v3776_v28 = vpop.eup %3775  ;;  %2709 = vmatprep.subr.mxu0 %v2672_v18  ;;  %v2668_v16 = vld [vmem:[#allocation11 + $0xc8] sm:$0xff]  ;;  %v2691_v27 = vld [vmem:[#allocation11 + $0x180] sm:$0xff]  ;;  %v3796_v58 = vld [vmem:[%s4329_s19 + $0x58] sm:$0xff] }
 0x707   : > { %v2446_v34 = vmul.f32 %v3776_v28, %v4880_v31  ;;  %v3778_v39 = vpop.eup %3777  ;;  %2710 = vmatpush1.msra.mxu0 %v2671_v35  ;;  %v2666_v31 = vld [vmem:[#allocation11 + $0xb8] sm:$0xff]  ;;  %v2689_v35 = vld [vmem:[#allocation11 + $0x170] sm:$0xff] }
 0x708   : > { %v2444_v14 = vmul.f32 %v3778_v39, %v4888_v44  ;;  %2711 = vmatprep.subr.mxu0 %v2670_v23  ;;  %v2664_v44 = vld [vmem:[#allocation11 + $0xa8] sm:$0xff]  ;;  %v2690_v39 = vld [vmem:[#allocation11 + $0x178] sm:$0xff] }
 0x709   : > { %2479 = vperm.xlu1 %3506, %v2449_v40   ;;  %2459 = vperm.xlu0 %3505, %v2445_v43   ;;  %v3793_v40 = vld [vmem:[%s4329_s19 + $0x68] sm:$0xff] }
 0x70a   : > { %2712 = vmatpush1.msra.mxu0 %v2669_v26  ;;  %v2688_v26 = vld [vmem:[#allocation11 + $0x168] sm:$0xff] }
 0x70b   : > { %2713 = vmatprep.subr.mxu0 %v2668_v16  ;;  %v2687_v16 = vld [vmem:[#allocation11 + $0x160] sm:$0xff] }
 0x70c   : > { %2714 = vmatpush1.msra.mxu0 %v2667_v15 }
 0x70d   : > { %2474 = vperm.xlu1 %3506, %v2448_v42   ;;  %2715 = vmatprep.subr.mxu0 %v2666_v31  ;;  %v3794_v42 = vld [vmem:[%s4329_s19 + $0x60] sm:$0xff]  ;;  %v2686_v31 = vld [vmem:[#allocation11 + $0x158] sm:$0xff] }
 0x70e   : > { %2716 = vmatpush1.msra.mxu0 %v2665_v11  ;;  %v3797_v11 = vld [vmem:[%s4329_s19 + $0x40] sm:$0xff] }
 0x70f   : > { %2717 = vmatprep.subr.mxu0 %v2664_v44 }
 0x710   : > { %2718 = vmatpush1.msra.mxu0 %v2663_v4  ;;  %v3798_v4 = vld [vmem:[%s4329_s19 + $0x48] sm:$0xff] }
 0x711   : > { %2464 = vperm.xlu1 %3506, %v2446_v34   ;;  %2719 = vmatprep.subr.mxu0 %v2662_v52 }
 0x712   : > { %2720 = vmatpush1.msra.mxu0 %v2661_v56  ;;  %v2685_v56 = vld [vmem:[#allocation11 + $0x150] sm:$0xff] }
 0x713   : > { %2721 = vmatprep.subr.mxu0 %v2660_v48  ;;  %v2684_v48 = vld [vmem:[#allocation11 + $0x148] sm:$0xff] }
 0x714   : > { %2722 = vmatpush1.msra.mxu0 %v2659_v1  ;;  %v3799_v1 = vld [vmem:[%s4329_s19 + $0x38] sm:$0xff] }
 0x715   : > { %2454 = vperm.xlu1 %3506, %v2444_v14   ;;  %2723 = vmatprep.subr.mxu0 %v2658_v51  ;;  %v3795_v14 = vld [vmem:[%s4329_s19 + $0x50] sm:$0xff] }
 0x716   : > { %2724 = vmatpush1.msra.mxu0 %v2657_v55  ;;  %v2683_v55 = vld [vmem:[#allocation11 + $0x140] sm:$0xff] }
 0x717   : > { %2725 = vmatprep.subr.mxu0 %v2656_v50  ;;  %v3800_v50 = vld [vmem:[%s4329_s19 + $0x30] sm:$0xff] }
 0x718   : > { %2726 = vmatpush1.msra.mxu0 %v2655_v49 }
 0x719   : > { %2727 = vmatprep.subr.mxu0 %v2654_v33 }
 0x71a   : > { %2728 = vmatpush1.msra.mxu0 %v2653_v53 }
 0x71b   : > { %2729 = vmatprep.subr.mxu0 %v2652_v20  ;;  %v2682_v20 = vld [vmem:[#allocation11 + $0x138] sm:$0xff] }
 0x71c   : > { %2730 = vmatpush1.msra.mxu0 %v2651_v41  ;;  %v3801_v41 = vld [vmem:[%s4329_s19 + $0x20] sm:$0xff] }
 0x71d   : > { %2731 = vmatprep.subr.mxu0 %v2650_v32 }
 0x71e   : > { %2732 = vmatpush1.msra.mxu0 %v2649_v9  ;;  %v3802_v9 = vld [vmem:[%s4329_s19 + $0x28] sm:$0xff] }
 0x71f   : > { %2733 = vmatprep.subr.mxu0 %v2648_v46 }
 0x720   : > { %2734 = vmatpush1.msra.mxu0 %v2647_v2  ;;  %v2681_v2 = vld [vmem:[#allocation11 + $0x130] sm:$0xff] }
 0x721   : > { %2735 = vmatprep.subr.mxu0 %v2646_v30  ;;  %v2680_v30 = vld [vmem:[#allocation11 + $0x128] sm:$0xff] }
 0x722   : > { %2736 = vmatpush1.msra.mxu0 %v2645_v17  ;;  %v3803_v17 = vld [vmem:[%s4329_s19 + $0x18] sm:$0xff] }
 0x723   : > { %2737 = vmatprep.subr.mxu0 %v2644_v13 }
 0x724   : > { %2738 = vmatpush1.msra.mxu0 %v2643_v22  ;;  %v2679_v22 = vld [vmem:[#allocation11 + $0x120] sm:$0xff] }
 0x725   : > { %2739 = vmatprep.subr.mxu0 %v2706_v24  ;;  %v3804_v24 = vld [vmem:[%s4329_s19 + $0x10] sm:$0xff] }
 0x726   : > { %2740 = vmatpush2.msra.mxu0 %v2705_v63 }
 0x727   : > { %2741 = vmatprep.subr.mxu0 %v2704_v25 }
 0x728   : > { %2742 = vmatpush2.msra.mxu0 %v2703_v12  ;;  %v3805_v12 = vld [vmem:[%s4329_s19] sm:$0xff] }
 0x729   : > { %2743 = vmatprep.subr.mxu0 %v2702_v8 }
 0x72a   : > { %2744 = vmatpush2.msra.mxu0 %v2701_v21  ;;  %v3806_v21 = vld [vmem:[%s4329_s19 + $0x8] sm:$0xff]  ;;  %s639_s19 = scalar_lea.vmem [#allocation13], %s5115_s12 }
 0x72b   : > { %2745 = vmatprep.subr.mxu0 %v2700_v3 }
 0x72c   : > { %2746 = vmatpush2.msra.mxu0 %v2699_v19  ;;  %v2610_v19 = vld [vmem:[%s5234_s11 + $0xf8] sm:$0xff] }
 0x72d   : > { %2747 = vmatprep.subr.mxu0 %v2698_v62  ;;  %v2609_v62 = vld [vmem:[%s5234_s11 + $0xf0] sm:$0xff] }
 0x72e   : > { %2748 = vmatpush2.msra.mxu0 %v2697_v7  ;;  %v2608_v7 = vld [vmem:[%s5234_s11 + $0xe8] sm:$0xff] }
 0x72f   : > { %2749 = vmatprep.subr.mxu0 %v2696_v37  ;;  %v3807_v37 = vld [vmem:[%s5226_s3] sm:$0xff] }
 0x730   : > { %2750 = vmatpush2.msra.mxu0 %v2695_v57  ;;  %v2607_v57 = vld [vmem:[%s5234_s11 + $0xe0] sm:$0xff] }
 0x731   : > { %2751 = vmatprep.subr.mxu0 %v2694_v47  ;;  %v2606_v47 = vld [vmem:[%s5234_s11 + $0xd8] sm:$0xff] }
 0x732   : > { %2752 = vmatpush2.msra.mxu0 %v2693_v5  ;;  %v2603_v5 = vld [vmem:[%s5234_s11 + $0xc0] sm:$0xff] }
 0x733   : > { %2753 = vmatprep.subr.mxu0 %v2692_v54  ;;  %v2597_v54 = vld [vmem:[%s5234_s11 + $0x90] sm:$0xff] }
 0x734   : > { %2754 = vmatpush2.msra.mxu0 %v2691_v27  ;;  %v2594_v27 = vld [vmem:[%s5234_s11 + $0x78] sm:$0xff] }
 0x735   : > { %2755 = vmatprep.subr.mxu0 %v2690_v39  ;;  %v2590_v39 = vld [vmem:[%s5234_s11 + $0x58] sm:$0xff] }
 0x736   : > { %2756 = vmatpush2.msra.mxu0 %v2689_v35  ;;  %v2585_v35 = vld [vmem:[%s5234_s11 + $0x30] sm:$0xff] }
 0x737   : > { %2757 = vmatprep.subr.mxu0 %v2688_v26  ;;  %v2583_v26 = vld [vmem:[%s5234_s11 + $0x20] sm:$0xff] }
 0x738   : > { %2758 = vmatpush2.msra.mxu0 %v2687_v16  ;;  %v2582_v16 = vld [vmem:[%s5234_s11 + $0x18] sm:$0xff] }
 0x739   : > { %2759 = vmatprep.subr.mxu0 %v2686_v31  ;;  %v2580_v31 = vld [vmem:[%s5234_s11 + $0x8] sm:$0xff] }
 0x73a   : > { %2760 = vmatpush2.msra.mxu0 %v2685_v56  ;;  %v2639_v56 = vld [vmem:[%s5234_s11 + $0x1e0] sm:$0xff] }
 0x73b   : > { %2761 = vmatprep.subr.mxu0 %v2684_v48  ;;  %v2638_v48 = vld [vmem:[%s5234_s11 + $0x1d8] sm:$0xff] }
 0x73c   : > { %2762 = vmatpush2.msra.mxu0 %v2683_v55  ;;  %v2635_v55 = vld [vmem:[%s5234_s11 + $0x1c0] sm:$0xff] }
 0x73d   : > { %2763 = vmatprep.subr.mxu0 %v2682_v20  ;;  %v2630_v20 = vld [vmem:[%s5234_s11 + $0x198] sm:$0xff] }
 0x73e   : > { %2764 = vmatpush2.msra.mxu0 %v2681_v2  ;;  %v2625_v2 = vld [vmem:[%s5234_s11 + $0x170] sm:$0xff] }
 0x73f   : > { %2765 = vmatprep.subr.mxu0 %v2680_v30  ;;  %v2624_v30 = vld [vmem:[%s5234_s11 + $0x168] sm:$0xff] }
 0x740   : > { %2766 = vmatpush2.msra.mxu0 %v2679_v22  ;;  %v2621_v22 = vld [vmem:[%s5234_s11 + $0x150] sm:$0xff] }
 0x77c   : > { %v2485_v61 = vpop.permute.xlu0 %2484 }
 0x77d   : > { %v2505_v43 = vmul.f32 %v3793_v40, %v2485_v61  ;;  %v2504_v28 = vmul.f32 %v3794_v42, %v2485_v61  ;;  %v2605_v61 = vld [vmem:[%s5234_s11 + $0xd0] sm:$0xff]  ;;  %v2596_v40 = vld [vmem:[%s5234_s11 + $0x88] sm:$0xff] }
 0x77e   : > { %v2593_v42 = vld [vmem:[%s5234_s11 + $0x70] sm:$0xff] }
 0x780   : > { %v2490_v29 = vpop.permute.xlu1 %2489  ;;  %v2470_v23 = vpop.permute.xlu0 %2469 }
 0x781   : > { %v2506_v10 = vmul.f32 %v3791_v60, %v2490_v29  ;;  %v2507_v36 = vmul.f32 %v3792_v59, %v2490_v29  ;;  %v2499_v51 = vmul.f32 %v3799_v1, %v2470_v23  ;;  %v2498_v49 = vmul.f32 %v3800_v50, %v2470_v23  ;;  %v2604_v29 = vld [vmem:[%s5234_s11 + $0xc8] sm:$0xff]  ;;  %v2601_v60 = vld [vmem:[%s5234_s11 + $0xb0] sm:$0xff]  ;;  %v2599_v59 = vld [vmem:[%s5234_s11 + $0xa0] sm:$0xff] }
 0x782   : > { %v2584_v23 = vld [vmem:[%s5234_s11 + $0x28] sm:$0xff]  ;;  %v2637_v1 = vld [vmem:[%s5234_s11 + $0x1d0] sm:$0xff]  ;;  %v2634_v50 = vld [vmem:[%s5234_s11 + $0x1b8] sm:$0xff] }
 0x783   : > { %2524 = vmatprep.subr.mxu1 %v2507_v36  ;;  %v2598_v36 = vld [vmem:[%s5234_s11 + $0x98] sm:$0xff] }
 0x784   : > { %2525 = vmatpush1.msra.mxu1 %v2506_v10  ;;  %v2480_v34 = vpop.permute.xlu1 %2479  ;;  %v2460_v33 = vpop.permute.xlu0 %2459  ;;  %v2600_v10 = vld [vmem:[%s5234_s11 + $0xa8] sm:$0xff] }
 0x785   : > { %v2502_v0 = vmul.f32 %v3795_v14, %v2480_v34  ;;  %v2503_v18 = vmul.f32 %v3796_v58, %v2480_v34  ;;  %2526 = vmatprep.subr.mxu1 %v2505_v43  ;;  %v2495_v13 = vmul.f32 %v3803_v17, %v2460_v33  ;;  %v2494_v63 = vmul.f32 %v3804_v24, %v2460_v33  ;;  %v2595_v43 = vld [vmem:[%s5234_s11 + $0x80] sm:$0xff]  ;;  %v2589_v14 = vld [vmem:[%s5234_s11 + $0x50] sm:$0xff]  ;;  %v2632_v33 = vld [vmem:[%s5234_s11 + $0x1a8] sm:$0xff] }
 0x786   : > { %2527 = vmatpush1.msra.mxu1 %v2504_v28  ;;  %v2592_v28 = vld [vmem:[%s5234_s11 + $0x68] sm:$0xff]  ;;  %v2591_v34 = vld [vmem:[%s5234_s11 + $0x60] sm:$0xff] }
 0x787   : > { %2528 = vmatprep.subr.mxu1 %v2503_v18  ;;  %v2587_v58 = vld [vmem:[%s5234_s11 + $0x40] sm:$0xff]  ;;  %v2586_v18 = vld [vmem:[%s5234_s11 + $0x38] sm:$0xff]  ;;  %v2620_v24 = vld [vmem:[%s5234_s11 + $0x148] sm:$0xff] }
 0x788   : > { %v2475_v15 = vpop.permute.xlu1 %2474  ;;  %2529 = vmatpush1.msra.mxu1 %v2502_v0  ;;  %v2588_v0 = vld [vmem:[%s5234_s11 + $0x48] sm:$0xff]  ;;  %v2623_v17 = vld [vmem:[%s5234_s11 + $0x160] sm:$0xff] }
 0x789   : > { %v2500_v44 = vmul.f32 %v3797_v11, %v2475_v15  ;;  %v2501_v52 = vmul.f32 %v3798_v4, %v2475_v15  ;;  %v2581_v15 = vld [vmem:[%s5234_s11 + $0x10] sm:$0xff]  ;;  %v2579_v11 = vld [vmem:[%s5234_s11] sm:$0xff] }
 0x78a   : > { %v2641_v4 = vld [vmem:[%s5234_s11 + $0x1f0] sm:$0xff] }
 0x78b   : > { %2530 = vmatprep.subr.mxu1 %v2501_v52  ;;  %v2640_v52 = vld [vmem:[%s5234_s11 + $0x1e8] sm:$0xff] }
 0x78c   : > { %v2465_v53 = vpop.permute.xlu1 %2464  ;;  %2531 = vmatpush1.msra.mxu1 %v2500_v44  ;;  %v2642_v44 = vld [vmem:[%s5234_s11 + $0x1f8] sm:$0xff] }
 0x78d   : > { %v2496_v32 = vmul.f32 %v3801_v41, %v2465_v53  ;;  %v2497_v46 = vmul.f32 %v3802_v9, %v2465_v53  ;;  %2532 = vmatprep.subr.mxu1 %v2499_v51  ;;  %v2636_v51 = vld [vmem:[%s5234_s11 + $0x1c8] sm:$0xff]  ;;  %v2631_v53 = vld [vmem:[%s5234_s11 + $0x1a0] sm:$0xff]  ;;  %v2629_v41 = vld [vmem:[%s5234_s11 + $0x190] sm:$0xff] }
 0x78e   : > { %2533 = vmatpush1.msra.mxu1 %v2498_v49  ;;  %v2633_v49 = vld [vmem:[%s5234_s11 + $0x1b0] sm:$0xff]  ;;  %v2627_v9 = vld [vmem:[%s5234_s11 + $0x180] sm:$0xff] }
 0x78f   : > { %2534 = vmatprep.subr.mxu1 %v2497_v46  ;;  %v2626_v46 = vld [vmem:[%s5234_s11 + $0x178] sm:$0xff] }
 0x790   : > { %v2455_v25 = vpop.permute.xlu1 %2454  ;;  %2535 = vmatpush1.msra.mxu1 %v2496_v32  ;;  %v2628_v32 = vld [vmem:[%s5234_s11 + $0x188] sm:$0xff] }
 0x791   : > { %v2492_v8 = vmul.f32 %v3805_v12, %v2455_v25  ;;  %v2493_v3 = vmul.f32 %v3806_v21, %v2455_v25  ;;  %2536 = vmatprep.subr.mxu1 %v2495_v13  ;;  %v2622_v13 = vld [vmem:[%s5234_s11 + $0x158] sm:$0xff]  ;;  %v2617_v12 = vld [vmem:[%s5234_s11 + $0x130] sm:$0xff]  ;;  %v2615_v21 = vld [vmem:[%s5234_s11 + $0x120] sm:$0xff] }
 0x792   : > { %2537 = vmatpush1.msra.mxu1 %v2494_v63  ;;  %v2619_v63 = vld [vmem:[%s5234_s11 + $0x140] sm:$0xff]  ;;  %v2618_v25 = vld [vmem:[%s5234_s11 + $0x138] sm:$0xff] }
 0x793   : > { %2538 = vmatprep.subr.mxu1 %v2493_v3  ;;  %v2614_v3 = vld [vmem:[%s5234_s11 + $0x118] sm:$0xff] }
 0x794   : > { %2539 = vmatpush1.msra.mxu1 %v2492_v8  ;;  %v2616_v8 = vld [vmem:[%s5234_s11 + $0x128] sm:$0xff] }
 0x795   : > { %3273 = vmatmul.mubr.msk.f32.vlgmr.msra.gmra.mxu1 %vm1318_vm1, %v3807_v37  ;;  %2778 = vmatprep.subr.mxu1 %v2610_v19  ;;  %v2613_v19 = vld [vmem:[%s5234_s11 + $0x110] sm:$0xff]  ;;  %v2678_v37 = vld [vmem:[#allocation11 + $0x118] sm:$0xff] }
 0x796   : > { %2779 = vmatpush1.msra.mxu1 %v2609_v62  ;;  %2842 = vmatprep.mubr.f32.mxu1 %v4633_v6  ;;  %v2602_v6 = vld [vmem:[%s5234_s11 + $0xb8] sm:$0xff]  ;;  %v2612_v62 = vld [vmem:[%s5234_s11 + $0x108] sm:$0xff] }
 0x797   : > { %2780 = vmatprep.subr.mxu1 %v2608_v7  ;;  %v2611_v7 = vld [vmem:[%s5234_s11 + $0x100] sm:$0xff]  ;;  %2767 = vmatprep.subr.mxu0 %v2678_v37 }
 0x798   : > { %2781 = vmatpush1.msra.mxu1 %v2607_v57  ;;  %v2677_v57 = vld [vmem:[#allocation11 + $0x110] sm:$0xff] }
 0x799   : > { %2782 = vmatprep.subr.mxu1 %v2606_v47  ;;  %2768 = vmatpush2.msra.mxu0 %v2677_v57  ;;  %v2676_v47 = vld [vmem:[#allocation11 + $0x108] sm:$0xff] }
 0x79a   : > { %2783 = vmatpush1.msra.mxu1 %v2605_v61  ;;  %v2675_v61 = vld [vmem:[#allocation11 + $0x100] sm:$0xff]  ;;  %2769 = vmatprep.subr.mxu0 %v2676_v47 }
 0x79b   : > { %2784 = vmatprep.subr.mxu1 %v2604_v29  ;;  %2770 = vmatpush2.msra.mxu0 %v2675_v61 }
 0x79c   : > { %2785 = vmatpush1.msra.mxu1 %v2603_v5 }
 0x79d   : > { %2786 = vmatprep.subr.mxu1 %v2602_v6 }
 0x79e   : > { %2787 = vmatpush1.msra.mxu1 %v2601_v60 }
 0x79f   : > { %2788 = vmatprep.subr.mxu1 %v2600_v10 }
 0x7a0   : > { %2789 = vmatpush1.msra.mxu1 %v2599_v59  ;;  %v2850_v59 = vstv %s2849_s27  ;;  %s2939_s27 = sshll.u32 %s639_s19, 4  ;;  %s2940_s27 = int_to_ptr.vmem [resolvable:$true] %s2939_s27 }
 0x7a1   : > { %2790 = vmatprep.subr.mxu1 %v2598_v36  ;;  %p3947_p5 = scmp.lt.s32.totalorder %s2940_s27, %s3945_s17 }
 0x7a2   : > { %2791 = vmatpush1.msra.mxu1 %v2597_v54 }
 0x7a3   : > { %2792 = vmatprep.subr.mxu1 %v2596_v40 }
 0x7a4   : > { %2793 = vmatpush1.msra.mxu1 %v2595_v43 }
 0x7a5   : > { %2794 = vmatprep.subr.mxu1 %v2594_v27 }
 0x7a6   : > { %2795 = vmatpush1.msra.mxu1 %v2593_v42 }
 0x7a7   : > { %2796 = vmatprep.subr.mxu1 %v2592_v28 }
 0x7a8   : > { %2797 = vmatpush1.msra.mxu1 %v2591_v34 }
 0x7a9   : > { %2798 = vmatprep.subr.mxu1 %v2590_v39 }
 0x7aa   : > { %2799 = vmatpush1.msra.mxu1 %v2589_v14 }
 0x7ab   : > { %2800 = vmatprep.subr.mxu1 %v2588_v0 }
 0x7ac   : > { %2801 = vmatpush1.msra.mxu1 %v2587_v58 }
 0x7ad   : > { %2802 = vmatprep.subr.mxu1 %v2586_v18 }
 0x7ae   : > { %2803 = vmatpush1.msra.mxu1 %v2585_v35 }
 0x7af   : > { %2804 = vmatprep.subr.mxu1 %v2584_v23 }
 0x7b0   : > { %2805 = vmatpush1.msra.mxu1 %v2583_v26 }
 0x7b1   : > { %2806 = vmatprep.subr.mxu1 %v2582_v16 }
 0x7b2   : > { %2807 = vmatpush1.msra.mxu1 %v2581_v15 }
 0x7b3   : > { %2808 = vmatprep.subr.mxu1 %v2580_v31 }
 0x7b4   : > { %2809 = vmatpush1.msra.mxu1 %v2579_v11 }
 0x7b5   : > { %2810 = vmatprep.subr.mxu1 %v2642_v44 }
 0x7b6   : > { %2811 = vmatpush2.msra.mxu1 %v2641_v4 }
 0x7b7   : > { %2812 = vmatprep.subr.mxu1 %v2640_v52  ;;  %v2855_v52 = vld [vmem:[%s657_s28] sm:$0xff]  ;;  %s3940_s28 = scalar_lea.vmem %s2940_s27, 128 }
 0x7b8   : > { %2813 = vmatpush2.msra.mxu1 %v2639_v56  ;;  %p3941_p9 = scmp.ne.s32.totalorder %s2940_s27, %s3940_s28  ;;  %p3948_p10 = scmp.lt.s32.totalorder %s3946_s23, %s3940_s28 }
 0x7b9   : > { %2814 = vmatprep.subr.mxu1 %v2638_v48 }
 0x7ba   : > { %2815 = vmatpush2.msra.mxu1 %v2637_v1  ;;  %p3942_p2 = pnand %p3941_p9, %p5304_p13  ;;  %p3949_p3 = por %p3948_p10, %p3947_p5 }
 0x7bb   : > { %2816 = vmatprep.subr.mxu1 %v2636_v51 }
 0x7bc   : > { %2817 = vmatpush2.msra.mxu1 %v2635_v55  ;;  %p3943_p0 = pneg %p3942_p2 }
 0x7bd   : > { %2818 = vmatprep.subr.mxu1 %v2634_v50 }
 0x7be   : > { %2819 = vmatpush2.msra.mxu1 %v2633_v49  ;;  %p3950_p8 = pnand %p3949_p3, %p3943_p0 }
 0x7bf   : > { %2820 = vmatprep.subr.mxu1 %v2632_v33 }
 0x7c0   : > { %2821 = vmatpush2.msra.mxu1 %v2631_v53  ;;  %v2875_v53 = vsub.f32 1.0, %v2855_v52 }
 0x7c1   : > { %2822 = vmatprep.subr.mxu1 %v2630_v20 }
 0x7c2   : > { %2823 = vmatpush2.msra.mxu1 %v2629_v41 }
 0x7c3   : > { %2824 = vmatprep.subr.mxu1 %v2628_v32 }
 0x7c4   : > { %2825 = vmatpush2.msra.mxu1 %v2627_v9  ;;  %v2857_v9 = vand.u32 127, %v2081_v38 }
 0x7c5   : > { %2826 = vmatprep.subr.mxu1 %v2626_v46 }
 0x7c6   : > { %2827 = vmatpush2.msra.mxu1 %v2625_v2  ;;  %vm2858_vm5 = vcmp.lt.s32.totalorder %v2857_v9, 16 }
 0x7c7   : > { %2828 = vmatprep.subr.mxu1 %v2624_v30 }
 0x7c8   : > { %2829 = vmatpush2.msra.mxu1 %v2623_v17 }
 0x7c9   : > { %2830 = vmatprep.subr.mxu1 %v2622_v13 }
 0x7ca   : > { %2831 = vmatpush2.msra.mxu1 %v2621_v22 }
 0x7cb   : > { %2832 = vmatprep.subr.mxu1 %v2620_v24 }
 0x7cc   : > { %2833 = vmatpush2.msra.mxu1 %v2619_v63 }
 0x7cd   : > { %2834 = vmatprep.subr.mxu1 %v2618_v25 }
 0x7ce   : > { %2835 = vmatpush2.msra.mxu1 %v2617_v12 }
 0x7cf   : > { %2836 = vmatprep.subr.mxu1 %v2616_v8 }
 0x7d0   : > { %2837 = vmatpush2.msra.mxu1 %v2615_v21 }
 0x7d1   : > { %2838 = vmatprep.subr.mxu1 %v2614_v3 }
 0x7d2   : > { %2839 = vmatpush2.msra.mxu1 %v2613_v19 }
 0x7d3   : > { %2840 = vmatprep.subr.mxu1 %v2612_v62 }
 0x7d4   : > { %2841 = vmatpush2.msra.mxu1 %v2611_v7 }
 0x7d5   : > { %2843 = vmatmul.mubr.f32.vlgmr.msra.gmra.mxu1 %v4631_v45 }
 0x855   : > { %v2574_v29 = vpop.f32.mrf.mxu1 }
 0x857   : > { %v2576_v5 = vpop.f32.mrf.mxu1 }
 0x858   : > { %2771 = vmatprep.mubr.f32.mxu0 %v2576_v5 }
 0x859   : > { %2772 = vmatmul.mubr.f32.vlgmr.msra.gmra.mxu0 %v2574_v29 }
 0x895   : > { %v2844_v6 = vpop.f32.mrf.mxu1 }
 0x897   : > { %v2846_v60 = vpop.f32.mrf.mxu1 }
 0x919   : > { %v2773_v45 = vpop.f32.mrf.mxu0 }
 0x91a   : > { %v2845_v54 = vadd.f32 %v2844_v6, %v2773_v45 }
 0x91b   : > { %v2775_v10 = vpop.f32.mrf.mxu0 }
 0x91c   : > { %v2847_v36 = vadd.f32 %v2846_v60, %v2775_v10 }
 0x91e   : > { %v2851_v40 = vmul.f32 %v2850_v59, %v2847_v36  ;;  %2854 = vst [vmem:[%s639_s19] sm:$0xff] %v2847_v36 }
 0x920   : > { %v2852_v43 = vadd.f32 %v2851_v40, %v2845_v54 }
 0x922   : > { %v2860_v27 = vand.u32 2147483647, %v2852_v43  ;;  %v2876_v42 = vsub.f32 0.0, %v2852_v43  ;;  %2853 = vst [vmem:[%s5260_s20] sm:$0xff] %v2852_v43  ;;  %v2859_v51 = vmin.f32 %v2852_v43, 0.0 }
 0x924   : > { %v2861_v28 = vsub.f32 0.0, %v2860_v27  ;;  %v2878_v34 = vand.u32 2147483647, %v2876_v42  ;;  %v2877_v20 = vmin.f32 %v2876_v42, 0.0 }
 0x926   : > { %v2862_v39 = vmul.f32 1.442695, %v2861_v28  ;;  %v2879_v14 = vsub.f32 0.0, %v2878_v34 }
 0x928   : > { %3779 = vpow2.f32 %v2862_v39  ;;  %v2880_v0 = vmul.f32 1.442695, %v2879_v14 }
 0x92a   : > { %3781 = vpow2.f32 %v2880_v0 }
 0x935   : > { %v3780_v58 = vpop.eup %3779 }
 0x936   : > { %v2864_v18 = vadd.f32 1.0, %v3780_v58  ;;  %v2867_v26 = vmul.f32 -0.5, %v3780_v58  ;;  %v2870_v31 = vand.u32 2147483647, %v3780_v58 }
 0x937   : > { %v3782_v35 = vpop.eup %3781 }
 0x938   : > { %3783 = vlog2.f32 %v2864_v18  ;;  %v2882_v23 = vadd.f32 1.0, %v3782_v35  ;;  %v2885_v16 = vmul.f32 -0.5, %v3782_v35  ;;  %v2868_v15 = vadd.f32 1.0, %v2867_v26 }
 0x939   : > { %v2888_v4 = vand.u32 2147483647, %v3782_v35  ;;  %vm2871_vm3 = vcmp.lt.f32.partialorder %v2870_v31, 0.0004427343 }
 0x93a   : > { %3785 = vlog2.f32 %v2882_v23  ;;  %v2886_v11 = vadd.f32 1.0, %v2885_v16  ;;  %v2869_v48 = vmul.f32 %v3780_v58, %v2868_v15 }
 0x93b   : > { %vm2889_vm4 = vcmp.lt.f32.partialorder %v2888_v4, 0.0004427343 }
 0x93c   : > { %v2887_v49 = vmul.f32 %v3782_v35, %v2886_v11 }
 0x945   : > { %v3784_v44 = vpop.eup %3783 }
 0x946   : > { %v2866_v56 = vmul.f32 0.6931472, %v3784_v44 }
 0x947   : > { %v3786_v1 = vpop.eup %3785 }
 0x948   : > { %v2872_v55 = vsel %vm2871_vm3, %v2869_v48, %v2866_v56  ;;  %v2884_v50 = vmul.f32 0.6931472, %v3786_v1 }
 0x949   : > { %v2873_v33 = vsub.f32 %v2859_v51, %v2872_v55 }
 0x94a   : > { %v2890_v41 = vsel %vm2889_vm4, %v2887_v49, %v2884_v50 }
 0x94b   : > { %v2891_v32 = vsub.f32 %v2877_v20, %v2890_v41  ;;  %v2874_v46 = vmul.f32 %v2873_v33, %v2855_v52 }
 0x94d   : > { %v2892_v2 = vmul.f32 %v2891_v32, %v2875_v53 }
 0x94f   : > { %v2893_v30 = vadd.f32 %v2892_v2, %v2874_v46 }
 0x951   : > { %v2894_v17 = vsub.f32 0.0, %v2893_v30 }
 0x953   : > { %v2897_v13 = vsel %vm2858_vm5, %v2894_v17, 0.0 }
 0x954   : > { %2898 = vadd.xlane.f32.xlu0 %v2897_v13 }
 0x955   : > { %3953 = shalt.err (!%p3950_p8)
}
 0x956   : > { %s3954_s19 = scalar_lea.hbm %s5137_s21, 128  ;;  %s3958_s0 = scalar_lea.hbm %s5238_s15, 256 }
 0x957   : > { %p3955_p6 = scmp.ne.s32.totalorder %s5137_s21, %s3954_s19  ;;  %p3959_p7 = scmp.lt.s32.totalorder %s5137_s21, %s5238_s15 }
 0x958   : > { %p3960_p12 = scmp.lt.s32.totalorder %s3958_s0, %s3954_s19 }
 0x959   : > { %p3956_p11 = pnand %p3955_p6, %p5304_p13 }
 0x95a   : > { %p3961_p1 = por %p3960_p12, %p3959_p7 }
 0x95b   : > { %p3957_p4 = pneg %p3956_p11 }
 0x95d   : > { %p3962_p9 = pnand %p3961_p1, %p3957_p4 }
 0x95f   : > { %3965 = shalt.err (!%p3962_p9)
}
 0x960   : > { %3415 = dma.vmem_to_hbm [thread:$0]  (%p5304_p13), %s2940_s27, 128, %s5137_s21, %s5147_s7  }
 0x961   : > { %s5305_s28 = scalar_lea.vmem [#allocation12], %s5115_s12  ;;  %s2903_s23 = scalar_lea.sflag [#allocation5], %s4325_s16 }
 0x962   : > { %s2926_s17 = sshll.u32 %s5305_s28, 4  ;;  %s4084_s20 = smov [#allocation12]   ;;  %s2927_s17 = int_to_ptr.vmem [resolvable:$true] %s2926_s17 }
 0x963   : > { %s3966_s8 = scalar_lea.vmem %s2927_s17, 128  ;;  %s3970_s19 = sshll.u32 %s4084_s20, 4  ;;  %s3971_s19 = int_to_ptr.vmem [resolvable:$false] %s3970_s19 }
 0x964   : > { %p3967_p2 = scmp.ne.s32.totalorder %s2927_s17, %s3966_s8  ;;  %s3972_s25 = scalar_lea.vmem %s3971_s19, 256 }
 0x965   : > { %p3973_p10 = scmp.lt.s32.totalorder %s2927_s17, %s3971_s19  ;;  %p3974_p3 = scmp.lt.s32.totalorder %s3972_s25, %s3966_s8 }
 0x966   : > { %p3968_p0 = pnand %p3967_p2, %p5304_p13 }
 0x967   : > { %p3975_p8 = por %p3974_p3, %p3973_p10 }
 0x968   : > { %p3969_p5 = pneg %p3968_p0 }
 0x96a   : > { %p3976_p6 = pnand %p3975_p8, %p3969_p5 }
 0x96c   : > { %3979 = shalt.err (!%p3976_p6)
}
 0x96d   : > { %s3980_s21 = scalar_lea.hbm %s5145_s5, 128  ;;  %s3984_s0 = scalar_lea.hbm %s5237_s14, 256 }
 0x96e   : > { %p3981_p11 = scmp.ne.s32.totalorder %s5145_s5, %s3980_s21  ;;  %p3985_p12 = scmp.lt.s32.totalorder %s5145_s5, %s5237_s14 }
 0x96f   : > { %p3986_p1 = scmp.lt.s32.totalorder %s3984_s0, %s3980_s21 }
 0x970   : > { %p3982_p4 = pnand %p3981_p11, %p5304_p13 }
 0x971   : > { %p3987_p9 = por %p3986_p1, %p3985_p12 }
 0x972   : > { %p3983_p7 = pneg %p3982_p4 }
 0x974   : > { %p3988_p2 = pnand %p3987_p9, %p3983_p7 }
 0x976   : > { %3991 = shalt.err (!%p3988_p2)
}
 0x977   : > { %3414 = dma.vmem_to_hbm [thread:$0]  (%p5304_p13), %s2927_s17, 128, %s5145_s5, %s2903_s23  }
 0x978   : > { %s646_s8 = scalar_lea.vmem [#allocation15], %s5115_s12  ;;  %s5306_s16 = sld [smem:[#allocation36_spill]] }
 0x979   : > { %s2952_s20 = sshll.u32 %s646_s8, 4  ;;  %s4085_s0 = smov [#allocation15]   ;;  %s2953_s20 = int_to_ptr.vmem [resolvable:$true] %s2952_s20 }
 0x97a   : > { %s3992_s21 = scalar_lea.vmem %s2953_s20, 128  ;;  %s3996_s13 = sshll.u32 %s4085_s0, 4  ;;  %s3997_s13 = int_to_ptr.vmem [resolvable:$false] %s3996_s13 }
 0x97b   : > { %p3993_p0 = scmp.ne.s32.totalorder %s2953_s20, %s3992_s21  ;;  %s3998_s28 = scalar_lea.vmem %s3997_s13, 256 }
 0x97c   : > { %p3999_p3 = scmp.lt.s32.totalorder %s2953_s20, %s3997_s13  ;;  %p4000_p8 = scmp.lt.s32.totalorder %s3998_s28, %s3992_s21 }
 0x97d   : > { %p3994_p5 = pnand %p3993_p0, %p5304_p13 }
 0x97e   : > { %s2950_s27 = scalar_lea.hbm %s5306_s16, %s5131_s30  ;;  %p4001_p6 = por %p4000_p8, %p3999_p3 }
 0x97f   : > { %p3995_p10 = pneg %p3994_p5 }
 0x981   : > { %p4002_p11 = pnand %p4001_p6, %p3995_p10 }
 0x9dd   : > { %v2899_v38 = vpop.xlane.xlu0 %2898 }
 0x9de   : > { %v2900_v22 = vmul.f32 0.0625, %v2899_v38 }
 0x9e0   : > { %2901 = vst [vmem:[%s646_s8] sm:$0xff] %v2900_v22 }
 0x9e1   : > { %4005 = shalt.err (!%p4002_p11)
}
 0x9e2   : > { %s4006_s12 = scalar_lea.hbm %s2950_s27, 128  ;;  %s4010_s17 = scalar_lea.hbm %s5306_s16, 256 }
 0x9e3   : > { %p4007_p4 = scmp.ne.s32.totalorder %s2950_s27, %s4006_s12  ;;  %p4011_p1 = scmp.lt.s32.totalorder %s2950_s27, %s5306_s16 }
 0x9e4   : > { %p4012_p9 = scmp.lt.s32.totalorder %s4010_s17, %s4006_s12 }
 0x9e5   : > { %p4008_p7 = pnand %p4007_p4, %p5304_p13 }
 0x9e6   : > { %p4013_p2 = por %p4012_p9, %p4011_p1 }
 0x9e7   : > { %p4009_p12 = pneg %p4008_p7 }
 0x9e9   : > { %p4014_p0 = pnand %p4013_p2, %p4009_p12 }
 0x9eb   : > { %4017 = shalt.err (!%p4014_p0)
}
 0x9ec   : > { %3416 = dma.vmem_to_hbm [thread:$0]  (%p5304_p13), %s2953_s20, 128, %s2950_s27, %s5147_s7  }
 0x9ed PF: > { %s5307_s19 = sld [smem:[#allocation21_spill]]  ;;  %p5310_p10 = scmp.ge.s32.totalorder %s4068_s26, 2 }
 0x9ee   : > { %s5308_s25 = sld [smem:[#allocation23_spill]] }
 0x9f3   : > { %s2964_s21 = sand.u32 1, %s5307_s19  }
 0x9f4   : > { %p5309_p5 = scmp.ne.s32.totalorder %s5308_s25, 0  ;;  %s2965_s0 = scalar_lea.sflag [#allocation5], %s2964_s21 }
 0x9f6   : > { %p3438_p3 = pnand %p5310_p10, %p5309_p5 }
 0x9f8   : > { %p3439_p8 = pneg %p3438_p3 }
 0x9fa   : > { %4047 = dma.done.wait (%p3439_p8), %s2965_s0, 128  }
 0x9fb   : > { %4049 = vsyncadd (%p3439_p8), %s2965_s0, 4294967168  ;;  %s5311_s13 = sadd.s32 4294967294, %s4068_s26  }
 0x9fc   : > { %s2973_s28 = sand.u32 1, %s5311_s13  }
 0x9fd   : > { %s2974_s12 = scalar_lea.sflag [#allocation14], %s2973_s28 }
 0x9fe   : > { %4051 = dma.done.wait (%p3439_p8), %s2974_s12, 256  }
 0x9ff   : > { %4053 = vsyncadd (%p3439_p8), %s2974_s12, 4294967040  ;;  %s5312_s18 = sld [smem:[#allocation22_spill]]  ;;  %p36_p13 = scmp.ge.s32.totalorder %s4267_s29, 4  }
 0xa00   : > { %s5313_s25 = sld [smem:[#allocation24_spill]]  ;;  %s5314_s23 = smov %s4060_s24 }
 0xa01   : > { %s5316_s26 = smov %s4267_s29  ;;  %38 = sbr.rel (!%p36_p13) target bundleno = 17 (0x11), region = 175 }
 0xa05   : > { %s5315_s24 = smov %s5312_s18 }
 0xa06   :  { %2988 = vsyncpa [#allocation4], 1 }
 0xa07   :  { %2990 = vsyncpa [#allocation4 + $0x1], 1 }
 0xa08   :  { %2991 = vsyncpa [#allocation7], 1 }
 0xa09   :  { %2992 = vsyncpa [#allocation10], 1 }
 0xa0a   :  { %2993 = vsyncpa [#allocation5], 1 }
 0xa0b   :  { %2995 = vsyncpa [#allocation5 + $0x1], 1 }
 0xa0c   :  { %2996 = vsyncpa [#allocation14], 1 }
 0xa0d   :  { %2998 = vsyncpa [#allocation14 + $0x1], 1 }

</bundles_post_ra>
